<compile_context>
chip_gen: v7x
topology: tpu7x:2x2x1
jax: 0.10.0
libtpu: 0.0.40
codegen_flags: <defaults>
</compile_context>

<pallas_src>
import math

import jax
import jax.numpy as jnp
from jax.experimental import pallas as pl
from jax.experimental.pallas import tpu as pltpu

# ---------------- deterministic hyper-parameters ----------------
B = 2
T = 16            # max_len_pad (sequence length)
DIM_F0 = 8        # input channels (dim_f0)
DIM_ENC_3 = 16    # conv channels (dim_enc_3)
CHS_GRP = 4       # channels per group  -> 4 groups
DIM_NECK_3 = 4    # LSTM hidden per direction
FREQ_3 = 4
KSIZE = 5
PAD = (KSIZE - 1) // 2
EPS = 1e-5

H = DIM_NECK_3
G4 = 4 * H                      # gate width per direction (i,f,g,o)
NCODE = T // FREQ_3             # number of code frames


def _sigmoid(z):
    return 1.0 / (1.0 + jnp.exp(-z))


# ======================= fused Pallas kernel =======================

def _make_kernel(bb):
    """Kernel processing `bb` batch elements per grid step."""
    BT = bb * T
    R2 = 2 * bb                 # stacked carry rows: [fwd batches | bwd batches]
    f32 = jnp.float32

    def _pairwise_sum(terms):
        while len(terms) > 1:
            nxt = [terms[i] + terms[i + 1] for i in range(0, len(terms) - 1, 2)]
            if len(terms) % 2:
                nxt.append(terms[-1])
            terms = nxt
        return terms[0]

    def kernel(x_ref, s_ref, pmat_ref, gmat_ref,
               w1_ref, b1_ref, gw1_ref, gb1_ref,
               w2_ref, b2_ref, gw2_ref, gb2_ref,
               w3_ref, b3_ref, gw3_ref, gb3_ref,
               wi_ref, bi_ref, qf_ref, qb_ref, whhb_ref,
               codes_ref):
        # x_ref:     (bb*T, dim_f0)      batch-major flat input slab
        # s_ref:     (K, bb*T, bb*T)     conv shift-selection operators
        # pmat_ref:  (bb*T, bb*T)        per-batch time-average operator
        # gmat_ref:  (C, C)              channel-group-average operator
        # w*_ref:    (K, Cin, Cout)      conv weights ; b/gw/gb: (1, Cout)
        # wi_ref:    (C, 2*4H)  bi_ref: (1, 2*4H)
        # qf/qb_ref: (T*2bb, bb*T)       gate-input gather operators
        # whhb_ref:  (H, 2bb, 4H)        direction-pre-broadcast W_hh rows
        # codes_ref: (bb, NCODE, 2H)

        # ---- 3 x [Conv1d(k=5,pad=2) -> GroupNorm -> ReLU], VMEM resident ----
        def conv_gn_relu(xf, w_ref, b_ref, gw_ref, gb_ref):
            # 5-tap conv: y = bias + sum_k (S_k @ x) @ W_k   (idle-MXU shifts,
            # boundary zeros baked into S_k -> no pad/slice/concat copies).
            y = b_ref[...] + jnp.dot(
                jnp.dot(s_ref[0], xf, preferred_element_type=f32),
                w_ref[0], preferred_element_type=f32)
            for k in range(1, KSIZE):
                y = y + jnp.dot(
                    jnp.dot(s_ref[k], xf, preferred_element_type=f32),
                    w_ref[k], preferred_element_type=f32)
            # GroupNorm stats via constant averaging operators, centered variance.
            pmat = pmat_ref[...]
            gmat = gmat_ref[...]
            mean = jnp.dot(jnp.dot(pmat, y, preferred_element_type=f32), gmat,
                           preferred_element_type=f32)
            d = y - mean
            var = jnp.dot(jnp.dot(pmat, d * d, preferred_element_type=f32), gmat,
                          preferred_element_type=f32)
            yn = d * jax.lax.rsqrt(var + EPS)
            return jnp.maximum(yn * gw_ref[...] + gb_ref[...], 0.0)

        xf = x_ref[...].astype(f32)
        xf = conv_gn_relu(xf, w1_ref, b1_ref, gw1_ref, gb1_ref)
        xf = conv_gn_relu(xf, w2_ref, b2_ref, gw2_ref, gb2_ref)
        xf = conv_gn_relu(xf, w3_ref, b3_ref, gw3_ref, gb3_ref)

        # ---- bidirectional LSTM, batch + direction stacked on sublanes ----
        # Input projection for both directions in one matmul.
        xw = jnp.dot(xf, wi_ref[...], preferred_element_type=f32) + bi_ref[...]
        # Hoisted per-step gate inputs: row s*R2+r holds fwd batch r at time s
        # (r < bb) / bwd batch r-bb at time T-1-s (r >= bb).  Built once with two
        # constant permutation matmuls -> nothing but a static slice per step.
        g_in_all = (jnp.dot(qf_ref[...], xw[:, 0:G4], preferred_element_type=f32)
                    + jnp.dot(qb_ref[...], xw[:, G4:2 * G4],
                              preferred_element_type=f32))       # (T*R2, 4H)

        whh_rows = [whhb_ref[j] for j in range(H)]               # each (R2, 4H)
        lane = jax.lax.broadcasted_iota(jnp.int32, (R2, G4), 1)
        gsel = (lane >= 2 * H) & (lane < 3 * H)                  # 'g' gate lanes

        h = jnp.zeros((R2, H), f32)
        c = jnp.zeros((R2, H), f32)
        for s in range(T):                                       # static unroll
            g_in = g_in_all[s * R2:(s + 1) * R2, :]
            # recurrent update on the VPU (exact f32, no per-step MXU round trip)
            rec = _pairwise_sum([h[:, j:j + 1] * whh_rows[j] for j in range(H)])
            gates = g_in + rec
            # all four gates from 2 full-width EUP pushes
            sig = 0.5 * jnp.tanh(0.5 * gates) + 0.5              # sigmoid(gates)
            tnh = jnp.tanh(gates)
            act = jnp.where(gsel, tnh, sig)                      # [i | f | g | o]
            i_g = act[:, 0:H]
            f_g = act[:, H:2 * H]
            g_g = act[:, 2 * H:3 * H]
            o_g = act[:, 3 * H:4 * H]
            c = f_g * c + i_g * g_g
            h = o_g * jnp.tanh(c)
            if (s + 1) % FREQ_3 == 0:                            # downsample step
                mf = s // FREQ_3
                mb = (T - 1 - s) // FREQ_3
                # store code frames directly: bounds live ranges, no epilogue concat
                codes_ref[:, mf, 0:H] = h[0:bb, :]
                codes_ref[:, mb, H:2 * H] = h[bb:R2, :]

    return kernel


# ======================= constant operators (wrapper-built) =======================

def _build_constants(bb):
    """Tiny constant operators built in the wrapper (constant-folded under jit)."""
    BT = bb * T
    R2 = 2 * bb
    f32 = jnp.float32

    # Conv shift-selection: S[k, r, c] = 1 iff c = r + k - PAD within the same
    # batch's [0, T) time range (zero padding / batch seam folded in).
    kk = jnp.arange(KSIZE)[:, None, None]
    rr = jnp.arange(BT)[None, :, None]
    cc = jnp.arange(BT)[None, None, :]
    s_all = ((cc == rr + (kk - PAD)) & ((cc // T) == (rr // T))).astype(f32)

    # GroupNorm averaging operators (per-batch time avg, channel-group avg).
    r1 = jnp.arange(BT)
    pmat = ((r1[:, None] // T) == (r1[None, :] // T)).astype(f32) / T
    c1 = jnp.arange(DIM_ENC_3)
    gmat = ((c1[:, None] // CHS_GRP) == (c1[None, :] // CHS_GRP)).astype(f32) / CHS_GRP

    # LSTM gate-input gather: row s*R2 + r picks fwd time s (r<bb) / bwd time
    # T-1-s (r>=bb) out of the batch-major xw slab.
    q_rows = jnp.arange(T * R2)
    s_idx = q_rows // R2
    d_idx = q_rows % R2
    src_f = d_idx * T + s_idx
    src_b = (d_idx - bb) * T + (T - 1 - s_idx)
    q_cols = jnp.arange(BT)
    qf = ((q_cols[None, :] == src_f[:, None]) & (d_idx[:, None] < bb)).astype(f32)
    qb = ((q_cols[None, :] == src_b[:, None]) & (d_idx[:, None] >= bb)).astype(f32)
    return s_all, pmat, gmat, qf, qb


# ======================= wrapper =======================

def _const_spec(shape):
    zeros = (0,) * len(shape)
    return pl.BlockSpec(shape, lambda i, _z=zeros: _z)


def _cores_per_chip():
    try:
        kind = jax.devices()[0].device_kind.lower()
    except Exception:
        return 1
    return 2 if ("v7" in kind or "7x" in kind) else 1


def encoder6_forward(x_ncw, params, batch_block=None):
    """x_ncw: (B, dim_f0, T), like the PyTorch module.
    Returns codes (B, T//freq_3, 2*dim_neck_3)."""
    if batch_block is None:
        # v7x (2 TensorCores): one batch element per "parallel" grid step.
        # v5e/v6e (1 TensorCore): whole batch in one grid step (no step overhead).
        batch_block = 1 if _cores_per_chip() >= 2 else B
    bb = int(batch_block)
    assert B % bb == 0
    BT = bb * T

    (w1, b1, gw1, gb1), (w2, b2, gw2, gb2), (w3, b3, gw3, gb3) = params["convs"]
    wif, whf, bf, wib, whb, b_bwd = params["lstm"]

    s_all, pmat, gmat, qf, qb = _build_constants(bb)

    # weight pre-packing (constant-folded under jit since params are closed over)
    wi_cat = jnp.concatenate([wif, wib], axis=1)                 # (C, 2*4H)
    bi_cat = jnp.concatenate([bf, b_bwd], axis=1)                # (1, 2*4H)
    # direction-dependent W_hh rows, pre-broadcast over the stacked carry rows
    whh_bcast = jnp.stack(
        [jnp.concatenate([jnp.broadcast_to(whf[j], (bb, G4)),
                          jnp.broadcast_to(whb[j], (bb, G4))], axis=0)
         for j in range(H)], axis=0)                             # (H, 2bb, 4H)

    # NCW -> batch-major (B*T, Cin) layout change done in the wrapper (free).
    x_flat = jnp.transpose(x_ncw, (0, 2, 1)).reshape(B * T, DIM_F0)

    args = (x_flat, s_all, pmat, gmat,
            w1, b1, gw1, gb1, w2, b2, gw2, gb2, w3, b3, gw3, gb3,
            wi_cat, bi_cat, qf, qb, whh_bcast)

    in_specs = ([pl.BlockSpec((BT, DIM_F0), lambda i: (i, 0))]
                + [_const_spec(a.shape) for a in args[1:]])

    codes = pl.pallas_call(
        _make_kernel(bb),
        out_shape=jax.ShapeDtypeStruct((B, NCODE, 2 * H), jnp.float32),
        grid_spec=pltpu.PrefetchScalarGridSpec(
            num_scalar_prefetch=0,
            grid=(B // bb,),
            in_specs=in_specs,
            out_specs=pl.BlockSpec((bb, NCODE, 2 * H), lambda i: (i, 0, 0)),
        ),
        compiler_params=pltpu.CompilerParams(
            dimension_semantics=("parallel",)),
    )(*args)
    return codes


# ======================= pure-JAX reference =======================

def encoder6_reference(x_ncw, params):
    x = jnp.transpose(x_ncw, (0, 2, 1))
    num_groups = DIM_ENC_3 // CHS_GRP
    for (w_t, b, gw, gb) in params["convs"]:
        k = w_t.shape[0]
        pad = (k - 1) // 2
        tlen = x.shape[1]
        xp = jnp.pad(x, ((0, 0), (pad, pad), (0, 0)))
        y = sum(jnp.einsum("btc,cd->btd", xp[:, i:i + tlen, :], w_t[i],
                           precision=jax.lax.Precision.HIGHEST) for i in range(k))
        y = y + b
        bsz, tl, c = y.shape
        cgrp = c // num_groups
        yr = y.reshape(bsz, tl, num_groups, cgrp)
        mean = yr.mean(axis=(1, 3), keepdims=True)
        var = ((yr - mean) ** 2).mean(axis=(1, 3), keepdims=True)
        yn = ((yr - mean) / jnp.sqrt(var + EPS)).reshape(bsz, tl, c)
        x = jnp.maximum(yn * gw + gb, 0.0)

    wif, whf, bf, wib, whb, b_bwd = params["lstm"]

    def run_dir(xb, wih, whh_, bvec):
        hh = whh_.shape[0]
        xw = xb @ wih + bvec

        def step(carry, g_in):
            h, c = carry
            gates = g_in + h @ whh_
            i = _sigmoid(gates[0:hh])
            f = _sigmoid(gates[hh:2 * hh])
            g = jnp.tanh(gates[2 * hh:3 * hh])
            o = _sigmoid(gates[3 * hh:4 * hh])
            c = f * c + i * g
            h = o * jnp.tanh(c)
            return (h, c), h

        (_, _), hs = jax.lax.scan(step, (jnp.zeros(hh), jnp.zeros(hh)), xw)
        return hs

    def per_batch(xb):
        hf = run_dir(xb, wif, whf, bf)
        hb = run_dir(xb[::-1], wib, whb, b_bwd)[::-1]
        return jnp.concatenate([hf, hb], axis=-1)

    outputs = jax.vmap(per_batch)(x)
    return jnp.concatenate(
        [outputs[:, FREQ_3 - 1::FREQ_3, :H], outputs[:, ::FREQ_3, H:]], axis=-1)


# ======================= deterministic parameter init =======================

def init_params(key):
    keys = jax.random.split(key, 20)
    convs = []
    cin = DIM_F0
    idx = 0
    for _ in range(3):
        fan = KSIZE * (cin + DIM_ENC_3)
        w = jax.random.normal(keys[idx], (KSIZE, cin, DIM_ENC_3), jnp.float32)
        w = w * math.sqrt(2.0 / fan)                      # xavier-ish (relu gain)
        b = 0.1 * jax.random.normal(keys[idx + 1], (1, DIM_ENC_3), jnp.float32)
        gw = 1.0 + 0.1 * jax.random.normal(keys[idx + 2], (1, DIM_ENC_3), jnp.float32)
        gb = 0.1 * jax.random.normal(keys[idx + 3], (1, DIM_ENC_3), jnp.float32)
        convs.append((w, b, gw, gb))
        cin = DIM_ENC_3
        idx += 4

    s = 1.0 / math.sqrt(H)
    wif = s * jax.random.normal(keys[idx + 0], (DIM_ENC_3, 4 * H), jnp.float32)
    whf = s * jax.random.normal(keys[idx + 1], (H, 4 * H), jnp.float32)
    bf = s * jax.random.normal(keys[idx + 2], (1, 4 * H), jnp.float32)
    wib = s * jax.random.normal(keys[idx + 3], (DIM_ENC_3, 4 * H), jnp.float32)
    whb = s * jax.random.normal(keys[idx + 4], (H, 4 * H), jnp.float32)
    b_bwd = s * jax.random.normal(keys[idx + 5], (1, 4 * H), jnp.float32)

    return {"convs": convs, "lstm": (wif, whf, bf, wib, whb, b_bwd)}


# ======================= main =======================

if __name__ == "__main__":
    key = jax.random.PRNGKey(0)
    pkey, xkey = jax.random.split(key)
    params = init_params(pkey)

    # PyTorch-style input: (batch, dim_f0, time) = NCW
    x = jax.random.normal(xkey, (B, DIM_F0, T), jnp.float32)

    # float32 (HIGHEST precision) reference; in-kernel MXU dots run at default
    # single-pass precision (recurrence itself is exact f32 on the VPU), hence 2e-2.
    with jax.default_matmul_precision("highest"):
        ref = encoder6_reference(x, params)
    ref = jax.block_until_ready(ref)

    # Exercise BOTH grid layouts so each code path is validated regardless of the
    # chip this runs on: batch_block=B -> grid=(1,) (v5e/v6e), batch_block=1 ->
    # grid=(B,) "parallel" (v7x, 2 TensorCores).
    for blk in (B, 1):
        fwd = jax.jit(lambda a, _blk=blk: encoder6_forward(a, params, _blk))
        codes = jax.block_until_ready(fwd(x))
        assert codes.shape == (B, T // FREQ_3, 2 * DIM_NECK_3), codes.shape
        err = float(jnp.max(jnp.abs(codes - ref)))
        assert err < 2e-2, f"batch_block={blk}: max abs err = {err}"

    # once more with the hardware-autodetected default layout
    codes = jax.block_until_ready(jax.jit(lambda a: encoder6_forward(a, params))(x))
    assert codes.shape == (B, T // FREQ_3, 2 * DIM_NECK_3)

    print("KERNEL_OK")
</pallas_src>

<mosaic_0001>
module attributes {stable_mosaic.version = 11 : i64} {
  func.func @kernel(%arg0: i32, %arg1: memref<32x8xf32, #tpu.memory_space<vmem>>, %arg2: memref<5x32x32xf32, #tpu.memory_space<vmem>>, %arg3: memref<32x32xf32, #tpu.memory_space<vmem>>, %arg4: memref<16x16xf32, #tpu.memory_space<vmem>>, %arg5: memref<5x8x16xf32, #tpu.memory_space<vmem>>, %arg6: memref<1x16xf32, #tpu.memory_space<vmem>>, %arg7: memref<1x16xf32, #tpu.memory_space<vmem>>, %arg8: memref<1x16xf32, #tpu.memory_space<vmem>>, %arg9: memref<5x16x16xf32, #tpu.memory_space<vmem>>, %arg10: memref<1x16xf32, #tpu.memory_space<vmem>>, %arg11: memref<1x16xf32, #tpu.memory_space<vmem>>, %arg12: memref<1x16xf32, #tpu.memory_space<vmem>>, %arg13: memref<5x16x16xf32, #tpu.memory_space<vmem>>, %arg14: memref<1x16xf32, #tpu.memory_space<vmem>>, %arg15: memref<1x16xf32, #tpu.memory_space<vmem>>, %arg16: memref<1x16xf32, #tpu.memory_space<vmem>>, %arg17: memref<16x32xf32, #tpu.memory_space<vmem>>, %arg18: memref<1x32xf32, #tpu.memory_space<vmem>>, %arg19: memref<64x32xf32, #tpu.memory_space<vmem>>, %arg20: memref<64x32xf32, #tpu.memory_space<vmem>>, %arg21: memref<4x4x16xf32, #tpu.memory_space<vmem>>, %arg22: memref<2x4x8xf32, #tpu.memory_space<vmem>>) attributes {dimension_semantics = [#tpu.dimension_semantics<parallel>], iteration_bounds = array<i64: 1>, scalar_prefetch = 0 : i64, scratch_operands = 0 : i64, tpu.core_type = #tpu.core_type<tc>, window_params = [{transform_indices = @transform_0, window_bounds = array<i64: 32, 8>}, {pipeline_mode = #tpu.pipeline_mode<synchronous>, transform_indices = @transform_1, window_bounds = array<i64: 5, 32, 32>}, {pipeline_mode = #tpu.pipeline_mode<synchronous>, transform_indices = @transform_2, window_bounds = array<i64: 32, 32>}, {pipeline_mode = #tpu.pipeline_mode<synchronous>, transform_indices = @transform_3, window_bounds = array<i64: 16, 16>}, {pipeline_mode = #tpu.pipeline_mode<synchronous>, transform_indices = @transform_4, window_bounds = array<i64: 5, 8, 16>}, {pipeline_mode = #tpu.pipeline_mode<synchronous>, transform_indices = @transform_5, window_bounds = array<i64: 1, 16>}, {pipeline_mode = #tpu.pipeline_mode<synchronous>, transform_indices = @transform_6, window_bounds = array<i64: 1, 16>}, {pipeline_mode = #tpu.pipeline_mode<synchronous>, transform_indices = @transform_7, window_bounds = array<i64: 1, 16>}, {pipeline_mode = #tpu.pipeline_mode<synchronous>, transform_indices = @transform_8, window_bounds = array<i64: 5, 16, 16>}, {pipeline_mode = #tpu.pipeline_mode<synchronous>, transform_indices = @transform_9, window_bounds = array<i64: 1, 16>}, {pipeline_mode = #tpu.pipeline_mode<synchronous>, transform_indices = @transform_10, window_bounds = array<i64: 1, 16>}, {pipeline_mode = #tpu.pipeline_mode<synchronous>, transform_indices = @transform_11, window_bounds = array<i64: 1, 16>}, {pipeline_mode = #tpu.pipeline_mode<synchronous>, transform_indices = @transform_12, window_bounds = array<i64: 5, 16, 16>}, {pipeline_mode = #tpu.pipeline_mode<synchronous>, transform_indices = @transform_13, window_bounds = array<i64: 1, 16>}, {pipeline_mode = #tpu.pipeline_mode<synchronous>, transform_indices = @transform_14, window_bounds = array<i64: 1, 16>}, {pipeline_mode = #tpu.pipeline_mode<synchronous>, transform_indices = @transform_15, window_bounds = array<i64: 1, 16>}, {pipeline_mode = #tpu.pipeline_mode<synchronous>, transform_indices = @transform_16, window_bounds = array<i64: 16, 32>}, {pipeline_mode = #tpu.pipeline_mode<synchronous>, transform_indices = @transform_17, window_bounds = array<i64: 1, 32>}, {pipeline_mode = #tpu.pipeline_mode<synchronous>, transform_indices = @transform_18, window_bounds = array<i64: 64, 32>}, {pipeline_mode = #tpu.pipeline_mode<synchronous>, transform_indices = @transform_19, window_bounds = array<i64: 64, 32>}, {pipeline_mode = #tpu.pipeline_mode<synchronous>, transform_indices = @transform_20, window_bounds = array<i64: 4, 4, 16>}, {transform_indices = @transform_21, window_bounds = array<i64: 2, 4, 8>}]} {
    %c0 = arith.constant 0 : index
    %c0_0 = arith.constant 0 : index
    %0 = vector.load %arg1[%c0, %c0_0] : memref<32x8xf32, #tpu.memory_space<vmem>>, vector<32x8xf32>
    %c0_1 = arith.constant 0 : index
    %c0_2 = arith.constant 0 : index
    %1 = vector.load %arg6[%c0_1, %c0_2] : memref<1x16xf32, #tpu.memory_space<vmem>>, vector<1x16xf32>
    %c0_3 = arith.constant 0 : index
    %c0_4 = arith.constant 0 : index
    %c0_5 = arith.constant 0 : index
    %2 = vector.load %arg2[%c0_3, %c0_4, %c0_5] : memref<5x32x32xf32, #tpu.memory_space<vmem>>, vector<1x32x32xf32>
    %3 = vector.shape_cast %2 : vector<1x32x32xf32> to vector<32x32xf32>
    %cst = arith.constant dense<0.000000e+00> : vector<32x8xf32>
    %4 = tpu.matmul %3, %0, %cst {dimension_numbers = #tpu.dot_dimension_numbers<[1], [0], [0], [1], [0, 0, 1, 1], [], []>} : vector<32x32xf32>, vector<32x8xf32>, vector<32x8xf32> -> vector<32x8xf32>
    %c0_6 = arith.constant 0 : index
    %c0_7 = arith.constant 0 : index
    %c0_8 = arith.constant 0 : index
    %5 = vector.load %arg5[%c0_6, %c0_7, %c0_8] : memref<5x8x16xf32, #tpu.memory_space<vmem>>, vector<1x8x16xf32>
    %6 = vector.shape_cast %5 : vector<1x8x16xf32> to vector<8x16xf32>
    %cst_9 = arith.constant dense<0.000000e+00> : vector<32x16xf32>
    %7 = tpu.matmul %4, %6, %cst_9 {dimension_numbers = #tpu.dot_dimension_numbers<[1], [0], [0], [1], [0, 0, 1, 1], [], []>} : vector<32x8xf32>, vector<8x16xf32>, vector<32x16xf32> -> vector<32x16xf32>
    %8 = vector.broadcast %1 : vector<1x16xf32> to vector<32x16xf32>
    %9 = arith.addf %8, %7 : vector<32x16xf32>
    %c1 = arith.constant 1 : index
    %c0_10 = arith.constant 0 : index
    %c0_11 = arith.constant 0 : index
    %10 = vector.load %arg2[%c1, %c0_10, %c0_11] : memref<5x32x32xf32, #tpu.memory_space<vmem>>, vector<1x32x32xf32>
    %11 = vector.shape_cast %10 : vector<1x32x32xf32> to vector<32x32xf32>
    %cst_12 = arith.constant dense<0.000000e+00> : vector<32x8xf32>
    %12 = tpu.matmul %11, %0, %cst_12 {dimension_numbers = #tpu.dot_dimension_numbers<[1], [0], [0], [1], [0, 0, 1, 1], [], []>} : vector<32x32xf32>, vector<32x8xf32>, vector<32x8xf32> -> vector<32x8xf32>
    %c1_13 = arith.constant 1 : index
    %c0_14 = arith.constant 0 : index
    %c0_15 = arith.constant 0 : index
    %13 = vector.load %arg5[%c1_13, %c0_14, %c0_15] : memref<5x8x16xf32, #tpu.memory_space<vmem>>, vector<1x8x16xf32>
    %14 = vector.shape_cast %13 : vector<1x8x16xf32> to vector<8x16xf32>
    %cst_16 = arith.constant dense<0.000000e+00> : vector<32x16xf32>
    %15 = tpu.matmul %12, %14, %cst_16 {dimension_numbers = #tpu.dot_dimension_numbers<[1], [0], [0], [1], [0, 0, 1, 1], [], []>} : vector<32x8xf32>, vector<8x16xf32>, vector<32x16xf32> -> vector<32x16xf32>
    %16 = arith.addf %9, %15 : vector<32x16xf32>
    %c2 = arith.constant 2 : index
    %c0_17 = arith.constant 0 : index
    %c0_18 = arith.constant 0 : index
    %17 = vector.load %arg2[%c2, %c0_17, %c0_18] : memref<5x32x32xf32, #tpu.memory_space<vmem>>, vector<1x32x32xf32>
    %18 = vector.shape_cast %17 : vector<1x32x32xf32> to vector<32x32xf32>
    %cst_19 = arith.constant dense<0.000000e+00> : vector<32x8xf32>
    %19 = tpu.matmul %18, %0, %cst_19 {dimension_numbers = #tpu.dot_dimension_numbers<[1], [0], [0], [1], [0, 0, 1, 1], [], []>} : vector<32x32xf32>, vector<32x8xf32>, vector<32x8xf32> -> vector<32x8xf32>
    %c2_20 = arith.constant 2 : index
    %c0_21 = arith.constant 0 : index
    %c0_22 = arith.constant 0 : index
    %20 = vector.load %arg5[%c2_20, %c0_21, %c0_22] : memref<5x8x16xf32, #tpu.memory_space<vmem>>, vector<1x8x16xf32>
    %21 = vector.shape_cast %20 : vector<1x8x16xf32> to vector<8x16xf32>
    %cst_23 = arith.constant dense<0.000000e+00> : vector<32x16xf32>
    %22 = tpu.matmul %19, %21, %cst_23 {dimension_numbers = #tpu.dot_dimension_numbers<[1], [0], [0], [1], [0, 0, 1, 1], [], []>} : vector<32x8xf32>, vector<8x16xf32>, vector<32x16xf32> -> vector<32x16xf32>
    %23 = arith.addf %16, %22 : vector<32x16xf32>
    %c3 = arith.constant 3 : index
    %c0_24 = arith.constant 0 : index
    %c0_25 = arith.constant 0 : index
    %24 = vector.load %arg2[%c3, %c0_24, %c0_25] : memref<5x32x32xf32, #tpu.memory_space<vmem>>, vector<1x32x32xf32>
    %25 = vector.shape_cast %24 : vector<1x32x32xf32> to vector<32x32xf32>
    %cst_26 = arith.constant dense<0.000000e+00> : vector<32x8xf32>
    %26 = tpu.matmul %25, %0, %cst_26 {dimension_numbers = #tpu.dot_dimension_numbers<[1], [0], [0], [1], [0, 0, 1, 1], [], []>} : vector<32x32xf32>, vector<32x8xf32>, vector<32x8xf32> -> vector<32x8xf32>
    %c3_27 = arith.constant 3 : index
    %c0_28 = arith.constant 0 : index
    %c0_29 = arith.constant 0 : index
    %27 = vector.load %arg5[%c3_27, %c0_28, %c0_29] : memref<5x8x16xf32, #tpu.memory_space<vmem>>, vector<1x8x16xf32>
    %28 = vector.shape_cast %27 : vector<1x8x16xf32> to vector<8x16xf32>
    %cst_30 = arith.constant dense<0.000000e+00> : vector<32x16xf32>
    %29 = tpu.matmul %26, %28, %cst_30 {dimension_numbers = #tpu.dot_dimension_numbers<[1], [0], [0], [1], [0, 0, 1, 1], [], []>} : vector<32x8xf32>, vector<8x16xf32>, vector<32x16xf32> -> vector<32x16xf32>
    %30 = arith.addf %23, %29 : vector<32x16xf32>
    %c4 = arith.constant 4 : index
    %c0_31 = arith.constant 0 : index
    %c0_32 = arith.constant 0 : index
    %31 = vector.load %arg2[%c4, %c0_31, %c0_32] : memref<5x32x32xf32, #tpu.memory_space<vmem>>, vector<1x32x32xf32>
    %32 = vector.shape_cast %31 : vector<1x32x32xf32> to vector<32x32xf32>
    %cst_33 = arith.constant dense<0.000000e+00> : vector<32x8xf32>
    %33 = tpu.matmul %32, %0, %cst_33 {dimension_numbers = #tpu.dot_dimension_numbers<[1], [0], [0], [1], [0, 0, 1, 1], [], []>} : vector<32x32xf32>, vector<32x8xf32>, vector<32x8xf32> -> vector<32x8xf32>
    %c4_34 = arith.constant 4 : index
    %c0_35 = arith.constant 0 : index
    %c0_36 = arith.constant 0 : index
    %34 = vector.load %arg5[%c4_34, %c0_35, %c0_36] : memref<5x8x16xf32, #tpu.memory_space<vmem>>, vector<1x8x16xf32>
    %35 = vector.shape_cast %34 : vector<1x8x16xf32> to vector<8x16xf32>
    %cst_37 = arith.constant dense<0.000000e+00> : vector<32x16xf32>
    %36 = tpu.matmul %33, %35, %cst_37 {dimension_numbers = #tpu.dot_dimension_numbers<[1], [0], [0], [1], [0, 0, 1, 1], [], []>} : vector<32x8xf32>, vector<8x16xf32>, vector<32x16xf32> -> vector<32x16xf32>
    %37 = arith.addf %30, %36 : vector<32x16xf32>
    %c0_38 = arith.constant 0 : index
    %c0_39 = arith.constant 0 : index
    %38 = vector.load %arg3[%c0_38, %c0_39] : memref<32x32xf32, #tpu.memory_space<vmem>>, vector<32x32xf32>
    %c0_40 = arith.constant 0 : index
    %c0_41 = arith.constant 0 : index
    %39 = vector.load %arg4[%c0_40, %c0_41] : memref<16x16xf32, #tpu.memory_space<vmem>>, vector<16x16xf32>
    %cst_42 = arith.constant dense<0.000000e+00> : vector<32x16xf32>
    %40 = tpu.matmul %38, %37, %cst_42 {dimension_numbers = #tpu.dot_dimension_numbers<[1], [0], [0], [1], [0, 0, 1, 1], [], []>} : vector<32x32xf32>, vector<32x16xf32>, vector<32x16xf32> -> vector<32x16xf32>
    %cst_43 = arith.constant dense<0.000000e+00> : vector<32x16xf32>
    %41 = tpu.matmul %40, %39, %cst_43 {dimension_numbers = #tpu.dot_dimension_numbers<[1], [0], [0], [1], [0, 0, 1, 1], [], []>} : vector<32x16xf32>, vector<16x16xf32>, vector<32x16xf32> -> vector<32x16xf32>
    %42 = arith.subf %37, %41 : vector<32x16xf32>
    %43 = arith.mulf %42, %42 : vector<32x16xf32>
    %cst_44 = arith.constant dense<0.000000e+00> : vector<32x16xf32>
    %44 = tpu.matmul %38, %43, %cst_44 {dimension_numbers = #tpu.dot_dimension_numbers<[1], [0], [0], [1], [0, 0, 1, 1], [], []>} : vector<32x32xf32>, vector<32x16xf32>, vector<32x16xf32> -> vector<32x16xf32>
    %cst_45 = arith.constant dense<0.000000e+00> : vector<32x16xf32>
    %45 = tpu.matmul %44, %39, %cst_45 {dimension_numbers = #tpu.dot_dimension_numbers<[1], [0], [0], [1], [0, 0, 1, 1], [], []>} : vector<32x16xf32>, vector<16x16xf32>, vector<32x16xf32> -> vector<32x16xf32>
    %cst_46 = arith.constant 9.99999974E-6 : f32
    %46 = vector.broadcast %cst_46 : f32 to vector<32x16xf32>
    %47 = arith.addf %45, %46 : vector<32x16xf32>
    %48 = math.rsqrt %47 : vector<32x16xf32>
    %49 = arith.mulf %42, %48 : vector<32x16xf32>
    %c0_47 = arith.constant 0 : index
    %c0_48 = arith.constant 0 : index
    %50 = vector.load %arg7[%c0_47, %c0_48] : memref<1x16xf32, #tpu.memory_space<vmem>>, vector<1x16xf32>
    %51 = vector.broadcast %50 : vector<1x16xf32> to vector<32x16xf32>
    %52 = arith.mulf %49, %51 : vector<32x16xf32>
    %c0_49 = arith.constant 0 : index
    %c0_50 = arith.constant 0 : index
    %53 = vector.load %arg8[%c0_49, %c0_50] : memref<1x16xf32, #tpu.memory_space<vmem>>, vector<1x16xf32>
    %54 = vector.broadcast %53 : vector<1x16xf32> to vector<32x16xf32>
    %55 = arith.addf %52, %54 : vector<32x16xf32>
    %cst_51 = arith.constant 0.000000e+00 : f32
    %56 = vector.broadcast %cst_51 : f32 to vector<32x16xf32>
    %57 = arith.maximumf %55, %56 : vector<32x16xf32>
    %c0_52 = arith.constant 0 : index
    %c0_53 = arith.constant 0 : index
    %58 = vector.load %arg10[%c0_52, %c0_53] : memref<1x16xf32, #tpu.memory_space<vmem>>, vector<1x16xf32>
    %c0_54 = arith.constant 0 : index
    %c0_55 = arith.constant 0 : index
    %c0_56 = arith.constant 0 : index
    %59 = vector.load %arg2[%c0_54, %c0_55, %c0_56] : memref<5x32x32xf32, #tpu.memory_space<vmem>>, vector<1x32x32xf32>
    %60 = vector.shape_cast %59 : vector<1x32x32xf32> to vector<32x32xf32>
    %cst_57 = arith.constant dense<0.000000e+00> : vector<32x16xf32>
    %61 = tpu.matmul %60, %57, %cst_57 {dimension_numbers = #tpu.dot_dimension_numbers<[1], [0], [0], [1], [0, 0, 1, 1], [], []>} : vector<32x32xf32>, vector<32x16xf32>, vector<32x16xf32> -> vector<32x16xf32>
    %c0_58 = arith.constant 0 : index
    %c0_59 = arith.constant 0 : index
    %c0_60 = arith.constant 0 : index
    %62 = vector.load %arg9[%c0_58, %c0_59, %c0_60] : memref<5x16x16xf32, #tpu.memory_space<vmem>>, vector<1x16x16xf32>
    %63 = vector.shape_cast %62 : vector<1x16x16xf32> to vector<16x16xf32>
    %cst_61 = arith.constant dense<0.000000e+00> : vector<32x16xf32>
    %64 = tpu.matmul %61, %63, %cst_61 {dimension_numbers = #tpu.dot_dimension_numbers<[1], [0], [0], [1], [0, 0, 1, 1], [], []>} : vector<32x16xf32>, vector<16x16xf32>, vector<32x16xf32> -> vector<32x16xf32>
    %65 = vector.broadcast %58 : vector<1x16xf32> to vector<32x16xf32>
    %66 = arith.addf %65, %64 : vector<32x16xf32>
    %c1_62 = arith.constant 1 : index
    %c0_63 = arith.constant 0 : index
    %c0_64 = arith.constant 0 : index
    %67 = vector.load %arg2[%c1_62, %c0_63, %c0_64] : memref<5x32x32xf32, #tpu.memory_space<vmem>>, vector<1x32x32xf32>
    %68 = vector.shape_cast %67 : vector<1x32x32xf32> to vector<32x32xf32>
    %cst_65 = arith.constant dense<0.000000e+00> : vector<32x16xf32>
    %69 = tpu.matmul %68, %57, %cst_65 {dimension_numbers = #tpu.dot_dimension_numbers<[1], [0], [0], [1], [0, 0, 1, 1], [], []>} : vector<32x32xf32>, vector<32x16xf32>, vector<32x16xf32> -> vector<32x16xf32>
    %c1_66 = arith.constant 1 : index
    %c0_67 = arith.constant 0 : index
    %c0_68 = arith.constant 0 : index
    %70 = vector.load %arg9[%c1_66, %c0_67, %c0_68] : memref<5x16x16xf32, #tpu.memory_space<vmem>>, vector<1x16x16xf32>
    %71 = vector.shape_cast %70 : vector<1x16x16xf32> to vector<16x16xf32>
    %cst_69 = arith.constant dense<0.000000e+00> : vector<32x16xf32>
    %72 = tpu.matmul %69, %71, %cst_69 {dimension_numbers = #tpu.dot_dimension_numbers<[1], [0], [0], [1], [0, 0, 1, 1], [], []>} : vector<32x16xf32>, vector<16x16xf32>, vector<32x16xf32> -> vector<32x16xf32>
    %73 = arith.addf %66, %72 : vector<32x16xf32>
    %c2_70 = arith.constant 2 : index
    %c0_71 = arith.constant 0 : index
    %c0_72 = arith.constant 0 : index
    %74 = vector.load %arg2[%c2_70, %c0_71, %c0_72] : memref<5x32x32xf32, #tpu.memory_space<vmem>>, vector<1x32x32xf32>
    %75 = vector.shape_cast %74 : vector<1x32x32xf32> to vector<32x32xf32>
    %cst_73 = arith.constant dense<0.000000e+00> : vector<32x16xf32>
    %76 = tpu.matmul %75, %57, %cst_73 {dimension_numbers = #tpu.dot_dimension_numbers<[1], [0], [0], [1], [0, 0, 1, 1], [], []>} : vector<32x32xf32>, vector<32x16xf32>, vector<32x16xf32> -> vector<32x16xf32>
    %c2_74 = arith.constant 2 : index
    %c0_75 = arith.constant 0 : index
    %c0_76 = arith.constant 0 : index
    %77 = vector.load %arg9[%c2_74, %c0_75, %c0_76] : memref<5x16x16xf32, #tpu.memory_space<vmem>>, vector<1x16x16xf32>
    %78 = vector.shape_cast %77 : vector<1x16x16xf32> to vector<16x16xf32>
    %cst_77 = arith.constant dense<0.000000e+00> : vector<32x16xf32>
    %79 = tpu.matmul %76, %78, %cst_77 {dimension_numbers = #tpu.dot_dimension_numbers<[1], [0], [0], [1], [0, 0, 1, 1], [], []>} : vector<32x16xf32>, vector<16x16xf32>, vector<32x16xf32> -> vector<32x16xf32>
    %80 = arith.addf %73, %79 : vector<32x16xf32>
    %c3_78 = arith.constant 3 : index
    %c0_79 = arith.constant 0 : index
    %c0_80 = arith.constant 0 : index
    %81 = vector.load %arg2[%c3_78, %c0_79, %c0_80] : memref<5x32x32xf32, #tpu.memory_space<vmem>>, vector<1x32x32xf32>
    %82 = vector.shape_cast %81 : vector<1x32x32xf32> to vector<32x32xf32>
    %cst_81 = arith.constant dense<0.000000e+00> : vector<32x16xf32>
    %83 = tpu.matmul %82, %57, %cst_81 {dimension_numbers = #tpu.dot_dimension_numbers<[1], [0], [0], [1], [0, 0, 1, 1], [], []>} : vector<32x32xf32>, vector<32x16xf32>, vector<32x16xf32> -> vector<32x16xf32>
    %c3_82 = arith.constant 3 : index
    %c0_83 = arith.constant 0 : index
    %c0_84 = arith.constant 0 : index
    %84 = vector.load %arg9[%c3_82, %c0_83, %c0_84] : memref<5x16x16xf32, #tpu.memory_space<vmem>>, vector<1x16x16xf32>
    %85 = vector.shape_cast %84 : vector<1x16x16xf32> to vector<16x16xf32>
    %cst_85 = arith.constant dense<0.000000e+00> : vector<32x16xf32>
    %86 = tpu.matmul %83, %85, %cst_85 {dimension_numbers = #tpu.dot_dimension_numbers<[1], [0], [0], [1], [0, 0, 1, 1], [], []>} : vector<32x16xf32>, vector<16x16xf32>, vector<32x16xf32> -> vector<32x16xf32>
    %87 = arith.addf %80, %86 : vector<32x16xf32>
    %c4_86 = arith.constant 4 : index
    %c0_87 = arith.constant 0 : index
    %c0_88 = arith.constant 0 : index
    %88 = vector.load %arg2[%c4_86, %c0_87, %c0_88] : memref<5x32x32xf32, #tpu.memory_space<vmem>>, vector<1x32x32xf32>
    %89 = vector.shape_cast %88 : vector<1x32x32xf32> to vector<32x32xf32>
    %cst_89 = arith.constant dense<0.000000e+00> : vector<32x16xf32>
    %90 = tpu.matmul %89, %57, %cst_89 {dimension_numbers = #tpu.dot_dimension_numbers<[1], [0], [0], [1], [0, 0, 1, 1], [], []>} : vector<32x32xf32>, vector<32x16xf32>, vector<32x16xf32> -> vector<32x16xf32>
    %c4_90 = arith.constant 4 : index
    %c0_91 = arith.constant 0 : index
    %c0_92 = arith.constant 0 : index
    %91 = vector.load %arg9[%c4_90, %c0_91, %c0_92] : memref<5x16x16xf32, #tpu.memory_space<vmem>>, vector<1x16x16xf32>
    %92 = vector.shape_cast %91 : vector<1x16x16xf32> to vector<16x16xf32>
    %cst_93 = arith.constant dense<0.000000e+00> : vector<32x16xf32>
    %93 = tpu.matmul %90, %92, %cst_93 {dimension_numbers = #tpu.dot_dimension_numbers<[1], [0], [0], [1], [0, 0, 1, 1], [], []>} : vector<32x16xf32>, vector<16x16xf32>, vector<32x16xf32> -> vector<32x16xf32>
    %94 = arith.addf %87, %93 : vector<32x16xf32>
    %c0_94 = arith.constant 0 : index
    %c0_95 = arith.constant 0 : index
    %95 = vector.load %arg3[%c0_94, %c0_95] : memref<32x32xf32, #tpu.memory_space<vmem>>, vector<32x32xf32>
    %c0_96 = arith.constant 0 : index
    %c0_97 = arith.constant 0 : index
    %96 = vector.load %arg4[%c0_96, %c0_97] : memref<16x16xf32, #tpu.memory_space<vmem>>, vector<16x16xf32>
    %cst_98 = arith.constant dense<0.000000e+00> : vector<32x16xf32>
    %97 = tpu.matmul %95, %94, %cst_98 {dimension_numbers = #tpu.dot_dimension_numbers<[1], [0], [0], [1], [0, 0, 1, 1], [], []>} : vector<32x32xf32>, vector<32x16xf32>, vector<32x16xf32> -> vector<32x16xf32>
    %cst_99 = arith.constant dense<0.000000e+00> : vector<32x16xf32>
    %98 = tpu.matmul %97, %96, %cst_99 {dimension_numbers = #tpu.dot_dimension_numbers<[1], [0], [0], [1], [0, 0, 1, 1], [], []>} : vector<32x16xf32>, vector<16x16xf32>, vector<32x16xf32> -> vector<32x16xf32>
    %99 = arith.subf %94, %98 : vector<32x16xf32>
    %100 = arith.mulf %99, %99 : vector<32x16xf32>
    %cst_100 = arith.constant dense<0.000000e+00> : vector<32x16xf32>
    %101 = tpu.matmul %95, %100, %cst_100 {dimension_numbers = #tpu.dot_dimension_numbers<[1], [0], [0], [1], [0, 0, 1, 1], [], []>} : vector<32x32xf32>, vector<32x16xf32>, vector<32x16xf32> -> vector<32x16xf32>
    %cst_101 = arith.constant dense<0.000000e+00> : vector<32x16xf32>
    %102 = tpu.matmul %101, %96, %cst_101 {dimension_numbers = #tpu.dot_dimension_numbers<[1], [0], [0], [1], [0, 0, 1, 1], [], []>} : vector<32x16xf32>, vector<16x16xf32>, vector<32x16xf32> -> vector<32x16xf32>
    %cst_102 = arith.constant 9.99999974E-6 : f32
    %103 = vector.broadcast %cst_102 : f32 to vector<32x16xf32>
    %104 = arith.addf %102, %103 : vector<32x16xf32>
    %105 = math.rsqrt %104 : vector<32x16xf32>
    %106 = arith.mulf %99, %105 : vector<32x16xf32>
    %c0_103 = arith.constant 0 : index
    %c0_104 = arith.constant 0 : index
    %107 = vector.load %arg11[%c0_103, %c0_104] : memref<1x16xf32, #tpu.memory_space<vmem>>, vector<1x16xf32>
    %108 = vector.broadcast %107 : vector<1x16xf32> to vector<32x16xf32>
    %109 = arith.mulf %106, %108 : vector<32x16xf32>
    %c0_105 = arith.constant 0 : index
    %c0_106 = arith.constant 0 : index
    %110 = vector.load %arg12[%c0_105, %c0_106] : memref<1x16xf32, #tpu.memory_space<vmem>>, vector<1x16xf32>
    %111 = vector.broadcast %110 : vector<1x16xf32> to vector<32x16xf32>
    %112 = arith.addf %109, %111 : vector<32x16xf32>
    %cst_107 = arith.constant 0.000000e+00 : f32
    %113 = vector.broadcast %cst_107 : f32 to vector<32x16xf32>
    %114 = arith.maximumf %112, %113 : vector<32x16xf32>
    %c0_108 = arith.constant 0 : index
    %c0_109 = arith.constant 0 : index
    %115 = vector.load %arg14[%c0_108, %c0_109] : memref<1x16xf32, #tpu.memory_space<vmem>>, vector<1x16xf32>
    %c0_110 = arith.constant 0 : index
    %c0_111 = arith.constant 0 : index
    %c0_112 = arith.constant 0 : index
    %116 = vector.load %arg2[%c0_110, %c0_111, %c0_112] : memref<5x32x32xf32, #tpu.memory_space<vmem>>, vector<1x32x32xf32>
    %117 = vector.shape_cast %116 : vector<1x32x32xf32> to vector<32x32xf32>
    %cst_113 = arith.constant dense<0.000000e+00> : vector<32x16xf32>
    %118 = tpu.matmul %117, %114, %cst_113 {dimension_numbers = #tpu.dot_dimension_numbers<[1], [0], [0], [1], [0, 0, 1, 1], [], []>} : vector<32x32xf32>, vector<32x16xf32>, vector<32x16xf32> -> vector<32x16xf32>
    %c0_114 = arith.constant 0 : index
    %c0_115 = arith.constant 0 : index
    %c0_116 = arith.constant 0 : index
    %119 = vector.load %arg13[%c0_114, %c0_115, %c0_116] : memref<5x16x16xf32, #tpu.memory_space<vmem>>, vector<1x16x16xf32>
    %120 = vector.shape_cast %119 : vector<1x16x16xf32> to vector<16x16xf32>
    %cst_117 = arith.constant dense<0.000000e+00> : vector<32x16xf32>
    %121 = tpu.matmul %118, %120, %cst_117 {dimension_numbers = #tpu.dot_dimension_numbers<[1], [0], [0], [1], [0, 0, 1, 1], [], []>} : vector<32x16xf32>, vector<16x16xf32>, vector<32x16xf32> -> vector<32x16xf32>
    %122 = vector.broadcast %115 : vector<1x16xf32> to vector<32x16xf32>
    %123 = arith.addf %122, %121 : vector<32x16xf32>
    %c1_118 = arith.constant 1 : index
    %c0_119 = arith.constant 0 : index
    %c0_120 = arith.constant 0 : index
    %124 = vector.load %arg2[%c1_118, %c0_119, %c0_120] : memref<5x32x32xf32, #tpu.memory_space<vmem>>, vector<1x32x32xf32>
    %125 = vector.shape_cast %124 : vector<1x32x32xf32> to vector<32x32xf32>
    %cst_121 = arith.constant dense<0.000000e+00> : vector<32x16xf32>
    %126 = tpu.matmul %125, %114, %cst_121 {dimension_numbers = #tpu.dot_dimension_numbers<[1], [0], [0], [1], [0, 0, 1, 1], [], []>} : vector<32x32xf32>, vector<32x16xf32>, vector<32x16xf32> -> vector<32x16xf32>
    %c1_122 = arith.constant 1 : index
    %c0_123 = arith.constant 0 : index
    %c0_124 = arith.constant 0 : index
    %127 = vector.load %arg13[%c1_122, %c0_123, %c0_124] : memref<5x16x16xf32, #tpu.memory_space<vmem>>, vector<1x16x16xf32>
    %128 = vector.shape_cast %127 : vector<1x16x16xf32> to vector<16x16xf32>
    %cst_125 = arith.constant dense<0.000000e+00> : vector<32x16xf32>
    %129 = tpu.matmul %126, %128, %cst_125 {dimension_numbers = #tpu.dot_dimension_numbers<[1], [0], [0], [1], [0, 0, 1, 1], [], []>} : vector<32x16xf32>, vector<16x16xf32>, vector<32x16xf32> -> vector<32x16xf32>
    %130 = arith.addf %123, %129 : vector<32x16xf32>
    %c2_126 = arith.constant 2 : index
    %c0_127 = arith.constant 0 : index
    %c0_128 = arith.constant 0 : index
    %131 = vector.load %arg2[%c2_126, %c0_127, %c0_128] : memref<5x32x32xf32, #tpu.memory_space<vmem>>, vector<1x32x32xf32>
    %132 = vector.shape_cast %131 : vector<1x32x32xf32> to vector<32x32xf32>
    %cst_129 = arith.constant dense<0.000000e+00> : vector<32x16xf32>
    %133 = tpu.matmul %132, %114, %cst_129 {dimension_numbers = #tpu.dot_dimension_numbers<[1], [0], [0], [1], [0, 0, 1, 1], [], []>} : vector<32x32xf32>, vector<32x16xf32>, vector<32x16xf32> -> vector<32x16xf32>
    %c2_130 = arith.constant 2 : index
    %c0_131 = arith.constant 0 : index
    %c0_132 = arith.constant 0 : index
    %134 = vector.load %arg13[%c2_130, %c0_131, %c0_132] : memref<5x16x16xf32, #tpu.memory_space<vmem>>, vector<1x16x16xf32>
    %135 = vector.shape_cast %134 : vector<1x16x16xf32> to vector<16x16xf32>
    %cst_133 = arith.constant dense<0.000000e+00> : vector<32x16xf32>
    %136 = tpu.matmul %133, %135, %cst_133 {dimension_numbers = #tpu.dot_dimension_numbers<[1], [0], [0], [1], [0, 0, 1, 1], [], []>} : vector<32x16xf32>, vector<16x16xf32>, vector<32x16xf32> -> vector<32x16xf32>
    %137 = arith.addf %130, %136 : vector<32x16xf32>
    %c3_134 = arith.constant 3 : index
    %c0_135 = arith.constant 0 : index
    %c0_136 = arith.constant 0 : index
    %138 = vector.load %arg2[%c3_134, %c0_135, %c0_136] : memref<5x32x32xf32, #tpu.memory_space<vmem>>, vector<1x32x32xf32>
    %139 = vector.shape_cast %138 : vector<1x32x32xf32> to vector<32x32xf32>
    %cst_137 = arith.constant dense<0.000000e+00> : vector<32x16xf32>
    %140 = tpu.matmul %139, %114, %cst_137 {dimension_numbers = #tpu.dot_dimension_numbers<[1], [0], [0], [1], [0, 0, 1, 1], [], []>} : vector<32x32xf32>, vector<32x16xf32>, vector<32x16xf32> -> vector<32x16xf32>
    %c3_138 = arith.constant 3 : index
    %c0_139 = arith.constant 0 : index
    %c0_140 = arith.constant 0 : index
    %141 = vector.load %arg13[%c3_138, %c0_139, %c0_140] : memref<5x16x16xf32, #tpu.memory_space<vmem>>, vector<1x16x16xf32>
    %142 = vector.shape_cast %141 : vector<1x16x16xf32> to vector<16x16xf32>
    %cst_141 = arith.constant dense<0.000000e+00> : vector<32x16xf32>
    %143 = tpu.matmul %140, %142, %cst_141 {dimension_numbers = #tpu.dot_dimension_numbers<[1], [0], [0], [1], [0, 0, 1, 1], [], []>} : vector<32x16xf32>, vector<16x16xf32>, vector<32x16xf32> -> vector<32x16xf32>
    %144 = arith.addf %137, %143 : vector<32x16xf32>
    %c4_142 = arith.constant 4 : index
    %c0_143 = arith.constant 0 : index
    %c0_144 = arith.constant 0 : index
    %145 = vector.load %arg2[%c4_142, %c0_143, %c0_144] : memref<5x32x32xf32, #tpu.memory_space<vmem>>, vector<1x32x32xf32>
    %146 = vector.shape_cast %145 : vector<1x32x32xf32> to vector<32x32xf32>
    %cst_145 = arith.constant dense<0.000000e+00> : vector<32x16xf32>
    %147 = tpu.matmul %146, %114, %cst_145 {dimension_numbers = #tpu.dot_dimension_numbers<[1], [0], [0], [1], [0, 0, 1, 1], [], []>} : vector<32x32xf32>, vector<32x16xf32>, vector<32x16xf32> -> vector<32x16xf32>
    %c4_146 = arith.constant 4 : index
    %c0_147 = arith.constant 0 : index
    %c0_148 = arith.constant 0 : index
    %148 = vector.load %arg13[%c4_146, %c0_147, %c0_148] : memref<5x16x16xf32, #tpu.memory_space<vmem>>, vector<1x16x16xf32>
    %149 = vector.shape_cast %148 : vector<1x16x16xf32> to vector<16x16xf32>
    %cst_149 = arith.constant dense<0.000000e+00> : vector<32x16xf32>
    %150 = tpu.matmul %147, %149, %cst_149 {dimension_numbers = #tpu.dot_dimension_numbers<[1], [0], [0], [1], [0, 0, 1, 1], [], []>} : vector<32x16xf32>, vector<16x16xf32>, vector<32x16xf32> -> vector<32x16xf32>
    %151 = arith.addf %144, %150 : vector<32x16xf32>
    %c0_150 = arith.constant 0 : index
    %c0_151 = arith.constant 0 : index
    %152 = vector.load %arg3[%c0_150, %c0_151] : memref<32x32xf32, #tpu.memory_space<vmem>>, vector<32x32xf32>
    %c0_152 = arith.constant 0 : index
    %c0_153 = arith.constant 0 : index
    %153 = vector.load %arg4[%c0_152, %c0_153] : memref<16x16xf32, #tpu.memory_space<vmem>>, vector<16x16xf32>
    %cst_154 = arith.constant dense<0.000000e+00> : vector<32x16xf32>
    %154 = tpu.matmul %152, %151, %cst_154 {dimension_numbers = #tpu.dot_dimension_numbers<[1], [0], [0], [1], [0, 0, 1, 1], [], []>} : vector<32x32xf32>, vector<32x16xf32>, vector<32x16xf32> -> vector<32x16xf32>
    %cst_155 = arith.constant dense<0.000000e+00> : vector<32x16xf32>
    %155 = tpu.matmul %154, %153, %cst_155 {dimension_numbers = #tpu.dot_dimension_numbers<[1], [0], [0], [1], [0, 0, 1, 1], [], []>} : vector<32x16xf32>, vector<16x16xf32>, vector<32x16xf32> -> vector<32x16xf32>
    %156 = arith.subf %151, %155 : vector<32x16xf32>
    %157 = arith.mulf %156, %156 : vector<32x16xf32>
    %cst_156 = arith.constant dense<0.000000e+00> : vector<32x16xf32>
    %158 = tpu.matmul %152, %157, %cst_156 {dimension_numbers = #tpu.dot_dimension_numbers<[1], [0], [0], [1], [0, 0, 1, 1], [], []>} : vector<32x32xf32>, vector<32x16xf32>, vector<32x16xf32> -> vector<32x16xf32>
    %cst_157 = arith.constant dense<0.000000e+00> : vector<32x16xf32>
    %159 = tpu.matmul %158, %153, %cst_157 {dimension_numbers = #tpu.dot_dimension_numbers<[1], [0], [0], [1], [0, 0, 1, 1], [], []>} : vector<32x16xf32>, vector<16x16xf32>, vector<32x16xf32> -> vector<32x16xf32>
    %cst_158 = arith.constant 9.99999974E-6 : f32
    %160 = vector.broadcast %cst_158 : f32 to vector<32x16xf32>
    %161 = arith.addf %159, %160 : vector<32x16xf32>
    %162 = math.rsqrt %161 : vector<32x16xf32>
    %163 = arith.mulf %156, %162 : vector<32x16xf32>
    %c0_159 = arith.constant 0 : index
    %c0_160 = arith.constant 0 : index
    %164 = vector.load %arg15[%c0_159, %c0_160] : memref<1x16xf32, #tpu.memory_space<vmem>>, vector<1x16xf32>
    %165 = vector.broadcast %164 : vector<1x16xf32> to vector<32x16xf32>
    %166 = arith.mulf %163, %165 : vector<32x16xf32>
    %c0_161 = arith.constant 0 : index
    %c0_162 = arith.constant 0 : index
    %167 = vector.load %arg16[%c0_161, %c0_162] : memref<1x16xf32, #tpu.memory_space<vmem>>, vector<1x16xf32>
    %168 = vector.broadcast %167 : vector<1x16xf32> to vector<32x16xf32>
    %169 = arith.addf %166, %168 : vector<32x16xf32>
    %cst_163 = arith.constant 0.000000e+00 : f32
    %170 = vector.broadcast %cst_163 : f32 to vector<32x16xf32>
    %171 = arith.maximumf %169, %170 : vector<32x16xf32>
    %c0_164 = arith.constant 0 : index
    %c0_165 = arith.constant 0 : index
    %172 = vector.load %arg17[%c0_164, %c0_165] : memref<16x32xf32, #tpu.memory_space<vmem>>, vector<16x32xf32>
    %cst_166 = arith.constant dense<0.000000e+00> : vector<32x32xf32>
    %173 = tpu.matmul %171, %172, %cst_166 {dimension_numbers = #tpu.dot_dimension_numbers<[1], [0], [0], [1], [0, 0, 1, 1], [], []>} : vector<32x16xf32>, vector<16x32xf32>, vector<32x32xf32> -> vector<32x32xf32>
    %c0_167 = arith.constant 0 : index
    %c0_168 = arith.constant 0 : index
    %174 = vector.load %arg18[%c0_167, %c0_168] : memref<1x32xf32, #tpu.memory_space<vmem>>, vector<1x32xf32>
    %175 = vector.broadcast %174 : vector<1x32xf32> to vector<32x32xf32>
    %176 = arith.addf %173, %175 : vector<32x32xf32>
    %c0_169 = arith.constant 0 : index
    %c0_170 = arith.constant 0 : index
    %177 = vector.load %arg19[%c0_169, %c0_170] : memref<64x32xf32, #tpu.memory_space<vmem>>, vector<64x32xf32>
    %178 = vector.extract_strided_slice %176 {offsets = [0, 0], sizes = [32, 16], strides = [1, 1]} : vector<32x32xf32> to vector<32x16xf32>
    %cst_171 = arith.constant dense<0.000000e+00> : vector<64x16xf32>
    %179 = tpu.matmul %177, %178, %cst_171 {dimension_numbers = #tpu.dot_dimension_numbers<[1], [0], [0], [1], [0, 0, 1, 1], [], []>} : vector<64x32xf32>, vector<32x16xf32>, vector<64x16xf32> -> vector<64x16xf32>
    %c0_172 = arith.constant 0 : index
    %c0_173 = arith.constant 0 : index
    %180 = vector.load %arg20[%c0_172, %c0_173] : memref<64x32xf32, #tpu.memory_space<vmem>>, vector<64x32xf32>
    %181 = vector.extract_strided_slice %176 {offsets = [0, 16], sizes = [32, 16], strides = [1, 1]} : vector<32x32xf32> to vector<32x16xf32>
    %cst_174 = arith.constant dense<0.000000e+00> : vector<64x16xf32>
    %182 = tpu.matmul %180, %181, %cst_174 {dimension_numbers = #tpu.dot_dimension_numbers<[1], [0], [0], [1], [0, 0, 1, 1], [], []>} : vector<64x32xf32>, vector<32x16xf32>, vector<64x16xf32> -> vector<64x16xf32>
    %183 = arith.addf %179, %182 : vector<64x16xf32>
    %c0_175 = arith.constant 0 : index
    %c0_176 = arith.constant 0 : index
    %c0_177 = arith.constant 0 : index
    %184 = vector.load %arg21[%c0_175, %c0_176, %c0_177] : memref<4x4x16xf32, #tpu.memory_space<vmem>>, vector<1x4x16xf32>
    %185 = vector.shape_cast %184 : vector<1x4x16xf32> to vector<4x16xf32>
    %c1_178 = arith.constant 1 : index
    %c0_179 = arith.constant 0 : index
    %c0_180 = arith.constant 0 : index
    %186 = vector.load %arg21[%c1_178, %c0_179, %c0_180] : memref<4x4x16xf32, #tpu.memory_space<vmem>>, vector<1x4x16xf32>
    %187 = vector.shape_cast %186 : vector<1x4x16xf32> to vector<4x16xf32>
    %c2_181 = arith.constant 2 : index
    %c0_182 = arith.constant 0 : index
    %c0_183 = arith.constant 0 : index
    %188 = vector.load %arg21[%c2_181, %c0_182, %c0_183] : memref<4x4x16xf32, #tpu.memory_space<vmem>>, vector<1x4x16xf32>
    %189 = vector.shape_cast %188 : vector<1x4x16xf32> to vector<4x16xf32>
    %c3_184 = arith.constant 3 : index
    %c0_185 = arith.constant 0 : index
    %c0_186 = arith.constant 0 : index
    %190 = vector.load %arg21[%c3_184, %c0_185, %c0_186] : memref<4x4x16xf32, #tpu.memory_space<vmem>>, vector<1x4x16xf32>
    %191 = vector.shape_cast %190 : vector<1x4x16xf32> to vector<4x16xf32>
    %192 = tpu.iota {dimensions = array<i32: 1>} : vector<4x16xi32>
    %c8_i32 = arith.constant 8 : i32
    %193 = vector.broadcast %c8_i32 : i32 to vector<4x16xi32>
    %194 = arith.cmpi sge, %192, %193 : vector<4x16xi32>
    %c12_i32 = arith.constant 12 : i32
    %195 = vector.broadcast %c12_i32 : i32 to vector<4x16xi32>
    %196 = arith.cmpi slt, %192, %195 : vector<4x16xi32>
    %197 = arith.andi %194, %196 : vector<4x16xi1>
    %cst_187 = arith.constant 0.000000e+00 : f32
    %198 = vector.broadcast %cst_187 : f32 to vector<4x4xf32>
    %cst_188 = arith.constant 0.000000e+00 : f32
    %199 = vector.broadcast %cst_188 : f32 to vector<4x4xf32>
    %200 = vector.extract_strided_slice %183 {offsets = [0, 0], sizes = [4, 16], strides = [1, 1]} : vector<64x16xf32> to vector<4x16xf32>
    %201 = vector.extract_strided_slice %198 {offsets = [0, 0], sizes = [4, 1], strides = [1, 1]} : vector<4x4xf32> to vector<4x1xf32>
    %202 = vector.broadcast %201 : vector<4x1xf32> to vector<4x16xf32>
    %203 = arith.mulf %202, %185 : vector<4x16xf32>
    %204 = vector.extract_strided_slice %198 {offsets = [0, 1], sizes = [4, 1], strides = [1, 1]} : vector<4x4xf32> to vector<4x1xf32>
    %205 = vector.broadcast %204 : vector<4x1xf32> to vector<4x16xf32>
    %206 = arith.mulf %205, %187 : vector<4x16xf32>
    %207 = vector.extract_strided_slice %198 {offsets = [0, 2], sizes = [4, 1], strides = [1, 1]} : vector<4x4xf32> to vector<4x1xf32>
    %208 = vector.broadcast %207 : vector<4x1xf32> to vector<4x16xf32>
    %209 = arith.mulf %208, %189 : vector<4x16xf32>
    %210 = vector.extract_strided_slice %198 {offsets = [0, 3], sizes = [4, 1], strides = [1, 1]} : vector<4x4xf32> to vector<4x1xf32>
    %211 = vector.broadcast %210 : vector<4x1xf32> to vector<4x16xf32>
    %212 = arith.mulf %211, %191 : vector<4x16xf32>
    %213 = arith.addf %203, %206 : vector<4x16xf32>
    %214 = arith.addf %209, %212 : vector<4x16xf32>
    %215 = arith.addf %213, %214 : vector<4x16xf32>
    %216 = arith.addf %200, %215 : vector<4x16xf32>
    %cst_189 = arith.constant 5.000000e-01 : f32
    %217 = vector.broadcast %cst_189 : f32 to vector<4x16xf32>
    %218 = arith.mulf %217, %216 : vector<4x16xf32>
    %219 = math.tanh %218 : vector<4x16xf32>
    %cst_190 = arith.constant 5.000000e-01 : f32
    %220 = vector.broadcast %cst_190 : f32 to vector<4x16xf32>
    %221 = arith.mulf %220, %219 : vector<4x16xf32>
    %cst_191 = arith.constant 5.000000e-01 : f32
    %222 = vector.broadcast %cst_191 : f32 to vector<4x16xf32>
    %223 = arith.addf %221, %222 : vector<4x16xf32>
    %224 = math.tanh %216 : vector<4x16xf32>
    %225 = arith.select %197, %224, %223 : vector<4x16xi1>, vector<4x16xf32>
    %226 = vector.extract_strided_slice %225 {offsets = [0, 0], sizes = [4, 4], strides = [1, 1]} : vector<4x16xf32> to vector<4x4xf32>
    %227 = vector.extract_strided_slice %225 {offsets = [0, 4], sizes = [4, 4], strides = [1, 1]} : vector<4x16xf32> to vector<4x4xf32>
    %228 = vector.extract_strided_slice %225 {offsets = [0, 8], sizes = [4, 4], strides = [1, 1]} : vector<4x16xf32> to vector<4x4xf32>
    %229 = vector.extract_strided_slice %225 {offsets = [0, 12], sizes = [4, 4], strides = [1, 1]} : vector<4x16xf32> to vector<4x4xf32>
    %230 = arith.mulf %227, %199 : vector<4x4xf32>
    %231 = arith.mulf %226, %228 : vector<4x4xf32>
    %232 = arith.addf %230, %231 : vector<4x4xf32>
    %233 = math.tanh %232 : vector<4x4xf32>
    %234 = arith.mulf %229, %233 : vector<4x4xf32>
    %235 = vector.extract_strided_slice %183 {offsets = [4, 0], sizes = [4, 16], strides = [1, 1]} : vector<64x16xf32> to vector<4x16xf32>
    %236 = vector.extract_strided_slice %234 {offsets = [0, 0], sizes = [4, 1], strides = [1, 1]} : vector<4x4xf32> to vector<4x1xf32>
    %237 = vector.broadcast %236 : vector<4x1xf32> to vector<4x16xf32>
    %238 = arith.mulf %237, %185 : vector<4x16xf32>
    %239 = vector.extract_strided_slice %234 {offsets = [0, 1], sizes = [4, 1], strides = [1, 1]} : vector<4x4xf32> to vector<4x1xf32>
    %240 = vector.broadcast %239 : vector<4x1xf32> to vector<4x16xf32>
    %241 = arith.mulf %240, %187 : vector<4x16xf32>
    %242 = vector.extract_strided_slice %234 {offsets = [0, 2], sizes = [4, 1], strides = [1, 1]} : vector<4x4xf32> to vector<4x1xf32>
    %243 = vector.broadcast %242 : vector<4x1xf32> to vector<4x16xf32>
    %244 = arith.mulf %243, %189 : vector<4x16xf32>
    %245 = vector.extract_strided_slice %234 {offsets = [0, 3], sizes = [4, 1], strides = [1, 1]} : vector<4x4xf32> to vector<4x1xf32>
    %246 = vector.broadcast %245 : vector<4x1xf32> to vector<4x16xf32>
    %247 = arith.mulf %246, %191 : vector<4x16xf32>
    %248 = arith.addf %238, %241 : vector<4x16xf32>
    %249 = arith.addf %244, %247 : vector<4x16xf32>
    %250 = arith.addf %248, %249 : vector<4x16xf32>
    %251 = arith.addf %235, %250 : vector<4x16xf32>
    %cst_192 = arith.constant 5.000000e-01 : f32
    %252 = vector.broadcast %cst_192 : f32 to vector<4x16xf32>
    %253 = arith.mulf %252, %251 : vector<4x16xf32>
    %254 = math.tanh %253 : vector<4x16xf32>
    %cst_193 = arith.constant 5.000000e-01 : f32
    %255 = vector.broadcast %cst_193 : f32 to vector<4x16xf32>
    %256 = arith.mulf %255, %254 : vector<4x16xf32>
    %cst_194 = arith.constant 5.000000e-01 : f32
    %257 = vector.broadcast %cst_194 : f32 to vector<4x16xf32>
    %258 = arith.addf %256, %257 : vector<4x16xf32>
    %259 = math.tanh %251 : vector<4x16xf32>
    %260 = arith.select %197, %259, %258 : vector<4x16xi1>, vector<4x16xf32>
    %261 = vector.extract_strided_slice %260 {offsets = [0, 0], sizes = [4, 4], strides = [1, 1]} : vector<4x16xf32> to vector<4x4xf32>
    %262 = vector.extract_strided_slice %260 {offsets = [0, 4], sizes = [4, 4], strides = [1, 1]} : vector<4x16xf32> to vector<4x4xf32>
    %263 = vector.extract_strided_slice %260 {offsets = [0, 8], sizes = [4, 4], strides = [1, 1]} : vector<4x16xf32> to vector<4x4xf32>
    %264 = vector.extract_strided_slice %260 {offsets = [0, 12], sizes = [4, 4], strides = [1, 1]} : vector<4x16xf32> to vector<4x4xf32>
    %265 = arith.mulf %262, %232 : vector<4x4xf32>
    %266 = arith.mulf %261, %263 : vector<4x4xf32>
    %267 = arith.addf %265, %266 : vector<4x4xf32>
    %268 = math.tanh %267 : vector<4x4xf32>
    %269 = arith.mulf %264, %268 : vector<4x4xf32>
    %270 = vector.extract_strided_slice %183 {offsets = [8, 0], sizes = [4, 16], strides = [1, 1]} : vector<64x16xf32> to vector<4x16xf32>
    %271 = vector.extract_strided_slice %269 {offsets = [0, 0], sizes = [4, 1], strides = [1, 1]} : vector<4x4xf32> to vector<4x1xf32>
    %272 = vector.broadcast %271 : vector<4x1xf32> to vector<4x16xf32>
    %273 = arith.mulf %272, %185 : vector<4x16xf32>
    %274 = vector.extract_strided_slice %269 {offsets = [0, 1], sizes = [4, 1], strides = [1, 1]} : vector<4x4xf32> to vector<4x1xf32>
    %275 = vector.broadcast %274 : vector<4x1xf32> to vector<4x16xf32>
    %276 = arith.mulf %275, %187 : vector<4x16xf32>
    %277 = vector.extract_strided_slice %269 {offsets = [0, 2], sizes = [4, 1], strides = [1, 1]} : vector<4x4xf32> to vector<4x1xf32>
    %278 = vector.broadcast %277 : vector<4x1xf32> to vector<4x16xf32>
    %279 = arith.mulf %278, %189 : vector<4x16xf32>
    %280 = vector.extract_strided_slice %269 {offsets = [0, 3], sizes = [4, 1], strides = [1, 1]} : vector<4x4xf32> to vector<4x1xf32>
    %281 = vector.broadcast %280 : vector<4x1xf32> to vector<4x16xf32>
    %282 = arith.mulf %281, %191 : vector<4x16xf32>
    %283 = arith.addf %273, %276 : vector<4x16xf32>
    %284 = arith.addf %279, %282 : vector<4x16xf32>
    %285 = arith.addf %283, %284 : vector<4x16xf32>
    %286 = arith.addf %270, %285 : vector<4x16xf32>
    %cst_195 = arith.constant 5.000000e-01 : f32
    %287 = vector.broadcast %cst_195 : f32 to vector<4x16xf32>
    %288 = arith.mulf %287, %286 : vector<4x16xf32>
    %289 = math.tanh %288 : vector<4x16xf32>
    %cst_196 = arith.constant 5.000000e-01 : f32
    %290 = vector.broadcast %cst_196 : f32 to vector<4x16xf32>
    %291 = arith.mulf %290, %289 : vector<4x16xf32>
    %cst_197 = arith.constant 5.000000e-01 : f32
    %292 = vector.broadcast %cst_197 : f32 to vector<4x16xf32>
    %293 = arith.addf %291, %292 : vector<4x16xf32>
    %294 = math.tanh %286 : vector<4x16xf32>
    %295 = arith.select %197, %294, %293 : vector<4x16xi1>, vector<4x16xf32>
    %296 = vector.extract_strided_slice %295 {offsets = [0, 0], sizes = [4, 4], strides = [1, 1]} : vector<4x16xf32> to vector<4x4xf32>
    %297 = vector.extract_strided_slice %295 {offsets = [0, 4], sizes = [4, 4], strides = [1, 1]} : vector<4x16xf32> to vector<4x4xf32>
    %298 = vector.extract_strided_slice %295 {offsets = [0, 8], sizes = [4, 4], strides = [1, 1]} : vector<4x16xf32> to vector<4x4xf32>
    %299 = vector.extract_strided_slice %295 {offsets = [0, 12], sizes = [4, 4], strides = [1, 1]} : vector<4x16xf32> to vector<4x4xf32>
    %300 = arith.mulf %297, %267 : vector<4x4xf32>
    %301 = arith.mulf %296, %298 : vector<4x4xf32>
    %302 = arith.addf %300, %301 : vector<4x4xf32>
    %303 = math.tanh %302 : vector<4x4xf32>
    %304 = arith.mulf %299, %303 : vector<4x4xf32>
    %305 = vector.extract_strided_slice %183 {offsets = [12, 0], sizes = [4, 16], strides = [1, 1]} : vector<64x16xf32> to vector<4x16xf32>
    %306 = vector.extract_strided_slice %304 {offsets = [0, 0], sizes = [4, 1], strides = [1, 1]} : vector<4x4xf32> to vector<4x1xf32>
    %307 = vector.broadcast %306 : vector<4x1xf32> to vector<4x16xf32>
    %308 = arith.mulf %307, %185 : vector<4x16xf32>
    %309 = vector.extract_strided_slice %304 {offsets = [0, 1], sizes = [4, 1], strides = [1, 1]} : vector<4x4xf32> to vector<4x1xf32>
    %310 = vector.broadcast %309 : vector<4x1xf32> to vector<4x16xf32>
    %311 = arith.mulf %310, %187 : vector<4x16xf32>
    %312 = vector.extract_strided_slice %304 {offsets = [0, 2], sizes = [4, 1], strides = [1, 1]} : vector<4x4xf32> to vector<4x1xf32>
    %313 = vector.broadcast %312 : vector<4x1xf32> to vector<4x16xf32>
    %314 = arith.mulf %313, %189 : vector<4x16xf32>
    %315 = vector.extract_strided_slice %304 {offsets = [0, 3], sizes = [4, 1], strides = [1, 1]} : vector<4x4xf32> to vector<4x1xf32>
    %316 = vector.broadcast %315 : vector<4x1xf32> to vector<4x16xf32>
    %317 = arith.mulf %316, %191 : vector<4x16xf32>
    %318 = arith.addf %308, %311 : vector<4x16xf32>
    %319 = arith.addf %314, %317 : vector<4x16xf32>
    %320 = arith.addf %318, %319 : vector<4x16xf32>
    %321 = arith.addf %305, %320 : vector<4x16xf32>
    %cst_198 = arith.constant 5.000000e-01 : f32
    %322 = vector.broadcast %cst_198 : f32 to vector<4x16xf32>
    %323 = arith.mulf %322, %321 : vector<4x16xf32>
    %324 = math.tanh %323 : vector<4x16xf32>
    %cst_199 = arith.constant 5.000000e-01 : f32
    %325 = vector.broadcast %cst_199 : f32 to vector<4x16xf32>
    %326 = arith.mulf %325, %324 : vector<4x16xf32>
    %cst_200 = arith.constant 5.000000e-01 : f32
    %327 = vector.broadcast %cst_200 : f32 to vector<4x16xf32>
    %328 = arith.addf %326, %327 : vector<4x16xf32>
    %329 = math.tanh %321 : vector<4x16xf32>
    %330 = arith.select %197, %329, %328 : vector<4x16xi1>, vector<4x16xf32>
    %331 = vector.extract_strided_slice %330 {offsets = [0, 0], sizes = [4, 4], strides = [1, 1]} : vector<4x16xf32> to vector<4x4xf32>
    %332 = vector.extract_strided_slice %330 {offsets = [0, 4], sizes = [4, 4], strides = [1, 1]} : vector<4x16xf32> to vector<4x4xf32>
    %333 = vector.extract_strided_slice %330 {offsets = [0, 8], sizes = [4, 4], strides = [1, 1]} : vector<4x16xf32> to vector<4x4xf32>
    %334 = vector.extract_strided_slice %330 {offsets = [0, 12], sizes = [4, 4], strides = [1, 1]} : vector<4x16xf32> to vector<4x4xf32>
    %335 = arith.mulf %332, %302 : vector<4x4xf32>
    %336 = arith.mulf %331, %333 : vector<4x4xf32>
    %337 = arith.addf %335, %336 : vector<4x4xf32>
    %338 = math.tanh %337 : vector<4x4xf32>
    %339 = arith.mulf %334, %338 : vector<4x4xf32>
    %340 = vector.extract_strided_slice %339 {offsets = [0, 0], sizes = [2, 4], strides = [1, 1]} : vector<4x4xf32> to vector<2x4xf32>
    %c0_201 = arith.constant 0 : index
    %c0_202 = arith.constant 0 : index
    %c0_203 = arith.constant 0 : index
    %341 = vector.load %arg22[%c0_201, %c0_202, %c0_203] : memref<2x4x8xf32, #tpu.memory_space<vmem>>, vector<2x1x4xf32>
    %342 = vector.shape_cast %341 : vector<2x1x4xf32> to vector<2x4xf32>
    %343 = vector.shape_cast %340 : vector<2x4xf32> to vector<2x1x4xf32>
    tpu.vector_store %arg22[%c0_201, %c0_202, %c0_203], %343 {strides = array<i32>} : memref<2x4x8xf32, #tpu.memory_space<vmem>>, vector<2x1x4xf32>,
    %344 = vector.extract_strided_slice %339 {offsets = [2, 0], sizes = [2, 4], strides = [1, 1]} : vector<4x4xf32> to vector<2x4xf32>
    %c0_204 = arith.constant 0 : index
    %c3_205 = arith.constant 3 : index
    %c4_206 = arith.constant 4 : index
    %345 = vector.load %arg22[%c0_204, %c3_205, %c4_206] : memref<2x4x8xf32, #tpu.memory_space<vmem>>, vector<2x1x4xf32>
    %346 = vector.shape_cast %345 : vector<2x1x4xf32> to vector<2x4xf32>
    %347 = vector.shape_cast %344 : vector<2x4xf32> to vector<2x1x4xf32>
    tpu.vector_store %arg22[%c0_204, %c3_205, %c4_206], %347 {strides = array<i32>} : memref<2x4x8xf32, #tpu.memory_space<vmem>>, vector<2x1x4xf32>,
    %348 = vector.extract_strided_slice %183 {offsets = [16, 0], sizes = [4, 16], strides = [1, 1]} : vector<64x16xf32> to vector<4x16xf32>
    %349 = vector.extract_strided_slice %339 {offsets = [0, 0], sizes = [4, 1], strides = [1, 1]} : vector<4x4xf32> to vector<4x1xf32>
    %350 = vector.broadcast %349 : vector<4x1xf32> to vector<4x16xf32>
    %351 = arith.mulf %350, %185 : vector<4x16xf32>
    %352 = vector.extract_strided_slice %339 {offsets = [0, 1], sizes = [4, 1], strides = [1, 1]} : vector<4x4xf32> to vector<4x1xf32>
    %353 = vector.broadcast %352 : vector<4x1xf32> to vector<4x16xf32>
    %354 = arith.mulf %353, %187 : vector<4x16xf32>
    %355 = vector.extract_strided_slice %339 {offsets = [0, 2], sizes = [4, 1], strides = [1, 1]} : vector<4x4xf32> to vector<4x1xf32>
    %356 = vector.broadcast %355 : vector<4x1xf32> to vector<4x16xf32>
    %357 = arith.mulf %356, %189 : vector<4x16xf32>
    %358 = vector.extract_strided_slice %339 {offsets = [0, 3], sizes = [4, 1], strides = [1, 1]} : vector<4x4xf32> to vector<4x1xf32>
    %359 = vector.broadcast %358 : vector<4x1xf32> to vector<4x16xf32>
    %360 = arith.mulf %359, %191 : vector<4x16xf32>
    %361 = arith.addf %351, %354 : vector<4x16xf32>
    %362 = arith.addf %357, %360 : vector<4x16xf32>
    %363 = arith.addf %361, %362 : vector<4x16xf32>
    %364 = arith.addf %348, %363 : vector<4x16xf32>
    %cst_207 = arith.constant 5.000000e-01 : f32
    %365 = vector.broadcast %cst_207 : f32 to vector<4x16xf32>
    %366 = arith.mulf %365, %364 : vector<4x16xf32>
    %367 = math.tanh %366 : vector<4x16xf32>
    %cst_208 = arith.constant 5.000000e-01 : f32
    %368 = vector.broadcast %cst_208 : f32 to vector<4x16xf32>
    %369 = arith.mulf %368, %367 : vector<4x16xf32>
    %cst_209 = arith.constant 5.000000e-01 : f32
    %370 = vector.broadcast %cst_209 : f32 to vector<4x16xf32>
    %371 = arith.addf %369, %370 : vector<4x16xf32>
    %372 = math.tanh %364 : vector<4x16xf32>
    %373 = arith.select %197, %372, %371 : vector<4x16xi1>, vector<4x16xf32>
    %374 = vector.extract_strided_slice %373 {offsets = [0, 0], sizes = [4, 4], strides = [1, 1]} : vector<4x16xf32> to vector<4x4xf32>
    %375 = vector.extract_strided_slice %373 {offsets = [0, 4], sizes = [4, 4], strides = [1, 1]} : vector<4x16xf32> to vector<4x4xf32>
    %376 = vector.extract_strided_slice %373 {offsets = [0, 8], sizes = [4, 4], strides = [1, 1]} : vector<4x16xf32> to vector<4x4xf32>
    %377 = vector.extract_strided_slice %373 {offsets = [0, 12], sizes = [4, 4], strides = [1, 1]} : vector<4x16xf32> to vector<4x4xf32>
    %378 = arith.mulf %375, %337 : vector<4x4xf32>
    %379 = arith.mulf %374, %376 : vector<4x4xf32>
    %380 = arith.addf %378, %379 : vector<4x4xf32>
    %381 = math.tanh %380 : vector<4x4xf32>
    %382 = arith.mulf %377, %381 : vector<4x4xf32>
    %383 = vector.extract_strided_slice %183 {offsets = [20, 0], sizes = [4, 16], strides = [1, 1]} : vector<64x16xf32> to vector<4x16xf32>
    %384 = vector.extract_strided_slice %382 {offsets = [0, 0], sizes = [4, 1], strides = [1, 1]} : vector<4x4xf32> to vector<4x1xf32>
    %385 = vector.broadcast %384 : vector<4x1xf32> to vector<4x16xf32>
    %386 = arith.mulf %385, %185 : vector<4x16xf32>
    %387 = vector.extract_strided_slice %382 {offsets = [0, 1], sizes = [4, 1], strides = [1, 1]} : vector<4x4xf32> to vector<4x1xf32>
    %388 = vector.broadcast %387 : vector<4x1xf32> to vector<4x16xf32>
    %389 = arith.mulf %388, %187 : vector<4x16xf32>
    %390 = vector.extract_strided_slice %382 {offsets = [0, 2], sizes = [4, 1], strides = [1, 1]} : vector<4x4xf32> to vector<4x1xf32>
    %391 = vector.broadcast %390 : vector<4x1xf32> to vector<4x16xf32>
    %392 = arith.mulf %391, %189 : vector<4x16xf32>
    %393 = vector.extract_strided_slice %382 {offsets = [0, 3], sizes = [4, 1], strides = [1, 1]} : vector<4x4xf32> to vector<4x1xf32>
    %394 = vector.broadcast %393 : vector<4x1xf32> to vector<4x16xf32>
    %395 = arith.mulf %394, %191 : vector<4x16xf32>
    %396 = arith.addf %386, %389 : vector<4x16xf32>
    %397 = arith.addf %392, %395 : vector<4x16xf32>
    %398 = arith.addf %396, %397 : vector<4x16xf32>
    %399 = arith.addf %383, %398 : vector<4x16xf32>
    %cst_210 = arith.constant 5.000000e-01 : f32
    %400 = vector.broadcast %cst_210 : f32 to vector<4x16xf32>
    %401 = arith.mulf %400, %399 : vector<4x16xf32>
    %402 = math.tanh %401 : vector<4x16xf32>
    %cst_211 = arith.constant 5.000000e-01 : f32
    %403 = vector.broadcast %cst_211 : f32 to vector<4x16xf32>
    %404 = arith.mulf %403, %402 : vector<4x16xf32>
    %cst_212 = arith.constant 5.000000e-01 : f32
    %405 = vector.broadcast %cst_212 : f32 to vector<4x16xf32>
    %406 = arith.addf %404, %405 : vector<4x16xf32>
    %407 = math.tanh %399 : vector<4x16xf32>
    %408 = arith.select %197, %407, %406 : vector<4x16xi1>, vector<4x16xf32>
    %409 = vector.extract_strided_slice %408 {offsets = [0, 0], sizes = [4, 4], strides = [1, 1]} : vector<4x16xf32> to vector<4x4xf32>
    %410 = vector.extract_strided_slice %408 {offsets = [0, 4], sizes = [4, 4], strides = [1, 1]} : vector<4x16xf32> to vector<4x4xf32>
    %411 = vector.extract_strided_slice %408 {offsets = [0, 8], sizes = [4, 4], strides = [1, 1]} : vector<4x16xf32> to vector<4x4xf32>
    %412 = vector.extract_strided_slice %408 {offsets = [0, 12], sizes = [4, 4], strides = [1, 1]} : vector<4x16xf32> to vector<4x4xf32>
    %413 = arith.mulf %410, %380 : vector<4x4xf32>
    %414 = arith.mulf %409, %411 : vector<4x4xf32>
    %415 = arith.addf %413, %414 : vector<4x4xf32>
    %416 = math.tanh %415 : vector<4x4xf32>
    %417 = arith.mulf %412, %416 : vector<4x4xf32>
    %418 = vector.extract_strided_slice %183 {offsets = [24, 0], sizes = [4, 16], strides = [1, 1]} : vector<64x16xf32> to vector<4x16xf32>
    %419 = vector.extract_strided_slice %417 {offsets = [0, 0], sizes = [4, 1], strides = [1, 1]} : vector<4x4xf32> to vector<4x1xf32>
    %420 = vector.broadcast %419 : vector<4x1xf32> to vector<4x16xf32>
    %421 = arith.mulf %420, %185 : vector<4x16xf32>
    %422 = vector.extract_strided_slice %417 {offsets = [0, 1], sizes = [4, 1], strides = [1, 1]} : vector<4x4xf32> to vector<4x1xf32>
    %423 = vector.broadcast %422 : vector<4x1xf32> to vector<4x16xf32>
    %424 = arith.mulf %423, %187 : vector<4x16xf32>
    %425 = vector.extract_strided_slice %417 {offsets = [0, 2], sizes = [4, 1], strides = [1, 1]} : vector<4x4xf32> to vector<4x1xf32>
    %426 = vector.broadcast %425 : vector<4x1xf32> to vector<4x16xf32>
    %427 = arith.mulf %426, %189 : vector<4x16xf32>
    %428 = vector.extract_strided_slice %417 {offsets = [0, 3], sizes = [4, 1], strides = [1, 1]} : vector<4x4xf32> to vector<4x1xf32>
    %429 = vector.broadcast %428 : vector<4x1xf32> to vector<4x16xf32>
    %430 = arith.mulf %429, %191 : vector<4x16xf32>
    %431 = arith.addf %421, %424 : vector<4x16xf32>
    %432 = arith.addf %427, %430 : vector<4x16xf32>
    %433 = arith.addf %431, %432 : vector<4x16xf32>
    %434 = arith.addf %418, %433 : vector<4x16xf32>
    %cst_213 = arith.constant 5.000000e-01 : f32
    %435 = vector.broadcast %cst_213 : f32 to vector<4x16xf32>
    %436 = arith.mulf %435, %434 : vector<4x16xf32>
    %437 = math.tanh %436 : vector<4x16xf32>
    %cst_214 = arith.constant 5.000000e-01 : f32
    %438 = vector.broadcast %cst_214 : f32 to vector<4x16xf32>
    %439 = arith.mulf %438, %437 : vector<4x16xf32>
    %cst_215 = arith.constant 5.000000e-01 : f32
    %440 = vector.broadcast %cst_215 : f32 to vector<4x16xf32>
    %441 = arith.addf %439, %440 : vector<4x16xf32>
    %442 = math.tanh %434 : vector<4x16xf32>
    %443 = arith.select %197, %442, %441 : vector<4x16xi1>, vector<4x16xf32>
    %444 = vector.extract_strided_slice %443 {offsets = [0, 0], sizes = [4, 4], strides = [1, 1]} : vector<4x16xf32> to vector<4x4xf32>
    %445 = vector.extract_strided_slice %443 {offsets = [0, 4], sizes = [4, 4], strides = [1, 1]} : vector<4x16xf32> to vector<4x4xf32>
    %446 = vector.extract_strided_slice %443 {offsets = [0, 8], sizes = [4, 4], strides = [1, 1]} : vector<4x16xf32> to vector<4x4xf32>
    %447 = vector.extract_strided_slice %443 {offsets = [0, 12], sizes = [4, 4], strides = [1, 1]} : vector<4x16xf32> to vector<4x4xf32>
    %448 = arith.mulf %445, %415 : vector<4x4xf32>
    %449 = arith.mulf %444, %446 : vector<4x4xf32>
    %450 = arith.addf %448, %449 : vector<4x4xf32>
    %451 = math.tanh %450 : vector<4x4xf32>
    %452 = arith.mulf %447, %451 : vector<4x4xf32>
    %453 = vector.extract_strided_slice %183 {offsets = [28, 0], sizes = [4, 16], strides = [1, 1]} : vector<64x16xf32> to vector<4x16xf32>
    %454 = vector.extract_strided_slice %452 {offsets = [0, 0], sizes = [4, 1], strides = [1, 1]} : vector<4x4xf32> to vector<4x1xf32>
    %455 = vector.broadcast %454 : vector<4x1xf32> to vector<4x16xf32>
    %456 = arith.mulf %455, %185 : vector<4x16xf32>
    %457 = vector.extract_strided_slice %452 {offsets = [0, 1], sizes = [4, 1], strides = [1, 1]} : vector<4x4xf32> to vector<4x1xf32>
    %458 = vector.broadcast %457 : vector<4x1xf32> to vector<4x16xf32>
    %459 = arith.mulf %458, %187 : vector<4x16xf32>
    %460 = vector.extract_strided_slice %452 {offsets = [0, 2], sizes = [4, 1], strides = [1, 1]} : vector<4x4xf32> to vector<4x1xf32>
    %461 = vector.broadcast %460 : vector<4x1xf32> to vector<4x16xf32>
    %462 = arith.mulf %461, %189 : vector<4x16xf32>
    %463 = vector.extract_strided_slice %452 {offsets = [0, 3], sizes = [4, 1], strides = [1, 1]} : vector<4x4xf32> to vector<4x1xf32>
    %464 = vector.broadcast %463 : vector<4x1xf32> to vector<4x16xf32>
    %465 = arith.mulf %464, %191 : vector<4x16xf32>
    %466 = arith.addf %456, %459 : vector<4x16xf32>
    %467 = arith.addf %462, %465 : vector<4x16xf32>
    %468 = arith.addf %466, %467 : vector<4x16xf32>
    %469 = arith.addf %453, %468 : vector<4x16xf32>
    %cst_216 = arith.constant 5.000000e-01 : f32
    %470 = vector.broadcast %cst_216 : f32 to vector<4x16xf32>
    %471 = arith.mulf %470, %469 : vector<4x16xf32>
    %472 = math.tanh %471 : vector<4x16xf32>
    %cst_217 = arith.constant 5.000000e-01 : f32
    %473 = vector.broadcast %cst_217 : f32 to vector<4x16xf32>
    %474 = arith.mulf %473, %472 : vector<4x16xf32>
    %cst_218 = arith.constant 5.000000e-01 : f32
    %475 = vector.broadcast %cst_218 : f32 to vector<4x16xf32>
    %476 = arith.addf %474, %475 : vector<4x16xf32>
    %477 = math.tanh %469 : vector<4x16xf32>
    %478 = arith.select %197, %477, %476 : vector<4x16xi1>, vector<4x16xf32>
    %479 = vector.extract_strided_slice %478 {offsets = [0, 0], sizes = [4, 4], strides = [1, 1]} : vector<4x16xf32> to vector<4x4xf32>
    %480 = vector.extract_strided_slice %478 {offsets = [0, 4], sizes = [4, 4], strides = [1, 1]} : vector<4x16xf32> to vector<4x4xf32>
    %481 = vector.extract_strided_slice %478 {offsets = [0, 8], sizes = [4, 4], strides = [1, 1]} : vector<4x16xf32> to vector<4x4xf32>
    %482 = vector.extract_strided_slice %478 {offsets = [0, 12], sizes = [4, 4], strides = [1, 1]} : vector<4x16xf32> to vector<4x4xf32>
    %483 = arith.mulf %480, %450 : vector<4x4xf32>
    %484 = arith.mulf %479, %481 : vector<4x4xf32>
    %485 = arith.addf %483, %484 : vector<4x4xf32>
    %486 = math.tanh %485 : vector<4x4xf32>
    %487 = arith.mulf %482, %486 : vector<4x4xf32>
    %488 = vector.extract_strided_slice %487 {offsets = [0, 0], sizes = [2, 4], strides = [1, 1]} : vector<4x4xf32> to vector<2x4xf32>
    %c0_219 = arith.constant 0 : index
    %c1_220 = arith.constant 1 : index
    %c0_221 = arith.constant 0 : index
    %489 = vector.load %arg22[%c0_219, %c1_220, %c0_221] : memref<2x4x8xf32, #tpu.memory_space<vmem>>, vector<2x1x4xf32>
    %490 = vector.shape_cast %489 : vector<2x1x4xf32> to vector<2x4xf32>
    %491 = vector.shape_cast %488 : vector<2x4xf32> to vector<2x1x4xf32>
    tpu.vector_store %arg22[%c0_219, %c1_220, %c0_221], %491 {strides = array<i32>} : memref<2x4x8xf32, #tpu.memory_space<vmem>>, vector<2x1x4xf32>,
    %492 = vector.extract_strided_slice %487 {offsets = [2, 0], sizes = [2, 4], strides = [1, 1]} : vector<4x4xf32> to vector<2x4xf32>
    %c0_222 = arith.constant 0 : index
    %c2_223 = arith.constant 2 : index
    %c4_224 = arith.constant 4 : index
    %493 = vector.load %arg22[%c0_222, %c2_223, %c4_224] : memref<2x4x8xf32, #tpu.memory_space<vmem>>, vector<2x1x4xf32>
    %494 = vector.shape_cast %493 : vector<2x1x4xf32> to vector<2x4xf32>
    %495 = vector.shape_cast %492 : vector<2x4xf32> to vector<2x1x4xf32>
    tpu.vector_store %arg22[%c0_222, %c2_223, %c4_224], %495 {strides = array<i32>} : memref<2x4x8xf32, #tpu.memory_space<vmem>>, vector<2x1x4xf32>,
    %496 = vector.extract_strided_slice %183 {offsets = [32, 0], sizes = [4, 16], strides = [1, 1]} : vector<64x16xf32> to vector<4x16xf32>
    %497 = vector.extract_strided_slice %487 {offsets = [0, 0], sizes = [4, 1], strides = [1, 1]} : vector<4x4xf32> to vector<4x1xf32>
    %498 = vector.broadcast %497 : vector<4x1xf32> to vector<4x16xf32>
    %499 = arith.mulf %498, %185 : vector<4x16xf32>
    %500 = vector.extract_strided_slice %487 {offsets = [0, 1], sizes = [4, 1], strides = [1, 1]} : vector<4x4xf32> to vector<4x1xf32>
    %501 = vector.broadcast %500 : vector<4x1xf32> to vector<4x16xf32>
    %502 = arith.mulf %501, %187 : vector<4x16xf32>
    %503 = vector.extract_strided_slice %487 {offsets = [0, 2], sizes = [4, 1], strides = [1, 1]} : vector<4x4xf32> to vector<4x1xf32>
    %504 = vector.broadcast %503 : vector<4x1xf32> to vector<4x16xf32>
    %505 = arith.mulf %504, %189 : vector<4x16xf32>
    %506 = vector.extract_strided_slice %487 {offsets = [0, 3], sizes = [4, 1], strides = [1, 1]} : vector<4x4xf32> to vector<4x1xf32>
    %507 = vector.broadcast %506 : vector<4x1xf32> to vector<4x16xf32>
    %508 = arith.mulf %507, %191 : vector<4x16xf32>
    %509 = arith.addf %499, %502 : vector<4x16xf32>
    %510 = arith.addf %505, %508 : vector<4x16xf32>
    %511 = arith.addf %509, %510 : vector<4x16xf32>
    %512 = arith.addf %496, %511 : vector<4x16xf32>
    %cst_225 = arith.constant 5.000000e-01 : f32
    %513 = vector.broadcast %cst_225 : f32 to vector<4x16xf32>
    %514 = arith.mulf %513, %512 : vector<4x16xf32>
    %515 = math.tanh %514 : vector<4x16xf32>
    %cst_226 = arith.constant 5.000000e-01 : f32
    %516 = vector.broadcast %cst_226 : f32 to vector<4x16xf32>
    %517 = arith.mulf %516, %515 : vector<4x16xf32>
    %cst_227 = arith.constant 5.000000e-01 : f32
    %518 = vector.broadcast %cst_227 : f32 to vector<4x16xf32>
    %519 = arith.addf %517, %518 : vector<4x16xf32>
    %520 = math.tanh %512 : vector<4x16xf32>
    %521 = arith.select %197, %520, %519 : vector<4x16xi1>, vector<4x16xf32>
    %522 = vector.extract_strided_slice %521 {offsets = [0, 0], sizes = [4, 4], strides = [1, 1]} : vector<4x16xf32> to vector<4x4xf32>
    %523 = vector.extract_strided_slice %521 {offsets = [0, 4], sizes = [4, 4], strides = [1, 1]} : vector<4x16xf32> to vector<4x4xf32>
    %524 = vector.extract_strided_slice %521 {offsets = [0, 8], sizes = [4, 4], strides = [1, 1]} : vector<4x16xf32> to vector<4x4xf32>
    %525 = vector.extract_strided_slice %521 {offsets = [0, 12], sizes = [4, 4], strides = [1, 1]} : vector<4x16xf32> to vector<4x4xf32>
    %526 = arith.mulf %523, %485 : vector<4x4xf32>
    %527 = arith.mulf %522, %524 : vector<4x4xf32>
    %528 = arith.addf %526, %527 : vector<4x4xf32>
    %529 = math.tanh %528 : vector<4x4xf32>
    %530 = arith.mulf %525, %529 : vector<4x4xf32>
    %531 = vector.extract_strided_slice %183 {offsets = [36, 0], sizes = [4, 16], strides = [1, 1]} : vector<64x16xf32> to vector<4x16xf32>
    %532 = vector.extract_strided_slice %530 {offsets = [0, 0], sizes = [4, 1], strides = [1, 1]} : vector<4x4xf32> to vector<4x1xf32>
    %533 = vector.broadcast %532 : vector<4x1xf32> to vector<4x16xf32>
    %534 = arith.mulf %533, %185 : vector<4x16xf32>
    %535 = vector.extract_strided_slice %530 {offsets = [0, 1], sizes = [4, 1], strides = [1, 1]} : vector<4x4xf32> to vector<4x1xf32>
    %536 = vector.broadcast %535 : vector<4x1xf32> to vector<4x16xf32>
    %537 = arith.mulf %536, %187 : vector<4x16xf32>
    %538 = vector.extract_strided_slice %530 {offsets = [0, 2], sizes = [4, 1], strides = [1, 1]} : vector<4x4xf32> to vector<4x1xf32>
    %539 = vector.broadcast %538 : vector<4x1xf32> to vector<4x16xf32>
    %540 = arith.mulf %539, %189 : vector<4x16xf32>
    %541 = vector.extract_strided_slice %530 {offsets = [0, 3], sizes = [4, 1], strides = [1, 1]} : vector<4x4xf32> to vector<4x1xf32>
    %542 = vector.broadcast %541 : vector<4x1xf32> to vector<4x16xf32>
    %543 = arith.mulf %542, %191 : vector<4x16xf32>
    %544 = arith.addf %534, %537 : vector<4x16xf32>
    %545 = arith.addf %540, %543 : vector<4x16xf32>
    %546 = arith.addf %544, %545 : vector<4x16xf32>
    %547 = arith.addf %531, %546 : vector<4x16xf32>
    %cst_228 = arith.constant 5.000000e-01 : f32
    %548 = vector.broadcast %cst_228 : f32 to vector<4x16xf32>
    %549 = arith.mulf %548, %547 : vector<4x16xf32>
    %550 = math.tanh %549 : vector<4x16xf32>
    %cst_229 = arith.constant 5.000000e-01 : f32
    %551 = vector.broadcast %cst_229 : f32 to vector<4x16xf32>
    %552 = arith.mulf %551, %550 : vector<4x16xf32>
    %cst_230 = arith.constant 5.000000e-01 : f32
    %553 = vector.broadcast %cst_230 : f32 to vector<4x16xf32>
    %554 = arith.addf %552, %553 : vector<4x16xf32>
    %555 = math.tanh %547 : vector<4x16xf32>
    %556 = arith.select %197, %555, %554 : vector<4x16xi1>, vector<4x16xf32>
    %557 = vector.extract_strided_slice %556 {offsets = [0, 0], sizes = [4, 4], strides = [1, 1]} : vector<4x16xf32> to vector<4x4xf32>
    %558 = vector.extract_strided_slice %556 {offsets = [0, 4], sizes = [4, 4], strides = [1, 1]} : vector<4x16xf32> to vector<4x4xf32>
    %559 = vector.extract_strided_slice %556 {offsets = [0, 8], sizes = [4, 4], strides = [1, 1]} : vector<4x16xf32> to vector<4x4xf32>
    %560 = vector.extract_strided_slice %556 {offsets = [0, 12], sizes = [4, 4], strides = [1, 1]} : vector<4x16xf32> to vector<4x4xf32>
    %561 = arith.mulf %558, %528 : vector<4x4xf32>
    %562 = arith.mulf %557, %559 : vector<4x4xf32>
    %563 = arith.addf %561, %562 : vector<4x4xf32>
    %564 = math.tanh %563 : vector<4x4xf32>
    %565 = arith.mulf %560, %564 : vector<4x4xf32>
    %566 = vector.extract_strided_slice %183 {offsets = [40, 0], sizes = [4, 16], strides = [1, 1]} : vector<64x16xf32> to vector<4x16xf32>
    %567 = vector.extract_strided_slice %565 {offsets = [0, 0], sizes = [4, 1], strides = [1, 1]} : vector<4x4xf32> to vector<4x1xf32>
    %568 = vector.broadcast %567 : vector<4x1xf32> to vector<4x16xf32>
    %569 = arith.mulf %568, %185 : vector<4x16xf32>
    %570 = vector.extract_strided_slice %565 {offsets = [0, 1], sizes = [4, 1], strides = [1, 1]} : vector<4x4xf32> to vector<4x1xf32>
    %571 = vector.broadcast %570 : vector<4x1xf32> to vector<4x16xf32>
    %572 = arith.mulf %571, %187 : vector<4x16xf32>
    %573 = vector.extract_strided_slice %565 {offsets = [0, 2], sizes = [4, 1], strides = [1, 1]} : vector<4x4xf32> to vector<4x1xf32>
    %574 = vector.broadcast %573 : vector<4x1xf32> to vector<4x16xf32>
    %575 = arith.mulf %574, %189 : vector<4x16xf32>
    %576 = vector.extract_strided_slice %565 {offsets = [0, 3], sizes = [4, 1], strides = [1, 1]} : vector<4x4xf32> to vector<4x1xf32>
    %577 = vector.broadcast %576 : vector<4x1xf32> to vector<4x16xf32>
    %578 = arith.mulf %577, %191 : vector<4x16xf32>
    %579 = arith.addf %569, %572 : vector<4x16xf32>
    %580 = arith.addf %575, %578 : vector<4x16xf32>
    %581 = arith.addf %579, %580 : vector<4x16xf32>
    %582 = arith.addf %566, %581 : vector<4x16xf32>
    %cst_231 = arith.constant 5.000000e-01 : f32
    %583 = vector.broadcast %cst_231 : f32 to vector<4x16xf32>
    %584 = arith.mulf %583, %582 : vector<4x16xf32>
    %585 = math.tanh %584 : vector<4x16xf32>
    %cst_232 = arith.constant 5.000000e-01 : f32
    %586 = vector.broadcast %cst_232 : f32 to vector<4x16xf32>
    %587 = arith.mulf %586, %585 : vector<4x16xf32>
    %cst_233 = arith.constant 5.000000e-01 : f32
    %588 = vector.broadcast %cst_233 : f32 to vector<4x16xf32>
    %589 = arith.addf %587, %588 : vector<4x16xf32>
    %590 = math.tanh %582 : vector<4x16xf32>
    %591 = arith.select %197, %590, %589 : vector<4x16xi1>, vector<4x16xf32>
    %592 = vector.extract_strided_slice %591 {offsets = [0, 0], sizes = [4, 4], strides = [1, 1]} : vector<4x16xf32> to vector<4x4xf32>
    %593 = vector.extract_strided_slice %591 {offsets = [0, 4], sizes = [4, 4], strides = [1, 1]} : vector<4x16xf32> to vector<4x4xf32>
    %594 = vector.extract_strided_slice %591 {offsets = [0, 8], sizes = [4, 4], strides = [1, 1]} : vector<4x16xf32> to vector<4x4xf32>
    %595 = vector.extract_strided_slice %591 {offsets = [0, 12], sizes = [4, 4], strides = [1, 1]} : vector<4x16xf32> to vector<4x4xf32>
    %596 = arith.mulf %593, %563 : vector<4x4xf32>
    %597 = arith.mulf %592, %594 : vector<4x4xf32>
    %598 = arith.addf %596, %597 : vector<4x4xf32>
    %599 = math.tanh %598 : vector<4x4xf32>
    %600 = arith.mulf %595, %599 : vector<4x4xf32>
    %601 = vector.extract_strided_slice %183 {offsets = [44, 0], sizes = [4, 16], strides = [1, 1]} : vector<64x16xf32> to vector<4x16xf32>
    %602 = vector.extract_strided_slice %600 {offsets = [0, 0], sizes = [4, 1], strides = [1, 1]} : vector<4x4xf32> to vector<4x1xf32>
    %603 = vector.broadcast %602 : vector<4x1xf32> to vector<4x16xf32>
    %604 = arith.mulf %603, %185 : vector<4x16xf32>
    %605 = vector.extract_strided_slice %600 {offsets = [0, 1], sizes = [4, 1], strides = [1, 1]} : vector<4x4xf32> to vector<4x1xf32>
    %606 = vector.broadcast %605 : vector<4x1xf32> to vector<4x16xf32>
    %607 = arith.mulf %606, %187 : vector<4x16xf32>
    %608 = vector.extract_strided_slice %600 {offsets = [0, 2], sizes = [4, 1], strides = [1, 1]} : vector<4x4xf32> to vector<4x1xf32>
    %609 = vector.broadcast %608 : vector<4x1xf32> to vector<4x16xf32>
    %610 = arith.mulf %609, %189 : vector<4x16xf32>
    %611 = vector.extract_strided_slice %600 {offsets = [0, 3], sizes = [4, 1], strides = [1, 1]} : vector<4x4xf32> to vector<4x1xf32>
    %612 = vector.broadcast %611 : vector<4x1xf32> to vector<4x16xf32>
    %613 = arith.mulf %612, %191 : vector<4x16xf32>
    %614 = arith.addf %604, %607 : vector<4x16xf32>
    %615 = arith.addf %610, %613 : vector<4x16xf32>
    %616 = arith.addf %614, %615 : vector<4x16xf32>
    %617 = arith.addf %601, %616 : vector<4x16xf32>
    %cst_234 = arith.constant 5.000000e-01 : f32
    %618 = vector.broadcast %cst_234 : f32 to vector<4x16xf32>
    %619 = arith.mulf %618, %617 : vector<4x16xf32>
    %620 = math.tanh %619 : vector<4x16xf32>
    %cst_235 = arith.constant 5.000000e-01 : f32
    %621 = vector.broadcast %cst_235 : f32 to vector<4x16xf32>
    %622 = arith.mulf %621, %620 : vector<4x16xf32>
    %cst_236 = arith.constant 5.000000e-01 : f32
    %623 = vector.broadcast %cst_236 : f32 to vector<4x16xf32>
    %624 = arith.addf %622, %623 : vector<4x16xf32>
    %625 = math.tanh %617 : vector<4x16xf32>
    %626 = arith.select %197, %625, %624 : vector<4x16xi1>, vector<4x16xf32>
    %627 = vector.extract_strided_slice %626 {offsets = [0, 0], sizes = [4, 4], strides = [1, 1]} : vector<4x16xf32> to vector<4x4xf32>
    %628 = vector.extract_strided_slice %626 {offsets = [0, 4], sizes = [4, 4], strides = [1, 1]} : vector<4x16xf32> to vector<4x4xf32>
    %629 = vector.extract_strided_slice %626 {offsets = [0, 8], sizes = [4, 4], strides = [1, 1]} : vector<4x16xf32> to vector<4x4xf32>
    %630 = vector.extract_strided_slice %626 {offsets = [0, 12], sizes = [4, 4], strides = [1, 1]} : vector<4x16xf32> to vector<4x4xf32>
    %631 = arith.mulf %628, %598 : vector<4x4xf32>
    %632 = arith.mulf %627, %629 : vector<4x4xf32>
    %633 = arith.addf %631, %632 : vector<4x4xf32>
    %634 = math.tanh %633 : vector<4x4xf32>
    %635 = arith.mulf %630, %634 : vector<4x4xf32>
    %636 = vector.extract_strided_slice %635 {offsets = [0, 0], sizes = [2, 4], strides = [1, 1]} : vector<4x4xf32> to vector<2x4xf32>
    %c0_237 = arith.constant 0 : index
    %c2_238 = arith.constant 2 : index
    %c0_239 = arith.constant 0 : index
    %637 = vector.load %arg22[%c0_237, %c2_238, %c0_239] : memref<2x4x8xf32, #tpu.memory_space<vmem>>, vector<2x1x4xf32>
    %638 = vector.shape_cast %637 : vector<2x1x4xf32> to vector<2x4xf32>
    %639 = vector.shape_cast %636 : vector<2x4xf32> to vector<2x1x4xf32>
    tpu.vector_store %arg22[%c0_237, %c2_238, %c0_239], %639 {strides = array<i32>} : memref<2x4x8xf32, #tpu.memory_space<vmem>>, vector<2x1x4xf32>,
    %640 = vector.extract_strided_slice %635 {offsets = [2, 0], sizes = [2, 4], strides = [1, 1]} : vector<4x4xf32> to vector<2x4xf32>
    %c0_240 = arith.constant 0 : index
    %c1_241 = arith.constant 1 : index
    %c4_242 = arith.constant 4 : index
    %641 = vector.load %arg22[%c0_240, %c1_241, %c4_242] : memref<2x4x8xf32, #tpu.memory_space<vmem>>, vector<2x1x4xf32>
    %642 = vector.shape_cast %641 : vector<2x1x4xf32> to vector<2x4xf32>
    %643 = vector.shape_cast %640 : vector<2x4xf32> to vector<2x1x4xf32>
    tpu.vector_store %arg22[%c0_240, %c1_241, %c4_242], %643 {strides = array<i32>} : memref<2x4x8xf32, #tpu.memory_space<vmem>>, vector<2x1x4xf32>,
    %644 = vector.extract_strided_slice %183 {offsets = [48, 0], sizes = [4, 16], strides = [1, 1]} : vector<64x16xf32> to vector<4x16xf32>
    %645 = vector.extract_strided_slice %635 {offsets = [0, 0], sizes = [4, 1], strides = [1, 1]} : vector<4x4xf32> to vector<4x1xf32>
    %646 = vector.broadcast %645 : vector<4x1xf32> to vector<4x16xf32>
    %647 = arith.mulf %646, %185 : vector<4x16xf32>
    %648 = vector.extract_strided_slice %635 {offsets = [0, 1], sizes = [4, 1], strides = [1, 1]} : vector<4x4xf32> to vector<4x1xf32>
    %649 = vector.broadcast %648 : vector<4x1xf32> to vector<4x16xf32>
    %650 = arith.mulf %649, %187 : vector<4x16xf32>
    %651 = vector.extract_strided_slice %635 {offsets = [0, 2], sizes = [4, 1], strides = [1, 1]} : vector<4x4xf32> to vector<4x1xf32>
    %652 = vector.broadcast %651 : vector<4x1xf32> to vector<4x16xf32>
    %653 = arith.mulf %652, %189 : vector<4x16xf32>
    %654 = vector.extract_strided_slice %635 {offsets = [0, 3], sizes = [4, 1], strides = [1, 1]} : vector<4x4xf32> to vector<4x1xf32>
    %655 = vector.broadcast %654 : vector<4x1xf32> to vector<4x16xf32>
    %656 = arith.mulf %655, %191 : vector<4x16xf32>
    %657 = arith.addf %647, %650 : vector<4x16xf32>
    %658 = arith.addf %653, %656 : vector<4x16xf32>
    %659 = arith.addf %657, %658 : vector<4x16xf32>
    %660 = arith.addf %644, %659 : vector<4x16xf32>
    %cst_243 = arith.constant 5.000000e-01 : f32
    %661 = vector.broadcast %cst_243 : f32 to vector<4x16xf32>
    %662 = arith.mulf %661, %660 : vector<4x16xf32>
    %663 = math.tanh %662 : vector<4x16xf32>
    %cst_244 = arith.constant 5.000000e-01 : f32
    %664 = vector.broadcast %cst_244 : f32 to vector<4x16xf32>
    %665 = arith.mulf %664, %663 : vector<4x16xf32>
    %cst_245 = arith.constant 5.000000e-01 : f32
    %666 = vector.broadcast %cst_245 : f32 to vector<4x16xf32>
    %667 = arith.addf %665, %666 : vector<4x16xf32>
    %668 = math.tanh %660 : vector<4x16xf32>
    %669 = arith.select %197, %668, %667 : vector<4x16xi1>, vector<4x16xf32>
    %670 = vector.extract_strided_slice %669 {offsets = [0, 0], sizes = [4, 4], strides = [1, 1]} : vector<4x16xf32> to vector<4x4xf32>
    %671 = vector.extract_strided_slice %669 {offsets = [0, 4], sizes = [4, 4], strides = [1, 1]} : vector<4x16xf32> to vector<4x4xf32>
    %672 = vector.extract_strided_slice %669 {offsets = [0, 8], sizes = [4, 4], strides = [1, 1]} : vector<4x16xf32> to vector<4x4xf32>
    %673 = vector.extract_strided_slice %669 {offsets = [0, 12], sizes = [4, 4], strides = [1, 1]} : vector<4x16xf32> to vector<4x4xf32>
    %674 = arith.mulf %671, %633 : vector<4x4xf32>
    %675 = arith.mulf %670, %672 : vector<4x4xf32>
    %676 = arith.addf %674, %675 : vector<4x4xf32>
    %677 = math.tanh %676 : vector<4x4xf32>
    %678 = arith.mulf %673, %677 : vector<4x4xf32>
    %679 = vector.extract_strided_slice %183 {offsets = [52, 0], sizes = [4, 16], strides = [1, 1]} : vector<64x16xf32> to vector<4x16xf32>
    %680 = vector.extract_strided_slice %678 {offsets = [0, 0], sizes = [4, 1], strides = [1, 1]} : vector<4x4xf32> to vector<4x1xf32>
    %681 = vector.broadcast %680 : vector<4x1xf32> to vector<4x16xf32>
    %682 = arith.mulf %681, %185 : vector<4x16xf32>
    %683 = vector.extract_strided_slice %678 {offsets = [0, 1], sizes = [4, 1], strides = [1, 1]} : vector<4x4xf32> to vector<4x1xf32>
    %684 = vector.broadcast %683 : vector<4x1xf32> to vector<4x16xf32>
    %685 = arith.mulf %684, %187 : vector<4x16xf32>
    %686 = vector.extract_strided_slice %678 {offsets = [0, 2], sizes = [4, 1], strides = [1, 1]} : vector<4x4xf32> to vector<4x1xf32>
    %687 = vector.broadcast %686 : vector<4x1xf32> to vector<4x16xf32>
    %688 = arith.mulf %687, %189 : vector<4x16xf32>
    %689 = vector.extract_strided_slice %678 {offsets = [0, 3], sizes = [4, 1], strides = [1, 1]} : vector<4x4xf32> to vector<4x1xf32>
    %690 = vector.broadcast %689 : vector<4x1xf32> to vector<4x16xf32>
    %691 = arith.mulf %690, %191 : vector<4x16xf32>
    %692 = arith.addf %682, %685 : vector<4x16xf32>
    %693 = arith.addf %688, %691 : vector<4x16xf32>
    %694 = arith.addf %692, %693 : vector<4x16xf32>
    %695 = arith.addf %679, %694 : vector<4x16xf32>
    %cst_246 = arith.constant 5.000000e-01 : f32
    %696 = vector.broadcast %cst_246 : f32 to vector<4x16xf32>
    %697 = arith.mulf %696, %695 : vector<4x16xf32>
    %698 = math.tanh %697 : vector<4x16xf32>
    %cst_247 = arith.constant 5.000000e-01 : f32
    %699 = vector.broadcast %cst_247 : f32 to vector<4x16xf32>
    %700 = arith.mulf %699, %698 : vector<4x16xf32>
    %cst_248 = arith.constant 5.000000e-01 : f32
    %701 = vector.broadcast %cst_248 : f32 to vector<4x16xf32>
    %702 = arith.addf %700, %701 : vector<4x16xf32>
    %703 = math.tanh %695 : vector<4x16xf32>
    %704 = arith.select %197, %703, %702 : vector<4x16xi1>, vector<4x16xf32>
    %705 = vector.extract_strided_slice %704 {offsets = [0, 0], sizes = [4, 4], strides = [1, 1]} : vector<4x16xf32> to vector<4x4xf32>
    %706 = vector.extract_strided_slice %704 {offsets = [0, 4], sizes = [4, 4], strides = [1, 1]} : vector<4x16xf32> to vector<4x4xf32>
    %707 = vector.extract_strided_slice %704 {offsets = [0, 8], sizes = [4, 4], strides = [1, 1]} : vector<4x16xf32> to vector<4x4xf32>
    %708 = vector.extract_strided_slice %704 {offsets = [0, 12], sizes = [4, 4], strides = [1, 1]} : vector<4x16xf32> to vector<4x4xf32>
    %709 = arith.mulf %706, %676 : vector<4x4xf32>
    %710 = arith.mulf %705, %707 : vector<4x4xf32>
    %711 = arith.addf %709, %710 : vector<4x4xf32>
    %712 = math.tanh %711 : vector<4x4xf32>
    %713 = arith.mulf %708, %712 : vector<4x4xf32>
    %714 = vector.extract_strided_slice %183 {offsets = [56, 0], sizes = [4, 16], strides = [1, 1]} : vector<64x16xf32> to vector<4x16xf32>
    %715 = vector.extract_strided_slice %713 {offsets = [0, 0], sizes = [4, 1], strides = [1, 1]} : vector<4x4xf32> to vector<4x1xf32>
    %716 = vector.broadcast %715 : vector<4x1xf32> to vector<4x16xf32>
    %717 = arith.mulf %716, %185 : vector<4x16xf32>
    %718 = vector.extract_strided_slice %713 {offsets = [0, 1], sizes = [4, 1], strides = [1, 1]} : vector<4x4xf32> to vector<4x1xf32>
    %719 = vector.broadcast %718 : vector<4x1xf32> to vector<4x16xf32>
    %720 = arith.mulf %719, %187 : vector<4x16xf32>
    %721 = vector.extract_strided_slice %713 {offsets = [0, 2], sizes = [4, 1], strides = [1, 1]} : vector<4x4xf32> to vector<4x1xf32>
    %722 = vector.broadcast %721 : vector<4x1xf32> to vector<4x16xf32>
    %723 = arith.mulf %722, %189 : vector<4x16xf32>
    %724 = vector.extract_strided_slice %713 {offsets = [0, 3], sizes = [4, 1], strides = [1, 1]} : vector<4x4xf32> to vector<4x1xf32>
    %725 = vector.broadcast %724 : vector<4x1xf32> to vector<4x16xf32>
    %726 = arith.mulf %725, %191 : vector<4x16xf32>
    %727 = arith.addf %717, %720 : vector<4x16xf32>
    %728 = arith.addf %723, %726 : vector<4x16xf32>
    %729 = arith.addf %727, %728 : vector<4x16xf32>
    %730 = arith.addf %714, %729 : vector<4x16xf32>
    %cst_249 = arith.constant 5.000000e-01 : f32
    %731 = vector.broadcast %cst_249 : f32 to vector<4x16xf32>
    %732 = arith.mulf %731, %730 : vector<4x16xf32>
    %733 = math.tanh %732 : vector<4x16xf32>
    %cst_250 = arith.constant 5.000000e-01 : f32
    %734 = vector.broadcast %cst_250 : f32 to vector<4x16xf32>
    %735 = arith.mulf %734, %733 : vector<4x16xf32>
    %cst_251 = arith.constant 5.000000e-01 : f32
    %736 = vector.broadcast %cst_251 : f32 to vector<4x16xf32>
    %737 = arith.addf %735, %736 : vector<4x16xf32>
    %738 = math.tanh %730 : vector<4x16xf32>
    %739 = arith.select %197, %738, %737 : vector<4x16xi1>, vector<4x16xf32>
    %740 = vector.extract_strided_slice %739 {offsets = [0, 0], sizes = [4, 4], strides = [1, 1]} : vector<4x16xf32> to vector<4x4xf32>
    %741 = vector.extract_strided_slice %739 {offsets = [0, 4], sizes = [4, 4], strides = [1, 1]} : vector<4x16xf32> to vector<4x4xf32>
    %742 = vector.extract_strided_slice %739 {offsets = [0, 8], sizes = [4, 4], strides = [1, 1]} : vector<4x16xf32> to vector<4x4xf32>
    %743 = vector.extract_strided_slice %739 {offsets = [0, 12], sizes = [4, 4], strides = [1, 1]} : vector<4x16xf32> to vector<4x4xf32>
    %744 = arith.mulf %741, %711 : vector<4x4xf32>
    %745 = arith.mulf %740, %742 : vector<4x4xf32>
    %746 = arith.addf %744, %745 : vector<4x4xf32>
    %747 = math.tanh %746 : vector<4x4xf32>
    %748 = arith.mulf %743, %747 : vector<4x4xf32>
    %749 = vector.extract_strided_slice %183 {offsets = [60, 0], sizes = [4, 16], strides = [1, 1]} : vector<64x16xf32> to vector<4x16xf32>
    %750 = vector.extract_strided_slice %748 {offsets = [0, 0], sizes = [4, 1], strides = [1, 1]} : vector<4x4xf32> to vector<4x1xf32>
    %751 = vector.broadcast %750 : vector<4x1xf32> to vector<4x16xf32>
    %752 = arith.mulf %751, %185 : vector<4x16xf32>
    %753 = vector.extract_strided_slice %748 {offsets = [0, 1], sizes = [4, 1], strides = [1, 1]} : vector<4x4xf32> to vector<4x1xf32>
    %754 = vector.broadcast %753 : vector<4x1xf32> to vector<4x16xf32>
    %755 = arith.mulf %754, %187 : vector<4x16xf32>
    %756 = vector.extract_strided_slice %748 {offsets = [0, 2], sizes = [4, 1], strides = [1, 1]} : vector<4x4xf32> to vector<4x1xf32>
    %757 = vector.broadcast %756 : vector<4x1xf32> to vector<4x16xf32>
    %758 = arith.mulf %757, %189 : vector<4x16xf32>
    %759 = vector.extract_strided_slice %748 {offsets = [0, 3], sizes = [4, 1], strides = [1, 1]} : vector<4x4xf32> to vector<4x1xf32>
    %760 = vector.broadcast %759 : vector<4x1xf32> to vector<4x16xf32>
    %761 = arith.mulf %760, %191 : vector<4x16xf32>
    %762 = arith.addf %752, %755 : vector<4x16xf32>
    %763 = arith.addf %758, %761 : vector<4x16xf32>
    %764 = arith.addf %762, %763 : vector<4x16xf32>
    %765 = arith.addf %749, %764 : vector<4x16xf32>
    %cst_252 = arith.constant 5.000000e-01 : f32
    %766 = vector.broadcast %cst_252 : f32 to vector<4x16xf32>
    %767 = arith.mulf %766, %765 : vector<4x16xf32>
    %768 = math.tanh %767 : vector<4x16xf32>
    %cst_253 = arith.constant 5.000000e-01 : f32
    %769 = vector.broadcast %cst_253 : f32 to vector<4x16xf32>
    %770 = arith.mulf %769, %768 : vector<4x16xf32>
    %cst_254 = arith.constant 5.000000e-01 : f32
    %771 = vector.broadcast %cst_254 : f32 to vector<4x16xf32>
    %772 = arith.addf %770, %771 : vector<4x16xf32>
    %773 = math.tanh %765 : vector<4x16xf32>
    %774 = arith.select %197, %773, %772 : vector<4x16xi1>, vector<4x16xf32>
    %775 = vector.extract_strided_slice %774 {offsets = [0, 0], sizes = [4, 4], strides = [1, 1]} : vector<4x16xf32> to vector<4x4xf32>
    %776 = vector.extract_strided_slice %774 {offsets = [0, 4], sizes = [4, 4], strides = [1, 1]} : vector<4x16xf32> to vector<4x4xf32>
    %777 = vector.extract_strided_slice %774 {offsets = [0, 8], sizes = [4, 4], strides = [1, 1]} : vector<4x16xf32> to vector<4x4xf32>
    %778 = vector.extract_strided_slice %774 {offsets = [0, 12], sizes = [4, 4], strides = [1, 1]} : vector<4x16xf32> to vector<4x4xf32>
    %779 = arith.mulf %776, %746 : vector<4x4xf32>
    %780 = arith.mulf %775, %777 : vector<4x4xf32>
    %781 = arith.addf %779, %780 : vector<4x4xf32>
    %782 = math.tanh %781 : vector<4x4xf32>
    %783 = arith.mulf %778, %782 : vector<4x4xf32>
    %784 = vector.extract_strided_slice %783 {offsets = [0, 0], sizes = [2, 4], strides = [1, 1]} : vector<4x4xf32> to vector<2x4xf32>
    %c0_255 = arith.constant 0 : index
    %c3_256 = arith.constant 3 : index
    %c0_257 = arith.constant 0 : index
    %785 = vector.load %arg22[%c0_255, %c3_256, %c0_257] : memref<2x4x8xf32, #tpu.memory_space<vmem>>, vector<2x1x4xf32>
    %786 = vector.shape_cast %785 : vector<2x1x4xf32> to vector<2x4xf32>
    %787 = vector.shape_cast %784 : vector<2x4xf32> to vector<2x1x4xf32>
    tpu.vector_store %arg22[%c0_255, %c3_256, %c0_257], %787 {strides = array<i32>} : memref<2x4x8xf32, #tpu.memory_space<vmem>>, vector<2x1x4xf32>,
    %788 = vector.extract_strided_slice %783 {offsets = [2, 0], sizes = [2, 4], strides = [1, 1]} : vector<4x4xf32> to vector<2x4xf32>
    %c0_258 = arith.constant 0 : index
    %c0_259 = arith.constant 0 : index
    %c4_260 = arith.constant 4 : index
    %789 = vector.load %arg22[%c0_258, %c0_259, %c4_260] : memref<2x4x8xf32, #tpu.memory_space<vmem>>, vector<2x1x4xf32>
    %790 = vector.shape_cast %789 : vector<2x1x4xf32> to vector<2x4xf32>
    %791 = vector.shape_cast %788 : vector<2x4xf32> to vector<2x1x4xf32>
    tpu.vector_store %arg22[%c0_258, %c0_259, %c4_260], %791 {strides = array<i32>} : memref<2x4x8xf32, #tpu.memory_space<vmem>>, vector<2x1x4xf32>,
    return
  }
  func.func @transform_0(%arg0: i32) -> (i32, i32) {
    %c0_i32 = arith.constant 0 : i32
    %c0_i32_0 = arith.constant 0 : i32
    return %arg0, %c0_i32 : i32, i32
  }
  func.func @transform_1(%arg0: i32) -> (i32, i32, i32) {
    %c0_i32 = arith.constant 0 : i32
    %c0_i32_0 = arith.constant 0 : i32
    %c0_i32_1 = arith.constant 0 : i32
    %c0_i32_2 = arith.constant 0 : i32
    return %c0_i32, %c0_i32_0, %c0_i32_1 : i32, i32, i32
  }
  func.func @transform_2(%arg0: i32) -> (i32, i32) {
    %c0_i32 = arith.constant 0 : i32
    %c0_i32_0 = arith.constant 0 : i32
    %c0_i32_1 = arith.constant 0 : i32
    return %c0_i32, %c0_i32_0 : i32, i32
  }
  func.func @transform_3(%arg0: i32) -> (i32, i32) {
    %c0_i32 = arith.constant 0 : i32
    %c0_i32_0 = arith.constant 0 : i32
    %c0_i32_1 = arith.constant 0 : i32
    return %c0_i32, %c0_i32_0 : i32, i32
  }
  func.func @transform_4(%arg0: i32) -> (i32, i32, i32) {
    %c0_i32 = arith.constant 0 : i32
    %c0_i32_0 = arith.constant 0 : i32
    %c0_i32_1 = arith.constant 0 : i32
    %c0_i32_2 = arith.constant 0 : i32
    return %c0_i32, %c0_i32_0, %c0_i32_1 : i32, i32, i32
  }
  func.func @transform_5(%arg0: i32) -> (i32, i32) {
    %c0_i32 = arith.constant 0 : i32
    %c0_i32_0 = arith.constant 0 : i32
    %c0_i32_1 = arith.constant 0 : i32
    return %c0_i32, %c0_i32_0 : i32, i32
  }
  func.func @transform_6(%arg0: i32) -> (i32, i32) {
    %c0_i32 = arith.constant 0 : i32
    %c0_i32_0 = arith.constant 0 : i32
    %c0_i32_1 = arith.constant 0 : i32
    return %c0_i32, %c0_i32_0 : i32, i32
  }
  func.func @transform_7(%arg0: i32) -> (i32, i32) {
    %c0_i32 = arith.constant 0 : i32
    %c0_i32_0 = arith.constant 0 : i32
    %c0_i32_1 = arith.constant 0 : i32
    return %c0_i32, %c0_i32_0 : i32, i32
  }
  func.func @transform_8(%arg0: i32) -> (i32, i32, i32) {
    %c0_i32 = arith.constant 0 : i32
    %c0_i32_0 = arith.constant 0 : i32
    %c0_i32_1 = arith.constant 0 : i32
    %c0_i32_2 = arith.constant 0 : i32
    return %c0_i32, %c0_i32_0, %c0_i32_1 : i32, i32, i32
  }
  func.func @transform_9(%arg0: i32) -> (i32, i32) {
    %c0_i32 = arith.constant 0 : i32
    %c0_i32_0 = arith.constant 0 : i32
    %c0_i32_1 = arith.constant 0 : i32
    return %c0_i32, %c0_i32_0 : i32, i32
  }
  func.func @transform_10(%arg0: i32) -> (i32, i32) {
    %c0_i32 = arith.constant 0 : i32
    %c0_i32_0 = arith.constant 0 : i32
    %c0_i32_1 = arith.constant 0 : i32
    return %c0_i32, %c0_i32_0 : i32, i32
  }
  func.func @transform_11(%arg0: i32) -> (i32, i32) {
    %c0_i32 = arith.constant 0 : i32
    %c0_i32_0 = arith.constant 0 : i32
    %c0_i32_1 = arith.constant 0 : i32
    return %c0_i32, %c0_i32_0 : i32, i32
  }
  func.func @transform_12(%arg0: i32) -> (i32, i32, i32) {
    %c0_i32 = arith.constant 0 : i32
    %c0_i32_0 = arith.constant 0 : i32
    %c0_i32_1 = arith.constant 0 : i32
    %c0_i32_2 = arith.constant 0 : i32
    return %c0_i32, %c0_i32_0, %c0_i32_1 : i32, i32, i32
  }
  func.func @transform_13(%arg0: i32) -> (i32, i32) {
    %c0_i32 = arith.constant 0 : i32
    %c0_i32_0 = arith.constant 0 : i32
    %c0_i32_1 = arith.constant 0 : i32
    return %c0_i32, %c0_i32_0 : i32, i32
  }
  func.func @transform_14(%arg0: i32) -> (i32, i32) {
    %c0_i32 = arith.constant 0 : i32
    %c0_i32_0 = arith.constant 0 : i32
    %c0_i32_1 = arith.constant 0 : i32
    return %c0_i32, %c0_i32_0 : i32, i32
  }
  func.func @transform_15(%arg0: i32) -> (i32, i32) {
    %c0_i32 = arith.constant 0 : i32
    %c0_i32_0 = arith.constant 0 : i32
    %c0_i32_1 = arith.constant 0 : i32
    return %c0_i32, %c0_i32_0 : i32, i32
  }
  func.func @transform_16(%arg0: i32) -> (i32, i32) {
    %c0_i32 = arith.constant 0 : i32
    %c0_i32_0 = arith.constant 0 : i32
    %c0_i32_1 = arith.constant 0 : i32
    return %c0_i32, %c0_i32_0 : i32, i32
  }
  func.func @transform_17(%arg0: i32) -> (i32, i32) {
    %c0_i32 = arith.constant 0 : i32
    %c0_i32_0 = arith.constant 0 : i32
    %c0_i32_1 = arith.constant 0 : i32
    return %c0_i32, %c0_i32_0 : i32, i32
  }
  func.func @transform_18(%arg0: i32) -> (i32, i32) {
    %c0_i32 = arith.constant 0 : i32
    %c0_i32_0 = arith.constant 0 : i32
    %c0_i32_1 = arith.constant 0 : i32
    return %c0_i32, %c0_i32_0 : i32, i32
  }
  func.func @transform_19(%arg0: i32) -> (i32, i32) {
    %c0_i32 = arith.constant 0 : i32
    %c0_i32_0 = arith.constant 0 : i32
    %c0_i32_1 = arith.constant 0 : i32
    return %c0_i32, %c0_i32_0 : i32, i32
  }
  func.func @transform_20(%arg0: i32) -> (i32, i32, i32) {
    %c0_i32 = arith.constant 0 : i32
    %c0_i32_0 = arith.constant 0 : i32
    %c0_i32_1 = arith.constant 0 : i32
    %c0_i32_2 = arith.constant 0 : i32
    return %c0_i32, %c0_i32_0, %c0_i32_1 : i32, i32, i32
  }
  func.func @transform_21(%arg0: i32) -> (i32, i32, i32) {
    %c0_i32 = arith.constant 0 : i32
    %c0_i32_0 = arith.constant 0 : i32
    %c0_i32_1 = arith.constant 0 : i32
    return %arg0, %c0_i32, %c0_i32_0 : i32, i32, i32
  }
}

</mosaic_0001>

<bundles_post_ra>
// kernel: _lambda_.1
= control target key start
LH: loop header
LB: loop body
LE: loop exit
PB: predicated region body
PF: predicated region fallthrough
CT: control target
= control target key end

     0   :  { %s8496_s0 = inlined_call_operand.vmem [shape: f32[32,8], index: 0, kind: input, shape index: {}]   ;;  %s8497_s1 = inlined_call_operand.vmem [shape: f32[5,32,32], index: 1, kind: input, shape index: {}]   ;;  %s8498_s2 = inlined_call_operand.vmem [shape: f32[32,32], index: 2, kind: input, shape index: {}]   ;;  %s8499_s3 = inlined_call_operand.vmem [shape: f32[16,16], index: 3, kind: input, shape index: {}]   ;;  %s8500_s4 = inlined_call_operand.vmem [shape: f32[5,8,16], index: 4, kind: input, shape index: {}]   ;;  %s8501_s5 = inlined_call_operand.vmem [shape: f32[1,16], index: 5, kind: input, shape index: {}]   ;;  %s8502_s6 = inlined_call_operand.vmem [shape: f32[1,16], index: 6, kind: input, shape index: {}]   ;;  %s8503_s7 = inlined_call_operand.vmem [shape: f32[1,16], index: 7, kind: input, shape index: {}]   ;;  %s8504_s8 = inlined_call_operand.vmem [shape: f32[5,16,16], index: 8, kind: input, shape index: {}]   ;;  %s8505_s9 = inlined_call_operand.vmem [shape: f32[1,16], index: 9, kind: input, shape index: {}]   ;;  %s8506_s10 = inlined_call_operand.vmem [shape: f32[1,16], index: 10, kind: input, shape index: {}]   ;;  %s8507_s11 = inlined_call_operand.vmem [shape: f32[1,16], index: 11, kind: input, shape index: {}]   ;;  %s8508_s12 = inlined_call_operand.vmem [shape: f32[5,16,16], index: 12, kind: input, shape index: {}]   ;;  %s8509_s13 = inlined_call_operand.vmem [shape: f32[1,16], index: 13, kind: input, shape index: {}]   ;;  %s8510_s14 = inlined_call_operand.vmem [shape: f32[1,16], index: 14, kind: input, shape index: {}]   ;;  %s8511_s15 = inlined_call_operand.vmem [shape: f32[1,16], index: 15, kind: input, shape index: {}]   ;;  %s8512_s16 = inlined_call_operand.vmem [shape: f32[16,32], index: 16, kind: input, shape index: {}]   ;;  %s8513_s17 = inlined_call_operand.vmem [shape: f32[1,32], index: 17, kind: input, shape index: {}]   ;;  %s8514_s18 = inlined_call_operand.vmem [shape: f32[64,32], index: 18, kind: input, shape index: {}]   ;;  %s8515_s19 = inlined_call_operand.vmem [shape: f32[64,32], index: 19, kind: input, shape index: {}]   ;;  %s8516_s20 = inlined_call_operand.vmem [shape: f32[4,4,16], index: 20, kind: input, shape index: {}]   ;;  %s8517_s21 = inlined_call_operand.hbm [shape: f32[2,4,8], index: 21, kind: output, shape index: {}]  }
   0x1   :  { %8523 = sst [smem:[#allocation5_spill]] %s8496_s0 }
   0x2   :  { %8524 = sst [smem:[#allocation6_spill]] %s8497_s1 }
   0x3   :  { %8525 = sst [smem:[#allocation7_spill]] %s8498_s2 }
   0x4   :  { %8526 = sst [smem:[#allocation8_spill]] %s8499_s3 }
   0x5   :  { %8527 = sst [smem:[#allocation9_spill]] %s8500_s4 }
   0x6   :  { %8528 = sst [smem:[#allocation10_spill]] %s8501_s5 }
   0x7   :  { %s8529_s26 = sld [smem:[#allocation5_spill]]  ;;  %vm78_vm0 = vcmask 261120   ;;  %s8530_s22 = sld [smem:[#allocation6_spill]] }
   0xd   :  { %v69_v0 = vld [vmem:[%s8529_s26] sm:$0xff]  ;;  %v70_v1 = vld [vmem:[%s8529_s26 + $0x8] sm:$0xff]  ;;  %v71_v2 = vld [vmem:[%s8529_s26 + $0x10] sm:$0xff] }
   0xe   :  { %v6852_v3 = vpack.c.bf16 %v70_v1, %v69_v0  ;;  %v72_v4 = vld [vmem:[%s8529_s26 + $0x18] sm:$0xff]  ;;  %v7533_v5 = vld [vmem:[%s8530_s22] sm:$0xff] }
   0xf   :  { %v7535_v6 = vpack.c.bf16 %v72_v4, %v71_v2  ;;  %6316 = vmatprep.mubr.msk.f32.mxu0 %vm78_vm0, %v7533_v5 }
  0x10   :  { %26 = vsyncpa [#allocation3], 0  ;;  %6853 = vmatprep.subr.bf16.mxu0 %v6852_v3  ;;  %v7544_v7 = vld [vmem:[%s8530_s22 + $0x8] sm:$0xff]  ;;  %v7549_v8 = vld [vmem:[%s8530_s22 + $0x10] sm:$0xff]  ;;  %s8531_s28 = sld [smem:[#allocation9_spill]]  ;;  %vm177_vm1 = vcmask 64512  }
  0x11   :  { %6855 = vmatpush3.bf16.msra.mxu0 %v6852_v3  ;;  %v7558_v9 = vld [vmem:[%s8530_s22 + $0x18] sm:$0xff]  ;;  %v7570_v11 = vld [vmem:[%s8530_s22 + $0x40] sm:$0xff]  ;;  %v7575_v12 = vld [vmem:[%s8530_s22 + $0x48] sm:$0xff]  ;;  %s8532_s0 = sld [smem:[#allocation7_spill]]  ;;  %s8533_s5 = sld [smem:[#allocation10_spill]]  ;;  %vm1208_vm2 = vcmask 130048  }
  0x12   :  { %6857 = vmatprep.subr.bf16.mxu0 %v7535_v6  ;;  %v7580_v13 = vld [vmem:[%s8530_s22 + $0x50] sm:$0xff]  ;;  %v7591_v14 = vld [vmem:[%s8530_s22 + $0x58] sm:$0xff]  ;;  %v7597_v15 = vld [vmem:[%s8530_s22 + $0x60] sm:$0xff]  ;;  %s8534_s24 = sld [smem:[#allocation8_spill]]  ;;  %s7401_s26 = smov 8   ;;  %vm4895_vm6 = vcmask 24576  }
  0x13   :  { %v7607_v16 = vld [vmem:[%s8530_s22 + $0x68] sm:$0xff]  ;;  %v7612_v17 = vld [vmem:[%s8530_s22 + $0x70] sm:$0xff]  ;;  %v7621_v18 = vld [vmem:[%s8530_s22 + $0x78] sm:$0xff]  ;;  %vm4914_vm7 = vcmask 57376  }
  0x14   :  { %v7627_v19 = vld [vmem:[%s8530_s22 + $0x80] sm:$0xff]  ;;  %v7637_v20 = vld [vmem:[%s8530_s22 + $0x88] sm:$0xff]  ;;  %v7642_v21 = vld [vmem:[%s8530_s22 + $0x90] sm:$0xff] }
  0x15   :  { %6859 = vmatpush3.bf16.msra.mxu0 %v7535_v6  ;;  %v7651_v22 = vld [vmem:[%s8530_s22 + $0x98] sm:$0xff]  ;;  %v7661_v27 = vld [vmem:[%s8530_s22 + $0x20] sm:$0xff]  ;;  %v7674_v29 = vld [vmem:[%s8530_s22 + $0x28] sm:$0xff] }
  0x16   :  { %6869 = vmatprep.subr.bf16.mxu0 %v6852_v3  ;;  %v176_v10 = vld [vmem:[%s8531_s28] sm:$0xff]  ;;  %v5769_v28 = vld [vmem:[%s8531_s28 + $0x8] sm:$0xff]  ;;  %v7679_v30 = vld [vmem:[%s8530_s22 + $0x30] sm:$0xff] }
  0x17   :  { %6322 = vmatprep.subr.mxu1 %v176_v10  ;;  %v7688_v31 = vld [vmem:[%s8530_s22 + $0x38] sm:$0xff]  ;;  %v5782_v32 = vld [vmem:[%s8531_s28 + $0x10] sm:$0xff]  ;;  %v5808_v50 = vld [vmem:[%s8531_s28 + $0x20] sm:$0xff]  ;;  %s7398_s22 = smov 4  }
  0x18   :  { %6317 = vmatmul.mubr.msk.f32.vlgmr.msra.gmra.mrb[0].mxu0 %vm78_vm0, %v7544_v7  ;;  %6323 = vmatpush3.msra.mxu1 %v176_v10  ;;  %v5795_v47 = vld [vmem:[%s8531_s28 + $0x18] sm:$0xff]  ;;  %v7720_v51 = vld [vmem:[%s8532_s0] sm:$0xff]  ;;  %v1110_v62 = vld [vmem:[%s8534_s24 + $0x8] sm:$0xff] }
  0x19   :  { %6319 = vmatprep.mubr.msk.f32.mxu0 %vm78_vm0, %v7549_v8  ;;  %6871 = vmatpush3.bf16.msra.mxu0 %v6852_v3  ;;  %v5760_v52 = vld [vmem:[%s8533_s5] ss:$0 sm:$0xff]  ;;  %v7740_v2 = vld [vmem:[%s8532_s0 + $0x8] sm:$0xff]  ;;  %v7755_v4 = vld [vmem:[%s8532_s0 + $0x18] sm:$0xff] }
  0x1a   :  { %6873 = vmatprep.subr.bf16.mxu0 %v7535_v6  ;;  %6861 = vmatprep.subr.bf16.mxu1 %v6852_v3  ;;  %v1109_v61 = vld [vmem:[%s8534_s24] sm:$0xff] }
  0x1b   :  { %v7735_v1 = vpack.c.bf16 %v1110_v62, %v1109_v61 }
  0x1c   :  { %6320 = vmatmul.mubr.msk.f32.gmra.mrb[2].mxu0 %vm78_vm0, %v7558_v9 }
  0x1d   :  { %6875 = vmatpush3.bf16.msra.mxu0 %v7535_v6  ;;  %6360 = vmatprep.mubr.msk.f32.mxu0 %vm78_vm0, %v7570_v11 }
  0x1e   :  { %6877 = vmatprep.subr.bf16.mxu0 %v6852_v3 }
  0x20   :  { %6361 = vmatmul.mubr.msk.f32.vlgmr.msra.gmra.mrb[4].mxu0 %vm78_vm0, %v7575_v12 }
  0x21   :  { %6879 = vmatpush3.bf16.msra.mxu0 %v6852_v3  ;;  %6363 = vmatprep.mubr.msk.f32.mxu0 %vm78_vm0, %v7580_v13 }
  0x22   :  { %6881 = vmatprep.subr.bf16.mxu0 %v7535_v6 }
  0x24   :  { %6364 = vmatmul.mubr.msk.f32.gmra.mrb[6].mxu0 %vm78_vm0, %v7591_v14 }
  0x25   :  { %6883 = vmatpush3.bf16.msra.mxu0 %v7535_v6  ;;  %6382 = vmatprep.mubr.msk.f32.mxu0 %vm78_vm0, %v7597_v15 }
  0x26   :  { %6885 = vmatprep.subr.bf16.mxu0 %v6852_v3 }
  0x28   :  { %6383 = vmatmul.mubr.msk.f32.vlgmr.msra.gmra.mrb[8].mxu0 %vm78_vm0, %v7607_v16 }
  0x29   :  { %6887 = vmatpush3.bf16.msra.mxu0 %v6852_v3  ;;  %6385 = vmatprep.mubr.msk.f32.mxu0 %vm78_vm0, %v7612_v17 }
  0x2a   :  { %6889 = vmatprep.subr.bf16.mxu0 %v7535_v6 }
  0x2c   :  { %6386 = vmatmul.mubr.msk.f32.gmra.mrb[10].mxu0 %vm78_vm0, %v7621_v18 }
  0x2d   :  { %6891 = vmatpush3.bf16.msra.mxu0 %v7535_v6  ;;  %6404 = vmatprep.mubr.msk.f32.mxu0 %vm78_vm0, %v7627_v19 }
  0x30   :  { %6405 = vmatmul.mubr.msk.f32.vlgmr.msra.gmra.mrb[12].mxu0 %vm78_vm0, %v7637_v20 }
  0x31   :  { %6407 = vmatprep.mubr.msk.f32.mxu0 %vm78_vm0, %v7642_v21 }
  0x34   :  { %6408 = vmatmul.mubr.msk.f32.gmra.mrb[14].mxu0 %vm78_vm0, %v7651_v22 }
  0x35   :  { %6426 = vmatprep.mubr.msk.f32.mxu0 %vm78_vm0, %v7720_v51 }
  0xeb   :  { %v6318_v23 = vpop.f32.mrb[0].mxu0 }
  0xec   :  { %v157_v24 = vpop.f32.mrb[1].mxu0 }
  0xed   :  { %6324 = vmatprep.mubr.msk.f32.mxu1 %vm177_vm1, %v157_v24 }
  0xee   :  { %6325 = vmatmul.mubr.msk.f32.vlgmr.msra.gmra.mrb[0].mxu1 %vm177_vm1, %v6318_v23 }
  0xef   :  { %v6321_v25 = vpop.f32.mrb[2].mxu0  ;;  %6863 = vmatpush3.bf16.msra.mxu1 %v6852_v3  ;;  %v7745_v3 = vld [vmem:[%s8532_s0 + $0x10] sm:$0xff] }
  0xf0   :  { %v167_v26 = vpop.f32.mrb[3].mxu0  ;;  %6865 = vmatprep.subr.bf16.mxu1 %v7535_v6 }
  0xf1   :  { %6327 = vmatprep.mubr.msk.f32.mxu1 %vm177_vm1, %v167_v26 }
  0xf2   :  { %6328 = vmatmul.mubr.msk.f32.gmra.mrb[2].mxu1 %vm177_vm1, %v6321_v25 }
  0xf3   :  { %6867 = vmatpush3.bf16.msra.mxu1 %v7535_v6  ;;  %6338 = vmatprep.mubr.msk.f32.mxu1 %vm78_vm0, %v7661_v27  ;;  %v6362_v33 = vpop.f32.mrb[4].mxu0 }
  0xf4   :  { %6344 = vmatprep.subr.mxu1 %v5769_v28  ;;  %v573_v34 = vpop.f32.mrb[5].mxu0 }
  0xf6   :  { %6339 = vmatmul.mubr.msk.f32.vlgmr.msra.gmra.mrb[4].mxu1 %vm78_vm0, %v7674_v29 }
  0xf7   :  { %6341 = vmatprep.mubr.msk.f32.mxu1 %vm78_vm0, %v7679_v30  ;;  %6345 = vmatpush3.msra.mxu1 %v5769_v28  ;;  %v6365_v35 = vpop.f32.mrb[6].mxu0 }
  0xf8   :  { %6366 = vmatprep.subr.mxu1 %v5782_v32  ;;  %v583_v36 = vpop.f32.mrb[7].mxu0 }
  0xfa   :  { %6342 = vmatmul.mubr.msk.f32.gmra.mrb[6].mxu1 %vm78_vm0, %v7688_v31 }
  0xfb   :  { %v6384_v37 = vpop.f32.mrb[8].mxu0 }
  0xfc   :  { %v778_v38 = vpop.f32.mrb[9].mxu0 }
  0xff   :  { %v6387_v39 = vpop.f32.mrb[10].mxu0 }
 0x100   :  { %v788_v40 = vpop.f32.mrb[11].mxu0 }
 0x103   :  { %v6406_v41 = vpop.f32.mrb[12].mxu0 }
 0x104   :  { %v983_v42 = vpop.f32.mrb[13].mxu0 }
 0x107   :  { %v6409_v43 = vpop.f32.mrb[14].mxu0 }
 0x108   :  { %v993_v44 = vpop.f32.mrb[15].mxu0 }
 0x1c9   :  { %v6340_v45 = vpop.f32.mrb[4].mxu1 }
 0x1ca   :  { %v368_v46 = vpop.f32.mrb[5].mxu1 }
 0x1cb   :  { %6346 = vmatprep.mubr.msk.f32.mxu1 %vm177_vm1, %v368_v46 }
 0x1cc   :  { %6347 = vmatmul.mubr.msk.f32.vlgmr.msra.gmra.mrb[0].mxu1 %vm177_vm1, %v6340_v45 }
 0x1cd   :  { %v6343_v48 = vpop.f32.mrb[6].mxu1  ;;  %6367 = vmatpush3.msra.mxu1 %v5782_v32 }
 0x1ce   :  { %v378_v49 = vpop.f32.mrb[7].mxu1  ;;  %6388 = vmatprep.subr.mxu1 %v5795_v47 }
 0x1cf   :  { %6349 = vmatprep.mubr.msk.f32.mxu1 %vm177_vm1, %v378_v49 }
 0x1d0   :  { %6350 = vmatmul.mubr.msk.f32.gmra.mrb[2].mxu1 %vm177_vm1, %v6343_v48  ;;  %v1617_v48 = vld [vmem:[%s8504_s8 + $0x8] sm:$0xff] }
 0x1d1   :  { %6368 = vmatprep.mubr.msk.f32.mxu1 %vm177_vm1, %v573_v34 }
 0x1d4   :  { %6369 = vmatmul.mubr.msk.f32.vlgmr.msra.gmra.mrb[0].mxu1 %vm177_vm1, %v6362_v33 }
 0x1d5   :  { %6389 = vmatpush3.msra.mxu1 %v5795_v47  ;;  %6371 = vmatprep.mubr.msk.f32.mxu1 %vm177_vm1, %v583_v36  ;;  %v1616_v47 = vld [vmem:[%s8504_s8] sm:$0xff] }
 0x1d6   :  { %6410 = vmatprep.subr.mxu1 %v5808_v50  ;;  %v6924_v49 = vpack.c.bf16 %v1617_v48, %v1616_v47  ;;  %v5855_v47 = vld [vmem:[%s8504_s8 + $0x28] sm:$0xff] }
 0x1d8   :  { %6372 = vmatmul.mubr.msk.f32.gmra.mrb[2].mxu1 %vm177_vm1, %v6365_v35 }
 0x1d9   :  { %6390 = vmatprep.mubr.msk.f32.mxu1 %vm177_vm1, %v778_v38 }
 0x1dc   :  { %6391 = vmatmul.mubr.msk.f32.vlgmr.msra.gmra.mrb[0].mxu1 %vm177_vm1, %v6384_v37 }
 0x1dd   :  { %6411 = vmatpush3.msra.mxu1 %v5808_v50  ;;  %6393 = vmatprep.mubr.msk.f32.mxu1 %vm177_vm1, %v788_v40 }
 0x1e0   :  { %6394 = vmatmul.mubr.msk.f32.gmra.mrb[2].mxu1 %vm177_vm1, %v6387_v39 }
 0x1e1   :  { %6412 = vmatprep.mubr.msk.f32.mxu1 %vm177_vm1, %v983_v42 }
 0x1e4   :  { %6413 = vmatmul.mubr.msk.f32.vlgmr.msra.gmra.mrb[0].mxu1 %vm177_vm1, %v6406_v41 }
 0x1e5   :  { %6415 = vmatprep.mubr.msk.f32.mxu1 %vm177_vm1, %v993_v44 }
 0x1e8   :  { %6416 = vmatmul.mubr.msk.f32.gmra.mrb[2].mxu1 %vm177_vm1, %v6409_v43 }
 0x1e9   :  { %6450 = vmatprep.mubr.msk.f32.mxu1 %vm78_vm0, %v7720_v51 }
 0x2b7   :  { %v6414_v53 = vpop.f32.mrb[0].mxu1 }
 0x2b8   :  { %v7104_v54 = vadd.f32 %v6414_v53, %v5760_v52  ;;  %v1082_v55 = vpop.f32.mrb[1].mxu1 }
 0x2b9   :  { %v7105_v56 = vadd.f32 %v5760_v52, %v1082_v55 }
 0x2bb   :  { %v6892_v57 = vpack.c.bf16 %v7104_v54, %v7105_v56  ;;  %v6417_v58 = vpop.f32.mrb[2].mxu1 }
 0x2bc   :  { %v7106_v59 = vadd.f32 %v6417_v58, %v5760_v52  ;;  %v1092_v60 = vpop.f32.mrb[3].mxu1 }
 0x2bd   :  { %v7107_v63 = vadd.f32 %v5760_v52, %v1092_v60  ;;  %6893 = vmatprep.subr.bf16.mxu0 %v6892_v57  ;;  %v5829_v60 = vld [vmem:[%s8502_s6] ss:$0 sm:$0xff] }
 0x2be   :  { %6895 = vmatpush3.bf16.msra.mxu0 %v6892_v57 }
 0x2bf   :  { %v6896_v0 = vpack.c.bf16 %v7106_v59, %v7107_v63 }
 0x2c1   :  { %6897 = vmatprep.subr.bf16.mxu0 %v6896_v0 }
 0x2c2   :  { %6899 = vmatpush3.bf16.msra.mxu0 %v6896_v0 }
 0x2c3   :  { %6901 = vmatprep.subr.bf16.mxu0 %v7735_v1 }
 0x2c5   :  { %6427 = vmatmul.mubr.msk.f32.vlgmr.msra.gmra.mrb[16].mxu0 %vm78_vm0, %v7740_v2 }
 0x2c6   :  { %6429 = vmatprep.mubr.msk.f32.mxu0 %vm78_vm0, %v7745_v3  ;;  %6903 = vmatpush3.bf16.msra.mxu0 %v7735_v1 }
 0x2c7   :  { %6913 = vmatprep.subr.bf16.mxu0 %v7735_v1 }
 0x2c9   :  { %6430 = vmatmul.mubr.msk.f32.gmra.mrb[18].mxu0 %vm78_vm0, %v7755_v4 }
 0x398   :  { %v6428_v6 = vpop.f32.mrb[16].mxu0 }
 0x399   :  { %v1189_v10 = vpop.f32.mrb[17].mxu0 }
 0x39a   :  { %6436 = vmatprep.mubr.msk.f32.mxu0 %vm1208_vm2, %v1189_v10 }
 0x39b   :  { %6437 = vmatmul.mubr.msk.f32.vlgmr.msra.gmra.mrb[20].mxu0 %vm1208_vm2, %v6428_v6 }
 0x39c   :  { %v6431_v23 = vpop.f32.mrb[18].mxu0  ;;  %6915 = vmatpush3.bf16.msra.mxu0 %v7735_v1 }
 0x39d   :  { %v1199_v24 = vpop.f32.mrb[19].mxu0  ;;  %6925 = vmatprep.subr.bf16.mxu0 %v6924_v49 }
 0x39e   :  { %6439 = vmatprep.mubr.msk.f32.mxu0 %vm1208_vm2, %v1199_v24 }
 0x39f   :  { %6440 = vmatmul.mubr.msk.f32.gmra.mrb[22].mxu0 %vm1208_vm2, %v6431_v23 }
 0x46e   :  { %v6438_v25 = vpop.f32.mrb[20].mxu0 }
 0x46f   :  { %v1307_v26 = vsub.f32 %v7104_v54, %v6438_v25  ;;  %v1287_v28 = vpop.f32.mrb[21].mxu0 }
 0x470   :  { %v1306_v32 = vsub.f32 %v7105_v56, %v1287_v28 }
 0x471   :  { %v1311_v33 = vmul.f32 %v1307_v26, %v1307_v26 }
 0x472   :  { %v1310_v34 = vmul.f32 %v1306_v32, %v1306_v32  ;;  %v6441_v35 = vpop.f32.mrb[22].mxu0 }
 0x473   :  { %v1309_v36 = vsub.f32 %v7106_v59, %v6441_v35  ;;  %v1297_v37 = vpop.f32.mrb[23].mxu0 }
 0x474   :  { %v1308_v38 = vsub.f32 %v7107_v63, %v1297_v37  ;;  %v6904_v39 = vpack.c.bf16 %v1311_v33, %v1310_v34  ;;  %v5830_v63 = vld [vmem:[%s8503_s7] ss:$0 sm:$0xff] }
 0x475   :  { %v1313_v40 = vmul.f32 %v1309_v36, %v1309_v36 }
 0x476   :  { %v1312_v41 = vmul.f32 %v1308_v38, %v1308_v38  ;;  %6905 = vmatprep.subr.bf16.mxu1 %v6904_v39 }
 0x477   :  { %6907 = vmatpush3.bf16.msra.mxu1 %v6904_v39 }
 0x478   :  { %v6908_v42 = vpack.c.bf16 %v1313_v40, %v1312_v41 }
 0x47a   :  { %6909 = vmatprep.subr.bf16.mxu1 %v6908_v42 }
 0x47b   :  { %6911 = vmatpush3.bf16.msra.mxu1 %v6908_v42 }
 0x47e   :  { %6451 = vmatmul.mubr.msk.f32.vlgmr.msra.gmra.mrb[8].mxu1 %vm78_vm0, %v7740_v2 }
 0x47f   :  { %6453 = vmatprep.mubr.msk.f32.mxu1 %vm78_vm0, %v7745_v3 }
 0x482   :  { %6454 = vmatmul.mubr.msk.f32.gmra.mrb[10].mxu1 %vm78_vm0, %v7755_v4 }
 0x483   :  { %6474 = vmatprep.mubr.msk.f32.mxu1 %vm78_vm0, %v7533_v5 }
 0x551   :  { %v6452_v43 = vpop.f32.mrb[8].mxu1 }
 0x552   :  { %v1380_v44 = vpop.f32.mrb[9].mxu1 }
 0x553   :  { %6460 = vmatprep.mubr.msk.f32.mxu0 %vm1208_vm2, %v1380_v44 }
 0x554   :  { %6461 = vmatmul.mubr.msk.f32.vlgmr.msra.gmra.mrb[24].mxu0 %vm1208_vm2, %v6452_v43 }
 0x555   :  { %v6455_v45 = vpop.f32.mrb[10].mxu1  ;;  %6927 = vmatpush3.bf16.msra.mxu0 %v6924_v49 }
 0x556   :  { %v1390_v46 = vpop.f32.mrb[11].mxu1 }
 0x557   :  { %6463 = vmatprep.mubr.msk.f32.mxu0 %vm1208_vm2, %v1390_v46  ;;  %v5854_v46 = vld [vmem:[%s8504_s8 + $0x20] sm:$0xff] }
 0x558   :  { %6464 = vmatmul.mubr.msk.f32.gmra.mrb[26].mxu0 %vm1208_vm2, %v6455_v45 }
 0x627   :  { %v6462_v50 = vpop.f32.mrb[24].mxu0 }
 0x628   :  { %v1483_v52 = vadd.f32 1e-05, %v6462_v50  ;;  %v1477_v53 = vpop.f32.mrb[25].mxu0  ;;  %v6948_v50 = vpack.c.bf16 %v5855_v47, %v5854_v46 }
 0x629   :  { %v1478_v54 = vadd.f32 1e-05, %v1477_v53 }
 0x62a   :  { %7248 = vrsqrt.f32 %v1483_v52 }
 0x62b   :  { %7250 = vrsqrt.f32 %v1478_v54  ;;  %v6465_v55 = vpop.f32.mrb[26].mxu0  ;;  %v5864_v54 = vld [vmem:[%s8504_s8 + $0x30] sm:$0xff] }
 0x62c   :  { %v1493_v56 = vadd.f32 1e-05, %v6465_v55  ;;  %v1487_v57 = vpop.f32.mrb[27].mxu0  ;;  %v5865_v55 = vld [vmem:[%s8504_s8 + $0x38] sm:$0xff] }
 0x62d   :  { %v1488_v58 = vadd.f32 1e-05, %v1487_v57 }
 0x62e   :  { %7252 = vrsqrt.f32 %v1493_v56 }
 0x62f   :  { %7254 = vrsqrt.f32 %v1488_v58  ;;  %v6960_v58 = vpack.c.bf16 %v5865_v55, %v5864_v54 }
 0x634   :  { %v7249_v59 = vpop.eup %7248 }
 0x635   :  { %v7251_v61 = vpop.eup %7250  ;;  %v1501_v62 = vmul.f32 %v7249_v59, %v1307_v26 }
 0x636   :  { %v1500_v0 = vmul.f32 %v7251_v61, %v1306_v32  ;;  %v5874_v61 = vld [vmem:[%s8504_s8 + $0x40] sm:$0xff] }
 0x637   :  { %v1512_v6 = vmul.f32 %v5829_v60, %v1501_v62  ;;  %v5875_v62 = vld [vmem:[%s8504_s8 + $0x48] sm:$0xff] }
 0x638   :  { %v7253_v10 = vpop.eup %7252  ;;  %v1511_v23 = vmul.f32 %v5829_v60, %v1500_v0 }
 0x639   :  { %v7255_v24 = vpop.eup %7254  ;;  %v1523_v25 = vadd.f32 %v5830_v63, %v1512_v6  ;;  %v1503_v28 = vmul.f32 %v7253_v10, %v1309_v36  ;;  %v5844_v36 = vld [vmem:[%s8504_s8 + $0x10] sm:$0xff]  ;;  %v6972_v6 = vpack.c.bf16 %v5875_v62, %v5874_v61 }
 0x63a   :  { %v1522_v33 = vadd.f32 %v5830_v63, %v1511_v23  ;;  %v1502_v34 = vmul.f32 %v7255_v24, %v1308_v38  ;;  %v5845_v38 = vld [vmem:[%s8504_s8 + $0x18] sm:$0xff] }
 0x63b   :  { %v1527_v35 = vmax.f32 %v1523_v25, 0.0  ;;  %v1514_v37 = vmul.f32 %v5829_v60, %v1503_v28  ;;  %v6936_v45 = vpack.c.bf16 %v5845_v38, %v5844_v36 }
 0x63c   :  { %v1526_v39 = vmax.f32 %v1522_v33, 0.0  ;;  %v1513_v40 = vmul.f32 %v5829_v60, %v1502_v34 }
 0x63d   :  { %v1525_v41 = vadd.f32 %v5830_v63, %v1514_v37  ;;  %6937 = vmatprep.subr.bf16.mxu0 %v6936_v45 }
 0x63e   :  { %v6916_v42 = vpack.c.bf16 %v1527_v35, %v1526_v39  ;;  %v1524_v26 = vadd.f32 %v5830_v63, %v1513_v40  ;;  %v5839_v40 = vld [vmem:[%s8505_s9] ss:$0 sm:$0xff] }
 0x63f   :  { %v1529_v43 = vmax.f32 %v1525_v41, 0.0 }
 0x640   :  { %v1528_v44 = vmax.f32 %v1524_v26, 0.0  ;;  %6917 = vmatprep.subr.bf16.mxu1 %v6916_v42 }
 0x641   :  { %6919 = vmatpush3.bf16.msra.mxu1 %v6916_v42 }
 0x642   :  { %v6920_v32 = vpack.c.bf16 %v1529_v43, %v1528_v44 }
 0x644   :  { %6921 = vmatprep.subr.bf16.mxu1 %v6920_v32 }
 0x645   :  { %6923 = vmatpush3.bf16.msra.mxu1 %v6920_v32 }
 0x646   :  { %6929 = vmatprep.subr.bf16.mxu1 %v6916_v42 }
 0x648   :  { %6475 = vmatmul.mubr.msk.f32.vlgmr.msra.gmra.mrb[12].mxu1 %vm78_vm0, %v7544_v7 }
 0x649   :  { %6931 = vmatpush3.bf16.msra.mxu1 %v6916_v42  ;;  %6477 = vmatprep.mubr.msk.f32.mxu1 %vm78_vm0, %v7549_v8 }
 0x64a   :  { %6933 = vmatprep.subr.bf16.mxu1 %v6920_v32 }
 0x64c   :  { %6478 = vmatmul.mubr.msk.f32.gmra.mrb[14].mxu1 %vm78_vm0, %v7558_v9 }
 0x64d   :  { %6935 = vmatpush3.bf16.msra.mxu1 %v6920_v32  ;;  %6498 = vmatprep.mubr.msk.f32.mxu1 %vm78_vm0, %v7661_v27 }
 0x64e   :  { %6941 = vmatprep.subr.bf16.mxu1 %v6916_v42 }
 0x650   :  { %6499 = vmatmul.mubr.msk.f32.vlgmr.msra.gmra.mrb[16].mxu1 %vm78_vm0, %v7674_v29 }
 0x651   :  { %6943 = vmatpush3.bf16.msra.mxu1 %v6916_v42  ;;  %6501 = vmatprep.mubr.msk.f32.mxu1 %vm78_vm0, %v7679_v30 }
 0x652   :  { %6945 = vmatprep.subr.bf16.mxu1 %v6920_v32 }
 0x654   :  { %6502 = vmatmul.mubr.msk.f32.gmra.mrb[18].mxu1 %vm78_vm0, %v7688_v31 }
 0x655   :  { %6947 = vmatpush3.bf16.msra.mxu1 %v6920_v32  ;;  %6522 = vmatprep.mubr.msk.f32.mxu1 %vm78_vm0, %v7570_v11 }
 0x656   :  { %6953 = vmatprep.subr.bf16.mxu1 %v6916_v42 }
 0x658   :  { %6523 = vmatmul.mubr.msk.f32.vlgmr.msra.gmra.mrb[20].mxu1 %vm78_vm0, %v7575_v12 }
 0x659   :  { %6955 = vmatpush3.bf16.msra.mxu1 %v6916_v42  ;;  %6525 = vmatprep.mubr.msk.f32.mxu1 %vm78_vm0, %v7580_v13 }
 0x65a   :  { %6957 = vmatprep.subr.bf16.mxu1 %v6920_v32 }
 0x65c   :  { %6526 = vmatmul.mubr.msk.f32.gmra.mrb[22].mxu1 %vm78_vm0, %v7591_v14 }
 0x65d   :  { %6959 = vmatpush3.bf16.msra.mxu1 %v6920_v32  ;;  %6546 = vmatprep.mubr.msk.f32.mxu1 %vm78_vm0, %v7597_v15 }
 0x65e   :  { %6965 = vmatprep.subr.bf16.mxu1 %v6916_v42 }
 0x660   :  { %6547 = vmatmul.mubr.msk.f32.vlgmr.msra.gmra.mrb[24].mxu1 %vm78_vm0, %v7607_v16 }
 0x661   :  { %6967 = vmatpush3.bf16.msra.mxu1 %v6916_v42  ;;  %6549 = vmatprep.mubr.msk.f32.mxu1 %vm78_vm0, %v7612_v17 }
 0x662   :  { %6969 = vmatprep.subr.bf16.mxu1 %v6920_v32 }
 0x664   :  { %6550 = vmatmul.mubr.msk.f32.gmra.mrb[26].mxu1 %vm78_vm0, %v7621_v18 }
 0x665   :  { %6971 = vmatpush3.bf16.msra.mxu1 %v6920_v32  ;;  %6570 = vmatprep.mubr.msk.f32.mxu1 %vm78_vm0, %v7627_v19 }
 0x668   :  { %6571 = vmatmul.mubr.msk.f32.vlgmr.msra.gmra.mrb[28].mxu1 %vm78_vm0, %v7637_v20 }
 0x669   :  { %6573 = vmatprep.mubr.msk.f32.mxu1 %vm78_vm0, %v7642_v21 }
 0x66c   :  { %6574 = vmatmul.mubr.msk.f32.gmra.mrb[30].mxu1 %vm78_vm0, %v7651_v22 }
 0x66d   :  { %6594 = vmatprep.mubr.msk.f32.mxu1 %vm78_vm0, %v7720_v51 }
 0x71b   :  { %v6476_v48 = vpop.f32.mrb[12].mxu1 }
 0x71c   :  { %v1597_v49 = vpop.f32.mrb[13].mxu1 }
 0x71d   :  { %6484 = vmatprep.mubr.msk.f32.mxu0 %vm1208_vm2, %v1597_v49 }
 0x71e   :  { %6485 = vmatmul.mubr.msk.f32.vlgmr.msra.gmra.mrb[28].mxu0 %vm1208_vm2, %v6476_v48 }
 0x71f   :  { %v6479_v52 = vpop.f32.mrb[14].mxu1  ;;  %6939 = vmatpush3.bf16.msra.mxu0 %v6936_v45 }
 0x720   :  { %v1607_v53 = vpop.f32.mrb[15].mxu1  ;;  %6949 = vmatprep.subr.bf16.mxu0 %v6948_v50 }
 0x721   :  { %6487 = vmatprep.mubr.msk.f32.mxu0 %vm1208_vm2, %v1607_v53 }
 0x722   :  { %6488 = vmatmul.mubr.msk.f32.gmra.mrb[30].mxu0 %vm1208_vm2, %v6479_v52 }
 0x723   :  { %v6500_v56 = vpop.f32.mrb[16].mxu1 }
 0x724   :  { %v1791_v57 = vpop.f32.mrb[17].mxu1 }
 0x725   :  { %6508 = vmatprep.mubr.msk.f32.mxu0 %vm1208_vm2, %v1791_v57 }
 0x726   :  { %6509 = vmatmul.mubr.msk.f32.vlgmr.msra.gmra.mrb[28].mxu0 %vm1208_vm2, %v6500_v56 }
 0x727   :  { %v6503_v59 = vpop.f32.mrb[18].mxu1  ;;  %6951 = vmatpush3.bf16.msra.mxu0 %v6948_v50 }
 0x728   :  { %v1801_v60 = vpop.f32.mrb[19].mxu1  ;;  %6961 = vmatprep.subr.bf16.mxu0 %v6960_v58 }
 0x729   :  { %6511 = vmatprep.mubr.msk.f32.mxu0 %vm1208_vm2, %v1801_v60 }
 0x72a   :  { %6512 = vmatmul.mubr.msk.f32.gmra.mrb[30].mxu0 %vm1208_vm2, %v6503_v59 }
 0x72b   :  { %v6524_v63 = vpop.f32.mrb[20].mxu1 }
 0x72c   :  { %v1980_v0 = vpop.f32.mrb[21].mxu1 }
 0x72d   :  { %6532 = vmatprep.mubr.msk.f32.mxu0 %vm1208_vm2, %v1980_v0 }
 0x72e   :  { %6533 = vmatmul.mubr.msk.f32.vlgmr.msra.gmra.mrb[28].mxu0 %vm1208_vm2, %v6524_v63 }
 0x72f   :  { %v6527_v10 = vpop.f32.mrb[22].mxu1  ;;  %6963 = vmatpush3.bf16.msra.mxu0 %v6960_v58 }
 0x730   :  { %v1990_v23 = vpop.f32.mrb[23].mxu1  ;;  %6973 = vmatprep.subr.bf16.mxu0 %v6972_v6 }
 0x731   :  { %6535 = vmatprep.mubr.msk.f32.mxu0 %vm1208_vm2, %v1990_v23 }
 0x732   :  { %6536 = vmatmul.mubr.msk.f32.gmra.mrb[30].mxu0 %vm1208_vm2, %v6527_v10 }
 0x733   :  { %v6548_v24 = vpop.f32.mrb[24].mxu1 }
 0x734   :  { %v2169_v25 = vpop.f32.mrb[25].mxu1 }
 0x735   :  { %6556 = vmatprep.mubr.msk.f32.mxu0 %vm1208_vm2, %v2169_v25 }
 0x736   :  { %6557 = vmatmul.mubr.msk.f32.vlgmr.msra.gmra.mrb[28].mxu0 %vm1208_vm2, %v6548_v24 }
 0x737   :  { %v6551_v28 = vpop.f32.mrb[26].mxu1  ;;  %6975 = vmatpush3.bf16.msra.mxu0 %v6972_v6 }
 0x738   :  { %v2179_v33 = vpop.f32.mrb[27].mxu1  ;;  %6985 = vmatprep.subr.bf16.mxu0 %v7735_v1 }
 0x739   :  { %6559 = vmatprep.mubr.msk.f32.mxu0 %vm1208_vm2, %v2179_v33 }
 0x73a   :  { %6560 = vmatmul.mubr.msk.f32.gmra.mrb[30].mxu0 %vm1208_vm2, %v6551_v28  ;;  %v2973_v28 = vld [vmem:[%s8508_s12] sm:$0xff] }
 0x73b   :  { %v6572_v34 = vpop.f32.mrb[28].mxu1 }
 0x73c   :  { %v2358_v35 = vpop.f32.mrb[29].mxu1 }
 0x73d   :  { %6580 = vmatprep.mubr.msk.f32.mxu0 %vm1208_vm2, %v2358_v35 }
 0x73e   :  { %6581 = vmatmul.mubr.msk.f32.vlgmr.msra.gmra.mrb[28].mxu0 %vm1208_vm2, %v6572_v34 }
 0x73f   :  { %v6575_v37 = vpop.f32.mrb[30].mxu1  ;;  %6987 = vmatpush3.bf16.msra.mxu0 %v7735_v1 }
 0x740   :  { %v2368_v39 = vpop.f32.mrb[31].mxu1  ;;  %6997 = vmatprep.subr.bf16.mxu0 %v7735_v1 }
 0x741   :  { %6583 = vmatprep.mubr.msk.f32.mxu0 %vm1208_vm2, %v2368_v39 }
 0x742   :  { %6584 = vmatmul.mubr.msk.f32.gmra.mrb[30].mxu0 %vm1208_vm2, %v6575_v37 }
 0x811   :  { %v6582_v41 = vpop.f32.mrb[28].mxu0 }
 0x812   :  { %v7108_v42 = vadd.f32 %v6582_v41, %v5839_v40  ;;  %v2458_v26 = vpop.f32.mrb[29].mxu0 }
 0x813   :  { %v7109_v43 = vadd.f32 %v5839_v40, %v2458_v26 }
 0x815   :  { %v6976_v44 = vpack.c.bf16 %v7108_v42, %v7109_v43  ;;  %v6585_v32 = vpop.f32.mrb[30].mxu0 }
 0x816   :  { %v7110_v36 = vadd.f32 %v6585_v32, %v5839_v40  ;;  %v2468_v38 = vpop.f32.mrb[31].mxu0 }
 0x817   :  { %v7111_v45 = vadd.f32 %v5839_v40, %v2468_v38  ;;  %6977 = vmatprep.subr.bf16.mxu1 %v6976_v44  ;;  %v5897_v38 = vld [vmem:[%s8507_s11] ss:$0 sm:$0xff] }
 0x818   :  { %6979 = vmatpush3.bf16.msra.mxu1 %v6976_v44  ;;  %v5896_v44 = vld [vmem:[%s8506_s10] ss:$0 sm:$0xff] }
 0x819   :  { %v6980_v46 = vpack.c.bf16 %v7110_v36, %v7111_v45 }
 0x81b   :  { %6981 = vmatprep.subr.bf16.mxu1 %v6980_v46 }
 0x81c   :  { %6983 = vmatpush3.bf16.msra.mxu1 %v6980_v46 }
 0x81f   :  { %6595 = vmatmul.mubr.msk.f32.vlgmr.msra.gmra.mrb[32].mxu1 %vm78_vm0, %v7740_v2 }
 0x820   :  { %6597 = vmatprep.mubr.msk.f32.mxu1 %vm78_vm0, %v7745_v3 }
 0x823   :  { %6598 = vmatmul.mubr.msk.f32.gmra.mrb[34].mxu1 %vm78_vm0, %v7755_v4 }
 0x824   :  { %6618 = vmatprep.mubr.msk.f32.mxu1 %vm78_vm0, %v7720_v51 }
 0x8f2   :  { %v6596_v47 = vpop.f32.mrb[32].mxu1 }
 0x8f3   :  { %v2547_v48 = vpop.f32.mrb[33].mxu1 }
 0x8f4   :  { %6604 = vmatprep.mubr.msk.f32.mxu0 %vm1208_vm2, %v2547_v48 }
 0x8f5   :  { %6605 = vmatmul.mubr.msk.f32.vlgmr.msra.gmra.mrb[32].mxu0 %vm1208_vm2, %v6596_v47 }
 0x8f6   :  { %v6599_v49 = vpop.f32.mrb[34].mxu1  ;;  %6999 = vmatpush3.bf16.msra.mxu0 %v7735_v1 }
 0x8f7   :  { %v2557_v50 = vpop.f32.mrb[35].mxu1 }
 0x8f8   :  { %6607 = vmatprep.mubr.msk.f32.mxu0 %vm1208_vm2, %v2557_v50 }
 0x8f9   :  { %6608 = vmatmul.mubr.msk.f32.gmra.mrb[34].mxu0 %vm1208_vm2, %v6599_v49 }
 0x9c8   :  { %v6606_v52 = vpop.f32.mrb[32].mxu0 }
 0x9c9   :  { %v2664_v53 = vsub.f32 %v7108_v42, %v6606_v52  ;;  %v2644_v54 = vpop.f32.mrb[33].mxu0 }
 0x9ca   :  { %v2663_v55 = vsub.f32 %v7109_v43, %v2644_v54 }
 0x9cb   :  { %v2668_v56 = vmul.f32 %v2664_v53, %v2664_v53 }
 0x9cc   :  { %v2667_v57 = vmul.f32 %v2663_v55, %v2663_v55  ;;  %v6609_v58 = vpop.f32.mrb[34].mxu0 }
 0x9cd   :  { %v2666_v59 = vsub.f32 %v7110_v36, %v6609_v58  ;;  %v2654_v60 = vpop.f32.mrb[35].mxu0 }
 0x9ce   :  { %v2665_v61 = vsub.f32 %v7111_v45, %v2654_v60  ;;  %v6988_v62 = vpack.c.bf16 %v2668_v56, %v2667_v57 }
 0x9cf   :  { %v2670_v63 = vmul.f32 %v2666_v59, %v2666_v59 }
 0x9d0   :  { %v2669_v0 = vmul.f32 %v2665_v61, %v2665_v61  ;;  %6989 = vmatprep.subr.bf16.mxu1 %v6988_v62 }
 0x9d1   :  { %6991 = vmatpush3.bf16.msra.mxu1 %v6988_v62 }
 0x9d2   :  { %v6992_v6 = vpack.c.bf16 %v2670_v63, %v2669_v0 }
 0x9d4   :  { %6993 = vmatprep.subr.bf16.mxu1 %v6992_v6 }
 0x9d5   :  { %6995 = vmatpush3.bf16.msra.mxu1 %v6992_v6 }
 0x9d8   :  { %6619 = vmatmul.mubr.msk.f32.vlgmr.msra.gmra.mrb[36].mxu1 %vm78_vm0, %v7740_v2 }
 0x9d9   :  { %6621 = vmatprep.mubr.msk.f32.mxu1 %vm78_vm0, %v7745_v3 }
 0x9dc   :  { %6622 = vmatmul.mubr.msk.f32.gmra.mrb[38].mxu1 %vm78_vm0, %v7755_v4 }
 0x9dd   :  { %6642 = vmatprep.mubr.msk.f32.mxu1 %vm78_vm0, %v7533_v5  ;;  %v2974_v5 = vld [vmem:[%s8508_s12 + $0x8] sm:$0xff] }
 0x9de   :  { %v7008_v33 = vpack.c.bf16 %v2974_v5, %v2973_v28 }
 0x9e0   :  { %7009 = vmatprep.subr.bf16.mxu0 %v7008_v33 }
 0xaab   :  { %v6620_v10 = vpop.f32.mrb[36].mxu1 }
 0xaac   :  { %v2737_v23 = vpop.f32.mrb[37].mxu1 }
 0xaad   :  { %6628 = vmatprep.mubr.msk.f32.mxu0 %vm1208_vm2, %v2737_v23 }
 0xaae   :  { %6629 = vmatmul.mubr.msk.f32.vlgmr.msra.gmra.mrb[36].mxu0 %vm1208_vm2, %v6620_v10 }
 0xaaf   :  { %v6623_v24 = vpop.f32.mrb[38].mxu1  ;;  %7011 = vmatpush3.bf16.msra.mxu0 %v7008_v33 }
 0xab0   :  { %v2747_v25 = vpop.f32.mrb[39].mxu1 }
 0xab1   :  { %6631 = vmatprep.mubr.msk.f32.mxu0 %vm1208_vm2, %v2747_v25 }
 0xab2   :  { %6632 = vmatmul.mubr.msk.f32.gmra.mrb[38].mxu0 %vm1208_vm2, %v6623_v24 }
 0xb81   :  { %v6630_v34 = vpop.f32.mrb[36].mxu0 }
 0xb82   :  { %v2840_v35 = vadd.f32 1e-05, %v6630_v34  ;;  %v2834_v37 = vpop.f32.mrb[37].mxu0 }
 0xb83   :  { %v2835_v39 = vadd.f32 1e-05, %v2834_v37 }
 0xb84   :  { %7256 = vrsqrt.f32 %v2840_v35 }
 0xb85   :  { %7258 = vrsqrt.f32 %v2835_v39  ;;  %v6633_v40 = vpop.f32.mrb[38].mxu0 }
 0xb86   :  { %v2850_v41 = vadd.f32 1e-05, %v6633_v40  ;;  %v2844_v42 = vpop.f32.mrb[39].mxu0 }
 0xb87   :  { %v2845_v26 = vadd.f32 1e-05, %v2844_v42 }
 0xb88   :  { %7260 = vrsqrt.f32 %v2850_v41  ;;  %v5906_v41 = vld [vmem:[%s8509_s13] ss:$0 sm:$0xff]  ;;  %s7397_s13 = smov 120  }
 0xb89   :  { %7262 = vrsqrt.f32 %v2845_v26 }
 0xb8e   :  { %v7257_v43 = vpop.eup %7256 }
 0xb8f   :  { %v7259_v32 = vpop.eup %7258  ;;  %v2858_v36 = vmul.f32 %v7257_v43, %v2664_v53 }
 0xb90   :  { %v2857_v45 = vmul.f32 %v7259_v32, %v2663_v55 }
 0xb91   :  { %v2869_v46 = vmul.f32 %v5896_v44, %v2858_v36 }
 0xb92   :  { %v7261_v47 = vpop.eup %7260  ;;  %v2868_v48 = vmul.f32 %v5896_v44, %v2857_v45 }
 0xb93   :  { %v7263_v49 = vpop.eup %7262  ;;  %v2880_v50 = vadd.f32 %v5897_v38, %v2869_v46  ;;  %v2860_v52 = vmul.f32 %v7261_v47, %v2666_v59 }
 0xb94   :  { %v2879_v54 = vadd.f32 %v5897_v38, %v2868_v48  ;;  %v2859_v56 = vmul.f32 %v7263_v49, %v2665_v61 }
 0xb95   :  { %v2884_v57 = vmax.f32 %v2880_v50, 0.0  ;;  %v2871_v58 = vmul.f32 %v5896_v44, %v2860_v52 }
 0xb96   :  { %v2883_v60 = vmax.f32 %v2879_v54, 0.0  ;;  %v2870_v62 = vmul.f32 %v5896_v44, %v2859_v56 }
 0xb97   :  { %v2882_v63 = vadd.f32 %v5897_v38, %v2871_v58 }
 0xb98   :  { %v7000_v0 = vpack.c.bf16 %v2884_v57, %v2883_v60  ;;  %v2881_v53 = vadd.f32 %v5897_v38, %v2870_v62 }
 0xb99   :  { %v2886_v6 = vmax.f32 %v2882_v63, 0.0 }
 0xb9a   :  { %v2885_v10 = vmax.f32 %v2881_v53, 0.0  ;;  %7001 = vmatprep.subr.bf16.mxu1 %v7000_v0 }
 0xb9b   :  { %7003 = vmatpush3.bf16.msra.mxu1 %v7000_v0 }
 0xb9c   :  { %v7004_v55 = vpack.c.bf16 %v2886_v6, %v2885_v10 }
 0xb9e   :  { %7005 = vmatprep.subr.bf16.mxu1 %v7004_v55 }
 0xb9f   :  { %7007 = vmatpush3.bf16.msra.mxu1 %v7004_v55 }
 0xba0   :  { %7013 = vmatprep.subr.bf16.mxu1 %v7000_v0 }
 0xba2   :  { %6643 = vmatmul.mubr.msk.f32.vlgmr.msra.gmra.mrb[40].mxu1 %vm78_vm0, %v7544_v7  ;;  %v5911_v7 = vld [vmem:[%s8508_s12 + $0x10] sm:$0xff] }
 0xba3   :  { %7015 = vmatpush3.bf16.msra.mxu1 %v7000_v0  ;;  %6645 = vmatprep.mubr.msk.f32.mxu1 %vm78_vm0, %v7549_v8  ;;  %v5912_v8 = vld [vmem:[%s8508_s12 + $0x18] sm:$0xff] }
 0xba4   :  { %7017 = vmatprep.subr.bf16.mxu1 %v7004_v55 }
 0xba6   :  { %6646 = vmatmul.mubr.msk.f32.gmra.mrb[42].mxu1 %vm78_vm0, %v7558_v9  ;;  %v7020_v9 = vpack.c.bf16 %v5912_v8, %v5911_v7 }
 0xba7   :  { %7019 = vmatpush3.bf16.msra.mxu1 %v7004_v55  ;;  %6666 = vmatprep.mubr.msk.f32.mxu1 %vm78_vm0, %v7661_v27 }
 0xba8   :  { %7025 = vmatprep.subr.bf16.mxu1 %v7000_v0  ;;  %7021 = vmatprep.subr.bf16.mxu0 %v7020_v9 }
 0xbaa   :  { %6667 = vmatmul.mubr.msk.f32.vlgmr.msra.gmra.mrb[44].mxu1 %vm78_vm0, %v7674_v29 }
 0xbab   :  { %7027 = vmatpush3.bf16.msra.mxu1 %v7000_v0  ;;  %6669 = vmatprep.mubr.msk.f32.mxu1 %vm78_vm0, %v7679_v30  ;;  %v5941_v30 = vld [vmem:[%s8508_s12 + $0x40] sm:$0xff] }
 0xbac   :  { %7029 = vmatprep.subr.bf16.mxu1 %v7004_v55 }
 0xbae   :  { %6670 = vmatmul.mubr.msk.f32.gmra.mrb[46].mxu1 %vm78_vm0, %v7688_v31  ;;  %v5942_v31 = vld [vmem:[%s8508_s12 + $0x48] sm:$0xff] }
 0xbaf   :  { %7031 = vmatpush3.bf16.msra.mxu1 %v7004_v55  ;;  %6690 = vmatprep.mubr.msk.f32.mxu1 %vm78_vm0, %v7570_v11  ;;  %v5921_v11 = vld [vmem:[%s8508_s12 + $0x20] sm:$0xff]  ;;  %v7056_v23 = vpack.c.bf16 %v5942_v31, %v5941_v30 }
 0xbb0   :  { %7037 = vmatprep.subr.bf16.mxu1 %v7000_v0  ;;  %v5964_v30 = vld [vmem:[%s8511_s15] ss:$0 sm:$0xff] }
 0xbb2   :  { %6691 = vmatmul.mubr.msk.f32.vlgmr.msra.gmra.mrb[48].mxu1 %vm78_vm0, %v7575_v12  ;;  %v5922_v12 = vld [vmem:[%s8508_s12 + $0x28] sm:$0xff] }
 0xbb3   :  { %7039 = vmatpush3.bf16.msra.mxu1 %v7000_v0  ;;  %6693 = vmatprep.mubr.msk.f32.mxu1 %vm78_vm0, %v7580_v13 }
 0xbb4   :  { %7041 = vmatprep.subr.bf16.mxu1 %v7004_v55 }
 0xbb6   :  { %6694 = vmatmul.mubr.msk.f32.gmra.mrb[50].mxu1 %vm78_vm0, %v7591_v14 }
 0xbb7   :  { %7043 = vmatpush3.bf16.msra.mxu1 %v7004_v55  ;;  %6714 = vmatprep.mubr.msk.f32.mxu1 %vm78_vm0, %v7597_v15  ;;  %v7032_v15 = vpack.c.bf16 %v5922_v12, %v5921_v11 }
 0xbb8   :  { %7049 = vmatprep.subr.bf16.mxu1 %v7000_v0 }
 0xbba   :  { %6715 = vmatmul.mubr.msk.f32.vlgmr.msra.gmra.mrb[52].mxu1 %vm78_vm0, %v7607_v16 }
 0xbbb   :  { %7051 = vmatpush3.bf16.msra.mxu1 %v7000_v0  ;;  %6717 = vmatprep.mubr.msk.f32.mxu1 %vm78_vm0, %v7612_v17 }
 0xbbc   :  { %7053 = vmatprep.subr.bf16.mxu1 %v7004_v55 }
 0xbbe   :  { %6718 = vmatmul.mubr.msk.f32.gmra.mrb[54].mxu1 %vm78_vm0, %v7621_v18  ;;  %v5931_v18 = vld [vmem:[%s8508_s12 + $0x30] sm:$0xff] }
 0xbbf   :  { %7055 = vmatpush3.bf16.msra.mxu1 %v7004_v55  ;;  %6738 = vmatprep.mubr.msk.f32.mxu1 %vm78_vm0, %v7627_v19  ;;  %v5932_v19 = vld [vmem:[%s8508_s12 + $0x38] sm:$0xff] }
 0xbc2   :  { %6739 = vmatmul.mubr.msk.f32.vlgmr.msra.gmra.mrb[56].mxu1 %vm78_vm0, %v7637_v20 }
 0xbc3   :  { %6741 = vmatprep.mubr.msk.f32.mxu1 %vm78_vm0, %v7642_v21 }
 0xbc6   :  { %6742 = vmatmul.mubr.msk.f32.gmra.mrb[58].mxu1 %vm78_vm0, %v7651_v22  ;;  %v7044_v22 = vpack.c.bf16 %v5932_v19, %v5931_v18 }
 0xbc7   :  { %6762 = vmatprep.mubr.msk.f32.mxu1 %vm78_vm0, %v7720_v51 }
 0xc75   :  { %v6644_v13 = vpop.f32.mrb[40].mxu1 }
 0xc76   :  { %v2954_v14 = vpop.f32.mrb[41].mxu1 }
 0xc77   :  { %6652 = vmatprep.mubr.msk.f32.mxu0 %vm1208_vm2, %v2954_v14 }
 0xc78   :  { %6653 = vmatmul.mubr.msk.f32.vlgmr.msra.gmra.mrb[40].mxu0 %vm1208_vm2, %v6644_v13 }
 0xc79   :  { %v6647_v16 = vpop.f32.mrb[42].mxu1  ;;  %7023 = vmatpush3.bf16.msra.mxu0 %v7020_v9 }
 0xc7a   :  { %v2964_v17 = vpop.f32.mrb[43].mxu1  ;;  %7033 = vmatprep.subr.bf16.mxu0 %v7032_v15 }
 0xc7b   :  { %6655 = vmatprep.mubr.msk.f32.mxu0 %vm1208_vm2, %v2964_v17 }
 0xc7c   :  { %6656 = vmatmul.mubr.msk.f32.gmra.mrb[42].mxu0 %vm1208_vm2, %v6647_v16 }
 0xc7d   :  { %v6668_v20 = vpop.f32.mrb[44].mxu1 }
 0xc7e   :  { %v3148_v21 = vpop.f32.mrb[45].mxu1 }
 0xc7f   :  { %6676 = vmatprep.mubr.msk.f32.mxu0 %vm1208_vm2, %v3148_v21  ;;  %v5963_v21 = vld [vmem:[%s8510_s14] ss:$0 sm:$0xff] }
 0xc80   :  { %6677 = vmatmul.mubr.msk.f32.vlgmr.msra.gmra.mrb[40].mxu0 %vm1208_vm2, %v6668_v20 }
 0xc81   :  { %v6671_v27 = vpop.f32.mrb[46].mxu1  ;;  %7035 = vmatpush3.bf16.msra.mxu0 %v7032_v15 }
 0xc82   :  { %v3158_v29 = vpop.f32.mrb[47].mxu1  ;;  %7045 = vmatprep.subr.bf16.mxu0 %v7044_v22 }
 0xc83   :  { %6679 = vmatprep.mubr.msk.f32.mxu0 %vm1208_vm2, %v3158_v29 }
 0xc84   :  { %6680 = vmatmul.mubr.msk.f32.gmra.mrb[42].mxu0 %vm1208_vm2, %v6671_v27 }
 0xc85   :  { %v6692_v59 = vpop.f32.mrb[48].mxu1 }
 0xc86   :  { %v3337_v61 = vpop.f32.mrb[49].mxu1 }
 0xc87   :  { %6700 = vmatprep.mubr.msk.f32.mxu0 %vm1208_vm2, %v3337_v61 }
 0xc88   :  { %6701 = vmatmul.mubr.msk.f32.vlgmr.msra.gmra.mrb[40].mxu0 %vm1208_vm2, %v6692_v59 }
 0xc89   :  { %v6695_v24 = vpop.f32.mrb[50].mxu1  ;;  %7047 = vmatpush3.bf16.msra.mxu0 %v7044_v22 }
 0xc8a   :  { %v3347_v25 = vpop.f32.mrb[51].mxu1  ;;  %7057 = vmatprep.subr.bf16.mxu0 %v7056_v23 }
 0xc8b   :  { %6703 = vmatprep.mubr.msk.f32.mxu0 %vm1208_vm2, %v3347_v25 }
 0xc8c   :  { %6704 = vmatmul.mubr.msk.f32.gmra.mrb[42].mxu0 %vm1208_vm2, %v6695_v24 }
 0xc8d   :  { %v6716_v28 = vpop.f32.mrb[52].mxu1 }
 0xc8e   :  { %v3526_v5 = vpop.f32.mrb[53].mxu1 }
 0xc8f   :  { %6724 = vmatprep.mubr.msk.f32.mxu0 %vm1208_vm2, %v3526_v5 }
 0xc90   :  { %6725 = vmatmul.mubr.msk.f32.vlgmr.msra.gmra.mrb[40].mxu0 %vm1208_vm2, %v6716_v28 }
 0xc91   :  { %v6719_v33 = vpop.f32.mrb[54].mxu1  ;;  %7059 = vmatpush3.bf16.msra.mxu0 %v7056_v23 }
 0xc92   :  { %v3536_v34 = vpop.f32.mrb[55].mxu1  ;;  %7069 = vmatprep.subr.bf16.mxu0 %v7735_v1 }
 0xc93   :  { %6727 = vmatprep.mubr.msk.f32.mxu0 %vm1208_vm2, %v3536_v34 }
 0xc94   :  { %6728 = vmatmul.mubr.msk.f32.gmra.mrb[42].mxu0 %vm1208_vm2, %v6719_v33 }
 0xc95   :  { %v6740_v35 = vpop.f32.mrb[56].mxu1 }
 0xc96   :  { %v3715_v37 = vpop.f32.mrb[57].mxu1 }
 0xc97   :  { %6748 = vmatprep.mubr.msk.f32.mxu0 %vm1208_vm2, %v3715_v37 }
 0xc98   :  { %6749 = vmatmul.mubr.msk.f32.vlgmr.msra.gmra.mrb[40].mxu0 %vm1208_vm2, %v6740_v35 }
 0xc99   :  { %v6743_v39 = vpop.f32.mrb[58].mxu1  ;;  %7071 = vmatpush3.bf16.msra.mxu0 %v7735_v1 }
 0xc9a   :  { %v3725_v40 = vpop.f32.mrb[59].mxu1  ;;  %7081 = vmatprep.subr.bf16.mxu0 %v7735_v1 }
 0xc9b   :  { %6751 = vmatprep.mubr.msk.f32.mxu0 %vm1208_vm2, %v3725_v40 }
 0xc9c   :  { %6752 = vmatmul.mubr.msk.f32.gmra.mrb[42].mxu0 %vm1208_vm2, %v6743_v39 }
 0xd6b   :  { %v6750_v42 = vpop.f32.mrb[40].mxu0 }
 0xd6c   :  { %v7112_v26 = vadd.f32 %v6750_v42, %v5906_v41  ;;  %v3815_v43 = vpop.f32.mrb[41].mxu0 }
 0xd6d   :  { %v7113_v44 = vadd.f32 %v5906_v41, %v3815_v43 }
 0xd6f   :  { %v7060_v32 = vpack.c.bf16 %v7112_v26, %v7113_v44  ;;  %v6753_v36 = vpop.f32.mrb[42].mxu0 }
 0xd70   :  { %v7114_v38 = vadd.f32 %v6753_v36, %v5906_v41  ;;  %v3825_v45 = vpop.f32.mrb[43].mxu0 }
 0xd71   :  { %v7115_v46 = vadd.f32 %v5906_v41, %v3825_v45  ;;  %7061 = vmatprep.subr.bf16.mxu1 %v7060_v32  ;;  %v4350_v45 = vld [vmem:[%s8514_s18] sm:$0xff] }
 0xd72   :  { %7063 = vmatpush3.bf16.msra.mxu1 %v7060_v32 }
 0xd73   :  { %v7064_v47 = vpack.c.bf16 %v7114_v38, %v7115_v46 }
 0xd75   :  { %7065 = vmatprep.subr.bf16.mxu1 %v7064_v47 }
 0xd76   :  { %7067 = vmatpush3.bf16.msra.mxu1 %v7064_v47 }
 0xd79   :  { %6763 = vmatmul.mubr.msk.f32.vlgmr.msra.gmra.mrb[60].mxu1 %vm78_vm0, %v7740_v2 }
 0xd7a   :  { %6765 = vmatprep.mubr.msk.f32.mxu1 %vm78_vm0, %v7745_v3 }
 0xd7d   :  { %6766 = vmatmul.mubr.msk.f32.gmra.mrb[62].mxu1 %vm78_vm0, %v7755_v4 }
 0xd7e   :  { %6786 = vmatprep.mubr.msk.f32.mxu1 %vm78_vm0, %v7720_v51 }
 0xe4c   :  { %v6764_v48 = vpop.f32.mrb[60].mxu1 }
 0xe4d   :  { %v3904_v49 = vpop.f32.mrb[61].mxu1 }
 0xe4e   :  { %6772 = vmatprep.mubr.msk.f32.mxu0 %vm1208_vm2, %v3904_v49 }
 0xe4f   :  { %6773 = vmatmul.mubr.msk.f32.vlgmr.msra.gmra.mrb[44].mxu0 %vm1208_vm2, %v6764_v48 }
 0xe50   :  { %v6767_v50 = vpop.f32.mrb[62].mxu1  ;;  %7083 = vmatpush3.bf16.msra.mxu0 %v7735_v1 }
 0xe51   :  { %v3914_v52 = vpop.f32.mrb[63].mxu1 }
 0xe52   :  { %6775 = vmatprep.mubr.msk.f32.mxu0 %vm1208_vm2, %v3914_v52 }
 0xe53   :  { %6776 = vmatmul.mubr.msk.f32.gmra.mrb[46].mxu0 %vm1208_vm2, %v6767_v50 }
 0xf22   :  { %v6774_v54 = vpop.f32.mrb[44].mxu0 }
 0xf23   :  { %v4021_v56 = vsub.f32 %v7112_v26, %v6774_v54  ;;  %v4001_v57 = vpop.f32.mrb[45].mxu0  ;;  %v5965_v26 = vld [vmem:[%s8513_s17] ss:$0 sm:$0xff]  ;;  %s7396_s17 = smov 112  }
 0xf24   :  { %v4020_v58 = vsub.f32 %v7113_v44, %v4001_v57  ;;  %v4351_v57 = vld [vmem:[%s8514_s18 + $0x8] sm:$0xff] }
 0xf25   :  { %v4025_v60 = vmul.f32 %v4021_v56, %v4021_v56 }
 0xf26   :  { %v4024_v51 = vmul.f32 %v4020_v58, %v4020_v58  ;;  %v6777_v62 = vpop.f32.mrb[46].mxu0 }
 0xf27   :  { %v4023_v63 = vsub.f32 %v7114_v38, %v6777_v62  ;;  %v4011_v0 = vpop.f32.mrb[47].mxu0  ;;  %v4358_v38 = vld [vmem:[%s8515_s19] sm:$0xff] }
 0xf28   :  { %v4022_v53 = vsub.f32 %v7115_v46, %v4011_v0  ;;  %v7072_v6 = vpack.c.bf16 %v4025_v60, %v4024_v51 }
 0xf29   :  { %v4027_v10 = vmul.f32 %v4023_v63, %v4023_v63 }
 0xf2a   :  { %v4026_v55 = vmul.f32 %v4022_v53, %v4022_v53  ;;  %7073 = vmatprep.subr.bf16.mxu1 %v7072_v6 }
 0xf2b   :  { %7075 = vmatpush3.bf16.msra.mxu1 %v7072_v6 }
 0xf2c   :  { %v7076_v1 = vpack.c.bf16 %v4027_v10, %v4026_v55  ;;  %v4359_v10 = vld [vmem:[%s8515_s19 + $0x8] sm:$0xff] }
 0xf2e   :  { %7077 = vmatprep.subr.bf16.mxu1 %v7076_v1 }
 0xf2f   :  { %7079 = vmatpush3.bf16.msra.mxu1 %v7076_v1 }
 0xf32   :  { %6787 = vmatmul.mubr.msk.f32.vlgmr.msra.gmra.mrb[64].mxu1 %vm78_vm0, %v7740_v2  ;;  %v4244_v2 = vld [vmem:[%s8512_s16] sm:$0xff] }
 0xf33   :  { %6789 = vmatprep.mubr.msk.f32.mxu1 %vm78_vm0, %v7745_v3  ;;  %v4245_v3 = vld [vmem:[%s8512_s16 + $0x8] sm:$0xff] }
 0xf36   :  { %6790 = vmatmul.mubr.msk.f32.gmra.mrb[66].mxu1 %vm78_vm0, %v7755_v4  ;;  %v7084_v4 = vpack.c.bf16 %v4245_v3, %v4244_v2 }
 0xf38   :  { %7085 = vmatprep.subr.bf16.mxu1 %v7084_v4 }
 0xf39   :  { %7087 = vmatpush3.bf16.msra.mxu1 %v7084_v4 }
0x1005   :  { %v6788_v7 = vpop.f32.mrb[64].mxu1 }
0x1006   :  { %v4094_v8 = vpop.f32.mrb[65].mxu1 }
0x1007   :  { %6796 = vmatprep.mubr.msk.f32.mxu0 %vm1208_vm2, %v4094_v8  ;;  %v8073_v8 = vld [vmem:[%s8516_s20 + $0x4] sm:$0xf] }
0x1008   :  { %6797 = vmatmul.mubr.msk.f32.vlgmr.msra.gmra.mrb[48].mxu0 %vm1208_vm2, %v6788_v7  ;;  %v8068_v7 = vld [vmem:[%s8516_s20] sm:$0xf]  ;;  %v4653_v3 = vmul.f32 0.0, %v8073_v8 }
0x1009   :  { %v6791_v9 = vpop.f32.mrb[66].mxu1  ;;  %v4652_v2 = vmul.f32 0.0, %v8068_v7 }
0x100a   :  { %v4104_v11 = vpop.f32.mrb[67].mxu1 }
0x100b   :  { %6799 = vmatprep.mubr.msk.f32.mxu0 %vm1208_vm2, %v4104_v11  ;;  %v8083_v11 = vld [vmem:[%s8516_s20 + $0xc] sm:$0xf] }
0x100c   :  { %6800 = vmatmul.mubr.msk.f32.gmra.mrb[50].mxu0 %vm1208_vm2, %v6791_v9  ;;  %v8078_v9 = vld [vmem:[%s8516_s20 + $0x8] sm:$0xf] }
0x100d   :  { %6840 = vmatprep.mubr.msk.f32.mxu0 %vm78_vm0, %v4350_v45  ;;  %v4654_v4 = vmul.f32 0.0, %v8078_v9 }
0x10db   :  { %v6798_v12 = vpop.f32.mrb[48].mxu0 }
0x10dc   :  { %v4197_v13 = vadd.f32 1e-05, %v6798_v12  ;;  %v4191_v14 = vpop.f32.mrb[49].mxu0  ;;  %v4655_v12 = vmul.f32 0.0, %v8083_v11 }
0x10dd   :  { %v4192_v15 = vadd.f32 1e-05, %v4191_v14 }
0x10de   :  { %7264 = vrsqrt.f32 %v4197_v13  ;;  %v4656_v13 = vadd.f32 %v4653_v3, %v4652_v2  ;;  %v4657_v14 = vadd.f32 %v4655_v12, %v4654_v4  ;;  %v8120_v3 = vrot.slane %v8073_v8, 4 }
0x10df   :  { %7266 = vrsqrt.f32 %v4192_v15  ;;  %v6801_v16 = vpop.f32.mrb[50].mxu0  ;;  %v8123_v12 = vrot.slane %v8068_v7, 4 }
0x10e0   :  { %v4207_v17 = vadd.f32 1e-05, %v6801_v16  ;;  %v4201_v18 = vpop.f32.mrb[51].mxu0  ;;  %v4658_v16 = vadd.f32 %v4657_v14, %v4656_v13  ;;  %v8126_v14 = vrot.slane %v8083_v11, 4 }
0x10e1   :  { %v4202_v19 = vadd.f32 1e-05, %v4201_v18 }
0x10e2   :  { %7268 = vrsqrt.f32 %v4207_v17 }
0x10e3   :  { %7270 = vrsqrt.f32 %v4202_v19 }
0x10e8   :  { %v7265_v20 = vpop.eup %7264 }
0x10e9   :  { %v7267_v22 = vpop.eup %7266  ;;  %v4215_v27 = vmul.f32 %v7265_v20, %v4021_v56 }
0x10ea   :  { %v4214_v29 = vmul.f32 %v7267_v22, %v4020_v58  ;;  %v4647_v22 = vlaneseq }
0x10eb   :  { %v4226_v31 = vmul.f32 %v5963_v21, %v4215_v27 }
0x10ec   :  { %v7269_v59 = vpop.eup %7268  ;;  %v4225_v61 = vmul.f32 %v5963_v21, %v4214_v29  ;;  %v4648_v27 = vand.u32 127, %v4647_v22 }
0x10ed   :  { %v7271_v23 = vpop.eup %7270  ;;  %v4237_v24 = vadd.f32 %v5964_v30, %v4226_v31  ;;  %v4217_v25 = vmul.f32 %v7269_v59, %v4023_v63 }
0x10ee   :  { %v4236_v28 = vadd.f32 %v5964_v30, %v4225_v61  ;;  %v4216_v5 = vmul.f32 %v7271_v23, %v4022_v53  ;;  %vm4649_vm3 = vcmp.ge.s32.totalorder %v4648_v27, 8  ;;  %vm4650_vm4 = vcmp.lt.s32.totalorder %v4648_v27, 12 }
0x10ef   :  { %v4228_v33 = vmul.f32 %v5963_v21, %v4217_v25  ;;  %v4241_v37 = vmax.f32 %v4237_v24, 0.0  ;;  %vm8092_vm5 = vmand %vm4649_vm3, %vm4650_vm4 }
0x10f0   :  { %v4240_v34 = vmax.f32 %v4236_v28, 0.0  ;;  %v4227_v35 = vmul.f32 %v5963_v21, %v4216_v5 }
0x10f1   :  { %v4239_v39 = vadd.f32 %v5964_v30, %v4228_v33 }
0x10f2   :  { %6806 = vmatprep.mubr.msk.f32.mxu1 %vm1208_vm2, %v4240_v34  ;;  %v4238_v40 = vadd.f32 %v5964_v30, %v4227_v35  ;;  %v7399_v34 = vmov 13   ;;  %v7400_v35 = vmov 12  }
0x10f3   :  { %6807 = vmatmul.mubr.msk.f32.vlgmr.msra.gmra.mrb[68].mxu1 %vm1208_vm2, %v4241_v37  ;;  %v4243_v42 = vmax.f32 %v4239_v39, 0.0  ;;  %7195 = vset.pattern.permute.xlu0 %v7399_v34 }
0x10f4   :  { %v4242_v41 = vmax.f32 %v4238_v40, 0.0  ;;  %7194 = vset.pattern.permute.xlu1 %v7400_v35 }
0x10f6   :  { %6809 = vmatprep.mubr.msk.f32.mxu1 %vm1208_vm2, %v4242_v41  ;;  %v7402_v41 = vmov 14  }
0x10f7   :  { %6810 = vmatmul.mubr.msk.f32.gmra.mrb[70].mxu1 %vm1208_vm2, %v4243_v42  ;;  %v7403_v42 = vmov 15  }
0x10f8   :  { %6820 = vmatprep.mubr.msk.f32.mxu1 %vm78_vm0, %v4358_v38 }
0x11c6   :  { %v6808_v43 = vpop.f32.mrb[68].mxu1 }
0x11c7   :  { %v4337_v44 = vadd.f32 %v6808_v43, %v5965_v26  ;;  %v4331_v32 = vpop.f32.mrb[69].mxu1 }
0x11c8   :  { %v4332_v36 = vadd.f32 %v5965_v26, %v4331_v32 }
0x11ca   :  { %v7096_v46 = vpack.c.bf16 %v4337_v44, %v4332_v36  ;;  %v6811_v47 = vpop.f32.mrb[70].mxu1  ;;  %v7184_v48 = vpack.i.bf16 %v4337_v44, %v4332_v36 }
0x11cb   :  { %v4347_v49 = vadd.f32 %v6811_v47, %v5965_v26  ;;  %v4341_v50 = vpop.f32.mrb[71].mxu1 }
0x11cc   :  { %v4342_v52 = vadd.f32 %v5965_v26, %v4341_v50  ;;  %7185 = vrot.lane.b32.xlu0 %v7184_v48, %s7396_s17  ;;  %7097 = vmatprep.subr.bf16.mxu0 %v7096_v46 }
0x11cd   :  { %7099 = vmatpush3.bf16.msra.mxu0 %v7096_v46 }
0x11ce   :  { %v7189_v54 = vpack.i.bf16 %v4347_v49, %v4342_v52  ;;  %v7100_v56 = vpack.c.bf16 %v4347_v49, %v4342_v52 }
0x11d0   :  { %7190 = vrot.lane.b32.xlu0 %v7189_v54, %s7396_s17  ;;  %7101 = vmatprep.subr.bf16.mxu0 %v7100_v56 }
0x11d1   :  { %7103 = vmatpush3.bf16.msra.mxu0 %v7100_v56 }
0x11d4   :  { %6841 = vmatmul.mubr.msk.f32.vlgmr.msra.gmra.mrb[52].mxu0 %vm78_vm0, %v4351_v57 }
0x123e   :  { %v7186_v58 = vpop.permute.xlu0 %7185 }
0x123f   :  { %v7188_v60 = vunpack.i.h.bf16 %v7186_v58  ;;  %v7187_v51 = vunpack.i.l.bf16 %v7186_v58 }
0x1241   :  { %v7088_v62 = vpack.c.bf16 %v7188_v60, %v7187_v51 }
0x1242   :  { %v7191_v63 = vpop.permute.xlu0 %7190 }
0x1243   :  { %v7193_v0 = vunpack.i.h.bf16 %v7191_v63  ;;  %v7192_v53 = vunpack.i.l.bf16 %v7191_v63  ;;  %7089 = vmatprep.subr.bf16.mxu1 %v7088_v62 }
0x1244   :  { %7091 = vmatpush3.bf16.msra.mxu1 %v7088_v62 }
0x1245   :  { %v7092_v6 = vpack.c.bf16 %v7193_v0, %v7192_v53 }
0x1247   :  { %7093 = vmatprep.subr.bf16.mxu1 %v7092_v6 }
0x1248   :  { %7095 = vmatpush3.bf16.msra.mxu1 %v7092_v6 }
0x124b   :  { %6821 = vmatmul.mubr.msk.f32.vlgmr.msra.gmra.mrb[72].mxu1 %vm78_vm0, %v4359_v10 }
0x12a7   :  { %v6842_v55 = vpop.f32.mrb[52].mxu0 }
0x12a8   :  { %v4601_v1 = vpop.f32.mrb[53].mxu0 }
0x131e   :  { %v6822_v15 = vpop.f32.mrb[72].mxu1 }
0x131f   :  { %v8089_v17 = vadd.f32 %v6842_v55, %v6822_v15  ;;  %v4472_v18 = vpop.f32.mrb[73].mxu1  ;;  %v8129_v15 = vrot.slane %v8078_v9, 4 }
0x1320   :  { %v4602_v19 = vadd.f32 %v4601_v1, %v4472_v18 }
0x1322   :  { %v4659_v20 = vadd.f32 %v4658_v16, %v4602_v19 }
0x1324   :  { %v4660_v21 = vmul.f32 0.5, %v4659_v20 }
0x1326   :  { %7272 = vtanh.f32 %v4660_v21 }
0x1327   :  { %7274 = vtanh.f32 %v4659_v20 }
0x1330   :  { %v7273_v29 = vpop.eup %7272 }
0x1331   :  { %v4662_v30 = vmul.f32 0.5, %v7273_v29  ;;  %v7275_v61 = vpop.eup %7274 }
0x1333   :  { %v4663_v59 = vadd.f32 0.5, %v4662_v30 }
0x1335   :  { %v4665_v23 = vsel %vm8092_vm5, %v7275_v61, %v4663_v59 }
0x1336   :  { %4668 = vrot.lane.b32.xlu1 %v4665_v23, %s7397_s13  ;;  %v4666_v28 = vmul.f32 0.0, %v4665_v23 }
0x13a8   :  { %v4669_v24 = vpop.permute.xlu1 %4668 }
0x13a9   :  { %v4671_v25 = vmul.f32 %v4669_v24, %v4665_v23 }
0x13ab   :  { %4673 = vrot.lane.b32.xlu1 %v4671_v25, %s7398_s22 }
0x141d   :  { %v4674_v5 = vpop.permute.xlu1 %4673 }
0x141e   :  { %v4676_v33 = vadd.f32 %v4674_v5, %v4666_v28 }
0x1420   :  { %7276 = vtanh.f32 %v4676_v33  ;;  %v4718_v0 = vrot.slane %v4676_v33, 4 }
0x142a   :  { %v7277_v37 = vpop.eup %7276 }
0x142b   :  { %4679 = vrot.lane.b32.xlu0 %v7277_v37, %s7401_s26 }
0x149d   :  { %v4680_v39 = vpop.permute.xlu0 %4679 }
0x149e   :  { %v4682_v40 = vmul.f32 %v4680_v39, %v4665_v23 }
0x14a0   :  { %4690 = vperm.xlu0 %7195, %v4682_v40   ;;  %4685 = vperm.xlu1 %7194, %v4682_v40  }
0x14a4   :  { %7196 = vset.pattern.permute.xlu1 %v7402_v41 }
0x14a5   :  { %4695 = vperm.xlu1 %7196, %v4682_v40  }
0x14a9   :  { %7197 = vset.pattern.permute.xlu1 %v7403_v42 }
0x14aa   :  { %4700 = vperm.xlu1 %7197, %v4682_v40  }
0x14ae   :  { %7198 = vset.pattern.permute.xlu1 %v7400_v35 }
0x151f   :  { %v4686_v26 = vpop.permute.xlu1 %4685  ;;  %v4691_v44 = vpop.permute.xlu0 %4690 }
0x1520   :  { %v4693_v32 = vmul.f32 %v8073_v8, %v4691_v44  ;;  %v4688_v36 = vmul.f32 %v4686_v26, %v8068_v7 }
0x1522   :  { %v4704_v47 = vadd.f32 %v4693_v32, %v4688_v36 }
0x1524   :  { %v4696_v43 = vpop.permute.xlu1 %4695 }
0x1525   :  { %v4698_v45 = vmul.f32 %v8078_v9, %v4696_v43 }
0x1529   :  { %v4701_v38 = vpop.permute.xlu1 %4700 }
0x152a   :  { %v4703_v46 = vmul.f32 %v8083_v11, %v4701_v38 }
0x152c   :  { %v4705_v48 = vadd.f32 %v4703_v46, %v4698_v45 }
0x152e   :  { %v4706_v49 = vadd.f32 %v4705_v48, %v4704_v47 }
0x1530   :  { %v4708_v50 = vrot.slane %v4706_v49, 4 }
0x1532   :  { %v4710_v52 = vadd.f32 %v4708_v50, %v4602_v19 }
0x1534   :  { %v4711_v54 = vmul.f32 0.5, %v4710_v52 }
0x1536   :  { %7278 = vtanh.f32 %v4711_v54 }
0x1537   :  { %7280 = vtanh.f32 %v4710_v52 }
0x1540   :  { %v7279_v56 = vpop.eup %7278 }
0x1541   :  { %v4713_v57 = vmul.f32 0.5, %v7279_v56  ;;  %v7281_v60 = vpop.eup %7280 }
0x1543   :  { %v4714_v58 = vadd.f32 0.5, %v4713_v57 }
0x1545   :  { %v4716_v51 = vsel %vm8092_vm5, %v7281_v60, %v4714_v58 }
0x1546   :  { %4722 = vrot.lane.b32.xlu0 %v4716_v51, %s7397_s13  ;;  %v4720_v53 = vmul.f32 %v4718_v0, %v4716_v51 }
0x15b8   :  { %v4723_v62 = vpop.permute.xlu0 %4722 }
0x15b9   :  { %v4725_v63 = vmul.f32 %v4723_v62, %v4716_v51 }
0x15bb   :  { %4727 = vrot.lane.b32.xlu1 %v4725_v63, %s7398_s22 }
0x162d   :  { %v4728_v6 = vpop.permute.xlu1 %4727 }
0x162e   :  { %v4730_v10 = vadd.f32 %v4728_v6, %v4720_v53 }
0x1630   :  { %7282 = vtanh.f32 %v4730_v10  ;;  %v4784_v26 = vrot.slane %v4730_v10, 4 }
0x163a   :  { %v7283_v55 = vpop.eup %7282 }
0x163b   :  { %4733 = vrot.lane.b32.xlu0 %v7283_v55, %s7401_s26 }
0x16ad   :  { %v4734_v1 = vpop.permute.xlu0 %4733 }
0x16ae   :  { %v4736_v2 = vmul.f32 %v4734_v1, %v4716_v51 }
0x16b0   :  { %4747 = vperm.xlu0 %7195, %v4736_v2   ;;  %4739 = vperm.xlu1 %7198, %v4736_v2  }
0x16b4   :  { %7200 = vset.pattern.permute.xlu0 %v7403_v42  ;;  %7199 = vset.pattern.permute.xlu1 %v7402_v41 }
0x16b5   :  { %4763 = vperm.xlu0 %7200, %v4736_v2   ;;  %4755 = vperm.xlu1 %7199, %v4736_v2  }
0x16b9   :  { %7202 = vset.pattern.permute.xlu0 %v7399_v34  ;;  %7201 = vset.pattern.permute.xlu1 %v7400_v35 }
0x172f   :  { %v4748_v4 = vpop.permute.xlu0 %4747  ;;  %v4740_v13 = vpop.permute.xlu1 %4739 }
0x1730   :  { %v4753_v16 = vmul.f32 %v8120_v3, %v4748_v4  ;;  %v4745_v18 = vmul.f32 %v8123_v12, %v4740_v13  ;;  %v4352_v4 = vld [vmem:[%s8514_s18 + $0x10] sm:$0xff]  ;;  %v4361_v13 = vld [vmem:[%s8515_s19 + $0x18] sm:$0xff] }
0x1731   :  { %6843 = vmatprep.mubr.msk.f32.mxu0 %vm78_vm0, %v4352_v4 }
0x1732   :  { %v4770_v29 = vadd.f32 %v4753_v16, %v4745_v18  ;;  %v4353_v16 = vld [vmem:[%s8514_s18 + $0x18] sm:$0xff] }
0x1733   :  { %6844 = vmatmul.mubr.msk.f32.gmra.mrb[54].mxu0 %vm78_vm0, %v4353_v16 }
0x1734   :  { %v4764_v19 = vpop.permute.xlu0 %4763  ;;  %v4756_v20 = vpop.permute.xlu1 %4755 }
0x1735   :  { %v4769_v21 = vmul.f32 %v8126_v14, %v4764_v19  ;;  %v4761_v27 = vmul.f32 %v8129_v15, %v4756_v20 }
0x1737   :  { %v4771_v30 = vadd.f32 %v4769_v21, %v4761_v27 }
0x1739   :  { %v4772_v59 = vadd.f32 %v4771_v30, %v4770_v29 }
0x173b   :  { %v4774_v61 = vrot.slane %v4772_v59, 4 }
0x173d   :  { %v4776_v23 = vadd.f32 %v4774_v61, %v8089_v17 }
0x173f   :  { %v4777_v24 = vmul.f32 0.5, %v4776_v23 }
0x1741   :  { %7284 = vtanh.f32 %v4777_v24 }
0x1742   :  { %7286 = vtanh.f32 %v4776_v23 }
0x174b   :  { %v7285_v25 = vpop.eup %7284 }
0x174c   :  { %v4779_v28 = vmul.f32 0.5, %v7285_v25  ;;  %v7287_v33 = vpop.eup %7286 }
0x174e   :  { %v4780_v5 = vadd.f32 0.5, %v4779_v28 }
0x1750   :  { %v4782_v37 = vsel %vm8092_vm5, %v7287_v33, %v4780_v5 }
0x1751   :  { %4788 = vrot.lane.b32.xlu1 %v4782_v37, %s7397_s13  ;;  %v4786_v43 = vmul.f32 %v4784_v26, %v4782_v37 }
0x17c3   :  { %v4789_v39 = vpop.permute.xlu1 %4788 }
0x17c4   :  { %v4791_v40 = vmul.f32 %v4789_v39, %v4782_v37 }
0x17c6   :  { %4793 = vrot.lane.b32.xlu1 %v4791_v40, %s7398_s22 }
0x1806   :  { %v6845_v61 = vpop.f32.mrb[54].mxu0 }
0x1807   :  { %v4611_v25 = vpop.f32.mrb[55].mxu0 }
0x1838   :  { %v4794_v44 = vpop.permute.xlu1 %4793 }
0x1839   :  { %v4796_v32 = vadd.f32 %v4794_v44, %v4786_v43 }
0x183b   :  { %7288 = vtanh.f32 %v4796_v32  ;;  %v4838_v18 = vrot.slane %v4796_v32, 4 }
0x1845   :  { %v7289_v36 = vpop.eup %7288 }
0x1846   :  { %4799 = vrot.lane.b32.xlu0 %v7289_v36, %s7401_s26 }
0x18b8   :  { %v4800_v38 = vpop.permute.xlu0 %4799 }
0x18b9   :  { %v4802_v45 = vmul.f32 %v4800_v38, %v4782_v37 }
0x18bb   :  { %4810 = vperm.xlu0 %7202, %v4802_v45   ;;  %4805 = vperm.xlu1 %7201, %v4802_v45  }
0x18bf   :  { %7203 = vset.pattern.permute.xlu1 %v7402_v41 }
0x18c0   :  { %4815 = vperm.xlu1 %7203, %v4802_v45  }
0x18c4   :  { %7204 = vset.pattern.permute.xlu1 %v7403_v42 }
0x18c5   :  { %4820 = vperm.xlu1 %7204, %v4802_v45  }
0x18c9   :  { %7205 = vset.pattern.permute.xlu1 %v7400_v35 }
0x193a   :  { %v4806_v46 = vpop.permute.xlu1 %4805  ;;  %v4811_v48 = vpop.permute.xlu0 %4810 }
0x193b   :  { %v4813_v49 = vmul.f32 %v8073_v8, %v4811_v48  ;;  %v4808_v50 = vmul.f32 %v4806_v46, %v8068_v7 }
0x193d   :  { %v4824_v57 = vadd.f32 %v4813_v49, %v4808_v50 }
0x193f   :  { %v4816_v47 = vpop.permute.xlu1 %4815 }
0x1940   :  { %v4818_v54 = vmul.f32 %v8078_v9, %v4816_v47 }
0x1944   :  { %v4821_v52 = vpop.permute.xlu1 %4820 }
0x1945   :  { %v4823_v56 = vmul.f32 %v8083_v11, %v4821_v52 }
0x1947   :  { %v4825_v58 = vadd.f32 %v4823_v56, %v4818_v54 }
0x1949   :  { %v4826_v60 = vadd.f32 %v4825_v58, %v4824_v57 }
0x194b   :  { %v4828_v51 = vrot.slane %v4826_v60, 4 }
0x194d   :  { %v4830_v62 = vadd.f32 %v4828_v51, %v8089_v17  ;;  %v4360_v17 = vld [vmem:[%s8515_s19 + $0x10] sm:$0xff] }
0x194e   :  { %6823 = vmatprep.mubr.msk.f32.mxu1 %vm78_vm0, %v4360_v17 }
0x194f   :  { %v4831_v63 = vmul.f32 0.5, %v4830_v62  ;;  %6824 = vmatmul.mubr.msk.f32.gmra.mrb[74].mxu1 %vm78_vm0, %v4361_v13 }
0x1951   :  { %7290 = vtanh.f32 %v4831_v63 }
0x1952   :  { %7292 = vtanh.f32 %v4830_v62 }
0x195b   :  { %v7291_v0 = vpop.eup %7290 }
0x195c   :  { %v4833_v53 = vmul.f32 0.5, %v7291_v0  ;;  %v7293_v10 = vpop.eup %7292 }
0x195e   :  { %v4834_v6 = vadd.f32 0.5, %v4833_v53 }
0x1960   :  { %v4836_v55 = vsel %vm8092_vm5, %v7293_v10, %v4834_v6 }
0x1961   :  { %4842 = vrot.lane.b32.xlu0 %v4836_v55, %s7397_s13  ;;  %v4840_v19 = vmul.f32 %v4838_v18, %v4836_v55 }
0x19d3   :  { %v4843_v1 = vpop.permute.xlu0 %4842 }
0x19d4   :  { %v4845_v2 = vmul.f32 %v4843_v1, %v4836_v55 }
0x19d6   :  { %4847 = vrot.lane.b32.xlu1 %v4845_v2, %s7398_s22 }
0x1a22   :  { %v6825_v59 = vpop.f32.mrb[74].mxu1 }
0x1a23   :  { %v8178_v23 = vadd.f32 %v6845_v61, %v6825_v59  ;;  %v4482_v24 = vpop.f32.mrb[75].mxu1 }
0x1a24   :  { %v4612_v28 = vadd.f32 %v4611_v25, %v4482_v24 }
0x1a48   :  { %v4848_v20 = vpop.permute.xlu1 %4847 }
0x1a49   :  { %v4850_v21 = vadd.f32 %v4848_v20, %v4840_v19 }
0x1a4b   :  { %7294 = vtanh.f32 %v4850_v21  ;;  %v4951_v58 = vrot.slane %v4850_v21, 4 }
0x1a55   :  { %v7295_v27 = vpop.eup %7294 }
0x1a56   :  { %4853 = vrot.lane.b32.xlu0 %v7295_v27, %s7401_s26 }
0x1ac8   :  { %v4854_v29 = vpop.permute.xlu0 %4853 }
0x1ac9   :  { %v8170_v30 = vmul.f32 %v4854_v29, %v4836_v55 }
0x1acb   :  { %4923 = vperm.xlu0 %7202, %v8170_v30   ;;  %4918 = vperm.xlu1 %7205, %v8170_v30  }
0x1acf   :  { %7207 = vset.pattern.permute.xlu0 %v7403_v42  ;;  %7206 = vset.pattern.permute.xlu1 %v7402_v41 }
0x1ad0   :  { %4933 = vperm.xlu0 %7207, %v8170_v30   ;;  %4928 = vperm.xlu1 %7206, %v8170_v30  }
0x1ad4   :  { %7209 = vset.pattern.permute.xlu0 %v7399_v34  ;;  %7208 = vset.pattern.permute.xlu1 %v7400_v35 }
0x1b4a   :  { %v4924_v5 = vpop.permute.xlu0 %4923  ;;  %v4919_v33 = vpop.permute.xlu1 %4918 }
0x1b4b   :  { %v4926_v37 = vmul.f32 %v4924_v5, %v8120_v3  ;;  %v4921_v39 = vmul.f32 %v4919_v33, %v8123_v12 }
0x1b4d   :  { %v4937_v32 = vadd.f32 %v4926_v37, %v4921_v39 }
0x1b4f   :  { %v4934_v40 = vpop.permute.xlu0 %4933  ;;  %v4929_v26 = vpop.permute.xlu1 %4928 }
0x1b50   :  { %v4936_v43 = vmul.f32 %v4934_v40, %v8126_v14  ;;  %v4931_v44 = vmul.f32 %v4929_v26, %v8129_v15 }
0x1b52   :  { %v4938_v36 = vadd.f32 %v4936_v43, %v4931_v44 }
0x1b54   :  { %v4939_v38 = vadd.f32 %v4938_v36, %v4937_v32 }
0x1b56   :  { %v4941_v45 = vrot.slane %v4939_v38, 4 }
0x1b58   :  { %v4943_v46 = vadd.f32 %v4941_v45, %v4612_v28 }
0x1b5a   :  { %v4944_v47 = vmul.f32 0.5, %v4943_v46 }
0x1b5c   :  { %7296 = vtanh.f32 %v4944_v47 }
0x1b5d   :  { %7298 = vtanh.f32 %v4943_v46 }
0x1b66   :  { %v7297_v48 = vpop.eup %7296 }
0x1b67   :  { %v4946_v49 = vmul.f32 0.5, %v7297_v48  ;;  %v7299_v52 = vpop.eup %7298 }
0x1b69   :  { %v4947_v50 = vadd.f32 0.5, %v4946_v49 }
0x1b6b   :  { %v4949_v54 = vsel %vm8092_vm5, %v7299_v52, %v4947_v50 }
0x1b6c   :  { %4955 = vrot.lane.b32.xlu1 %v4949_v54, %s7397_s13  ;;  %v4953_v60 = vmul.f32 %v4951_v58, %v4949_v54 }
0x1bde   :  { %v4956_v56 = vpop.permute.xlu1 %4955 }
0x1bdf   :  { %v4958_v57 = vmul.f32 %v4956_v56, %v4949_v54 }
0x1be1   :  { %4960 = vrot.lane.b32.xlu1 %v4958_v57, %s7398_s22 }
0x1c53   :  { %v4961_v51 = vpop.permute.xlu1 %4960 }
0x1c54   :  { %v4963_v62 = vadd.f32 %v4961_v51, %v4953_v60 }
0x1c56   :  { %7300 = vtanh.f32 %v4963_v62  ;;  %v5005_v37 = vrot.slane %v4963_v62, 4 }
0x1c60   :  { %v7301_v63 = vpop.eup %7300 }
0x1c61   :  { %4966 = vrot.lane.b32.xlu0 %v7301_v63, %s7401_s26 }
0x1cd3   :  { %v4967_v0 = vpop.permute.xlu0 %4966 }
0x1cd4   :  { %v4969_v53 = vmul.f32 %v4967_v0, %v4949_v54 }
0x1cd6   :  { %4977 = vperm.xlu0 %7209, %v4969_v53   ;;  %4972 = vperm.xlu1 %7208, %v4969_v53  }
0x1cda   :  { %7210 = vset.pattern.permute.xlu1 %v7402_v41 }
0x1cdb   :  { %4982 = vperm.xlu1 %7210, %v4969_v53  }
0x1cdf   :  { %7211 = vset.pattern.permute.xlu1 %v7403_v42 }
0x1ce0   :  { %4987 = vperm.xlu1 %7211, %v4969_v53  }
0x1ce4   :  { %7212 = vset.pattern.permute.xlu1 %v7400_v35 }
0x1d55   :  { %v4973_v6 = vpop.permute.xlu1 %4972  ;;  %v4978_v55 = vpop.permute.xlu0 %4977 }
0x1d56   :  { %v4980_v1 = vmul.f32 %v8073_v8, %v4978_v55  ;;  %v4975_v2 = vmul.f32 %v4973_v6, %v8068_v7 }
0x1d58   :  { %v4991_v16 = vadd.f32 %v4980_v1, %v4975_v2 }
0x1d5a   :  { %v4983_v10 = vpop.permute.xlu1 %4982 }
0x1d5b   :  { %v4985_v4 = vmul.f32 %v8078_v9, %v4983_v10 }
0x1d5f   :  { %v4988_v17 = vpop.permute.xlu1 %4987 }
0x1d60   :  { %v4990_v13 = vmul.f32 %v8083_v11, %v4988_v17 }
0x1d62   :  { %v4992_v18 = vadd.f32 %v4990_v13, %v4985_v4 }
0x1d64   :  { %v4993_v19 = vadd.f32 %v4992_v18, %v4991_v16 }
0x1d66   :  { %v4995_v20 = vrot.slane %v4993_v19, 4 }
0x1d68   :  { %v4997_v21 = vadd.f32 %v4995_v20, %v4612_v28 }
0x1d6a   :  { %v4998_v27 = vmul.f32 0.5, %v4997_v21 }
0x1d6c   :  { %7302 = vtanh.f32 %v4998_v27 }
0x1d6d   :  { %7304 = vtanh.f32 %v4997_v21 }
0x1d76   :  { %v7303_v29 = vpop.eup %7302 }
0x1d77   :  { %v5000_v59 = vmul.f32 0.5, %v7303_v29  ;;  %v7305_v24 = vpop.eup %7304 }
0x1d79   :  { %v5001_v61 = vadd.f32 0.5, %v5000_v59 }
0x1d7b   :  { %v5003_v25 = vsel %vm8092_vm5, %v7305_v24, %v5001_v61 }
0x1d7c   :  { %5009 = vrot.lane.b32.xlu0 %v5003_v25, %s7397_s13  ;;  %v5007_v39 = vmul.f32 %v5005_v37, %v5003_v25 }
0x1dee   :  { %v5010_v5 = vpop.permute.xlu0 %5009 }
0x1def   :  { %v5012_v33 = vmul.f32 %v5010_v5, %v5003_v25 }
0x1df1   :  { %5014 = vrot.lane.b32.xlu1 %v5012_v33, %s7398_s22 }
0x1e63   :  { %v5015_v40 = vpop.permute.xlu1 %5014 }
0x1e64   :  { %v5017_v28 = vadd.f32 %v5015_v40, %v5007_v39 }
0x1e66   :  { %7306 = vtanh.f32 %v5017_v28  ;;  %v5059_v10 = vrot.slane %v5017_v28, 4 }
0x1e70   :  { %v7307_v26 = vpop.eup %7306 }
0x1e71   :  { %5020 = vrot.lane.b32.xlu0 %v7307_v26, %s7401_s26 }
0x1ee3   :  { %v5021_v43 = vpop.permute.xlu0 %5020 }
0x1ee4   :  { %v5023_v44 = vmul.f32 %v5021_v43, %v5003_v25 }
0x1ee6   :  { %5031 = vperm.xlu0 %7209, %v5023_v44   ;;  %5026 = vperm.xlu1 %7212, %v5023_v44  }
0x1eea   :  { %7214 = vset.pattern.permute.xlu0 %v7403_v42  ;;  %7213 = vset.pattern.permute.xlu1 %v7402_v41 }
0x1eeb   :  { %5041 = vperm.xlu0 %7214, %v5023_v44   ;;  %5036 = vperm.xlu1 %7213, %v5023_v44  }
0x1eef   :  { %7216 = vset.pattern.permute.xlu0 %v7399_v34  ;;  %7215 = vset.pattern.permute.xlu1 %v7400_v35 }
0x1f65   :  { %v5032_v32 = vpop.permute.xlu0 %5031  ;;  %v5027_v36 = vpop.permute.xlu1 %5026 }
0x1f66   :  { %v5034_v38 = vmul.f32 %v5032_v32, %v8120_v3  ;;  %v5029_v45 = vmul.f32 %v5027_v36, %v8123_v12  ;;  %v4354_v36 = vld [vmem:[%s8514_s18 + $0x20] sm:$0xff] }
0x1f67   :  { %6846 = vmatprep.mubr.msk.f32.mxu0 %vm78_vm0, %v4354_v36 }
0x1f68   :  { %v5045_v50 = vadd.f32 %v5034_v38, %v5029_v45  ;;  %v4363_v38 = vld [vmem:[%s8515_s19 + $0x28] sm:$0xff] }
0x1f69   :  { %v4355_v45 = vld [vmem:[%s8514_s18 + $0x28] sm:$0xff] }
0x1f6a   :  { %v5042_v46 = vpop.permute.xlu0 %5041  ;;  %v5037_v47 = vpop.permute.xlu1 %5036  ;;  %6847 = vmatmul.mubr.msk.f32.gmra.mrb[56].mxu0 %vm78_vm0, %v4355_v45 }
0x1f6b   :  { %v5044_v48 = vmul.f32 %v5042_v46, %v8126_v14  ;;  %v5039_v49 = vmul.f32 %v5037_v47, %v8129_v15 }
0x1f6d   :  { %v5046_v52 = vadd.f32 %v5044_v48, %v5039_v49 }
0x1f6f   :  { %v5047_v54 = vadd.f32 %v5046_v52, %v5045_v50 }
0x1f71   :  { %v5049_v56 = vrot.slane %v5047_v54, 4 }
0x1f73   :  { %v5051_v57 = vadd.f32 %v5049_v56, %v8178_v23 }
0x1f75   :  { %v5052_v58 = vmul.f32 0.5, %v5051_v57 }
0x1f77   :  { %7308 = vtanh.f32 %v5052_v58 }
0x1f78   :  { %7310 = vtanh.f32 %v5051_v57 }
0x1f81   :  { %v7309_v60 = vpop.eup %7308 }
0x1f82   :  { %v5054_v51 = vmul.f32 0.5, %v7309_v60  ;;  %v7311_v63 = vpop.eup %7310 }
0x1f84   :  { %v5055_v62 = vadd.f32 0.5, %v5054_v51 }
0x1f86   :  { %v5057_v0 = vsel %vm8092_vm5, %v7311_v63, %v5055_v62 }
0x1f87   :  { %5063 = vrot.lane.b32.xlu1 %v5057_v0, %s7397_s13  ;;  %v5061_v55 = vmul.f32 %v5059_v10, %v5057_v0 }
0x1ff9   :  { %v5064_v53 = vpop.permute.xlu1 %5063 }
0x1ffa   :  { %v5066_v6 = vmul.f32 %v5064_v53, %v5057_v0 }
0x1ffc   :  { %5068 = vrot.lane.b32.xlu1 %v5066_v6, %s7398_s22 }
0x203d   :  { %v6848_v57 = vpop.f32.mrb[56].mxu0 }
0x203e   :  { %v4621_v51 = vpop.f32.mrb[57].mxu0 }
0x206e   :  { %v5069_v1 = vpop.permute.xlu1 %5068 }
0x206f   :  { %v5071_v2 = vadd.f32 %v5069_v1, %v5061_v55 }
0x2071   :  { %7312 = vtanh.f32 %v5071_v2  ;;  %v5113_v46 = vrot.slane %v5071_v2, 4 }
0x207b   :  { %v7313_v17 = vpop.eup %7312 }
0x207c   :  { %5074 = vrot.lane.b32.xlu0 %v7313_v17, %s7401_s26 }
0x20ee   :  { %v5075_v4 = vpop.permute.xlu0 %5074 }
0x20ef   :  { %v5077_v13 = vmul.f32 %v5075_v4, %v5057_v0 }
0x20f1   :  { %5085 = vperm.xlu0 %7216, %v5077_v13   ;;  %5080 = vperm.xlu1 %7215, %v5077_v13  }
0x20f5   :  { %7217 = vset.pattern.permute.xlu1 %v7402_v41 }
0x20f6   :  { %5090 = vperm.xlu1 %7217, %v5077_v13  }
0x20fa   :  { %7218 = vset.pattern.permute.xlu1 %v7403_v42 }
0x20fb   :  { %5095 = vperm.xlu1 %7218, %v5077_v13  }
0x20ff   :  { %7219 = vset.pattern.permute.xlu1 %v7400_v35 }
0x2170   :  { %v5081_v16 = vpop.permute.xlu1 %5080  ;;  %v5086_v19 = vpop.permute.xlu0 %5085 }
0x2171   :  { %v5088_v20 = vmul.f32 %v8073_v8, %v5086_v19  ;;  %v5083_v21 = vmul.f32 %v5081_v16, %v8068_v7 }
0x2173   :  { %v5099_v61 = vadd.f32 %v5088_v20, %v5083_v21 }
0x2175   :  { %v5091_v18 = vpop.permute.xlu1 %5090 }
0x2176   :  { %v5093_v29 = vmul.f32 %v8078_v9, %v5091_v18 }
0x217a   :  { %v5096_v27 = vpop.permute.xlu1 %5095 }
0x217b   :  { %v5098_v59 = vmul.f32 %v8083_v11, %v5096_v27 }
0x217d   :  { %v5100_v24 = vadd.f32 %v5098_v59, %v5093_v29 }
0x217f   :  { %v5101_v25 = vadd.f32 %v5100_v24, %v5099_v61 }
0x2181   :  { %v5103_v5 = vrot.slane %v5101_v25, 4 }
0x2183   :  { %v5105_v33 = vadd.f32 %v5103_v5, %v8178_v23  ;;  %v4362_v23 = vld [vmem:[%s8515_s19 + $0x20] sm:$0xff] }
0x2184   :  { %6826 = vmatprep.mubr.msk.f32.mxu1 %vm78_vm0, %v4362_v23 }
0x2185   :  { %v5106_v37 = vmul.f32 0.5, %v5105_v33  ;;  %6827 = vmatmul.mubr.msk.f32.gmra.mrb[76].mxu1 %vm78_vm0, %v4363_v38 }
0x2187   :  { %7314 = vtanh.f32 %v5106_v37 }
0x2188   :  { %7316 = vtanh.f32 %v5105_v33 }
0x2191   :  { %v7315_v39 = vpop.eup %7314 }
0x2192   :  { %v5108_v40 = vmul.f32 0.5, %v7315_v39  ;;  %v7317_v26 = vpop.eup %7316 }
0x2194   :  { %v5109_v28 = vadd.f32 0.5, %v5108_v40 }
0x2196   :  { %v5111_v43 = vsel %vm8092_vm5, %v7317_v26, %v5109_v28 }
0x2197   :  { %5117 = vrot.lane.b32.xlu0 %v5111_v43, %s7397_s13  ;;  %v5115_v47 = vmul.f32 %v5113_v46, %v5111_v43 }
0x2209   :  { %v5118_v44 = vpop.permute.xlu0 %5117 }
0x220a   :  { %v5120_v32 = vmul.f32 %v5118_v44, %v5111_v43 }
0x220c   :  { %5122 = vrot.lane.b32.xlu1 %v5120_v32, %s7398_s22 }
0x2258   :  { %v6828_v56 = vpop.f32.mrb[76].mxu1 }
0x2259   :  { %v8254_v58 = vadd.f32 %v6848_v57, %v6828_v56  ;;  %v4492_v60 = vpop.f32.mrb[77].mxu1 }
0x225a   :  { %v4622_v62 = vadd.f32 %v4621_v51, %v4492_v60 }
0x227e   :  { %v5123_v48 = vpop.permute.xlu1 %5122 }
0x227f   :  { %v5125_v49 = vadd.f32 %v5123_v48, %v5115_v47 }
0x2281   :  { %7318 = vtanh.f32 %v5125_v49  ;;  %v5224_v25 = vrot.slane %v5125_v49, 4 }
0x228b   :  { %v7319_v50 = vpop.eup %7318 }
0x228c   :  { %5128 = vrot.lane.b32.xlu0 %v7319_v50, %s7401_s26 }
0x22fe   :  { %v5129_v52 = vpop.permute.xlu0 %5128 }
0x22ff   :  { %v8246_v54 = vmul.f32 %v5129_v52, %v5111_v43 }
0x2301   :  { %5196 = vperm.xlu0 %7216, %v8246_v54   ;;  %5191 = vperm.xlu1 %7219, %v8246_v54   ;;  %v5133_v31 = vcombine.high %v8246_v54, %v8246_v54 }
0x2305   :  { %7221 = vset.pattern.permute.xlu0 %v7403_v42  ;;  %7220 = vset.pattern.permute.xlu1 %v7402_v41 }
0x2306   :  { %5206 = vperm.xlu0 %7221, %v8246_v54   ;;  %5201 = vperm.xlu1 %7220, %v8246_v54  }
0x230a   :  { %7223 = vset.pattern.permute.xlu0 %v7399_v34  ;;  %7222 = vset.pattern.permute.xlu1 %v7400_v35 }
0x2380   :  { %v5197_v63 = vpop.permute.xlu0 %5196  ;;  %v5192_v0 = vpop.permute.xlu1 %5191 }
0x2381   :  { %v5199_v53 = vmul.f32 %v5197_v63, %v8120_v3  ;;  %v5194_v6 = vmul.f32 %v5192_v0, %v8123_v12 }
0x2383   :  { %v5210_v17 = vadd.f32 %v5199_v53, %v5194_v6 }
0x2385   :  { %v5207_v10 = vpop.permute.xlu0 %5206  ;;  %v5202_v55 = vpop.permute.xlu1 %5201 }
0x2386   :  { %v5209_v1 = vmul.f32 %v5207_v10, %v8126_v14  ;;  %v5204_v2 = vmul.f32 %v5202_v55, %v8129_v15 }
0x2388   :  { %v5211_v4 = vadd.f32 %v5209_v1, %v5204_v2 }
0x238a   :  { %v5212_v13 = vadd.f32 %v5211_v4, %v5210_v17 }
0x238c   :  { %v5214_v16 = vrot.slane %v5212_v13, 4 }
0x238e   :  { %v5216_v18 = vadd.f32 %v5214_v16, %v4622_v62 }
0x2390   :  { %v5217_v19 = vmul.f32 0.5, %v5216_v18 }
0x2392   :  { %7320 = vtanh.f32 %v5217_v19 }
0x2393   :  { %7322 = vtanh.f32 %v5216_v18 }
0x239c   :  { %v7321_v20 = vpop.eup %7320 }
0x239d   :  { %v5219_v21 = vmul.f32 0.5, %v7321_v20  ;;  %v7323_v29 = vpop.eup %7322 }
0x239f   :  { %v5220_v27 = vadd.f32 0.5, %v5219_v21 }
0x23a1   :  { %v5222_v59 = vsel %vm8092_vm5, %v7323_v29, %v5220_v27 }
0x23a2   :  { %5228 = vrot.lane.b32.xlu1 %v5222_v59, %s7397_s13  ;;  %v5226_v5 = vmul.f32 %v5224_v25, %v5222_v59 }
0x2414   :  { %v5229_v61 = vpop.permute.xlu1 %5228 }
0x2415   :  { %v5231_v24 = vmul.f32 %v5229_v61, %v5222_v59 }
0x2417   :  { %5233 = vrot.lane.b32.xlu1 %v5231_v24, %s7398_s22 }
0x2489   :  { %v5234_v33 = vpop.permute.xlu1 %5233 }
0x248a   :  { %v5236_v37 = vadd.f32 %v5234_v33, %v5226_v5 }
0x248c   :  { %7324 = vtanh.f32 %v5236_v37  ;;  %v5278_v6 = vrot.slane %v5236_v37, 4 }
0x2496   :  { %v7325_v39 = vpop.eup %7324 }
0x2497   :  { %5239 = vrot.lane.b32.xlu0 %v7325_v39, %s7401_s26 }
0x2509   :  { %v5240_v40 = vpop.permute.xlu0 %5239 }
0x250a   :  { %v5242_v28 = vmul.f32 %v5240_v40, %v5222_v59 }
0x250c   :  { %5250 = vperm.xlu0 %7223, %v5242_v28   ;;  %5245 = vperm.xlu1 %7222, %v5242_v28  }
0x2510   :  { %7224 = vset.pattern.permute.xlu1 %v7402_v41 }
0x2511   :  { %5255 = vperm.xlu1 %7224, %v5242_v28  }
0x2515   :  { %7225 = vset.pattern.permute.xlu1 %v7403_v42 }
0x2516   :  { %5260 = vperm.xlu1 %7225, %v5242_v28  }
0x251a   :  { %7226 = vset.pattern.permute.xlu1 %v7400_v35 }
0x258b   :  { %v5246_v26 = vpop.permute.xlu1 %5245  ;;  %v5251_v44 = vpop.permute.xlu0 %5250 }
0x258c   :  { %v5253_v32 = vmul.f32 %v8073_v8, %v5251_v44  ;;  %v5248_v23 = vmul.f32 %v5246_v26, %v8068_v7 }
0x258e   :  { %v5264_v46 = vadd.f32 %v5253_v32, %v5248_v23 }
0x2590   :  { %v5256_v43 = vpop.permute.xlu1 %5255 }
0x2591   :  { %v5258_v38 = vmul.f32 %v8078_v9, %v5256_v43 }
0x2595   :  { %v5261_v36 = vpop.permute.xlu1 %5260 }
0x2596   :  { %v5263_v45 = vmul.f32 %v8083_v11, %v5261_v36 }
0x2598   :  { %v5265_v47 = vadd.f32 %v5263_v45, %v5258_v38 }
0x259a   :  { %v5266_v48 = vadd.f32 %v5265_v47, %v5264_v46 }
0x259c   :  { %v5268_v49 = vrot.slane %v5266_v48, 4 }
0x259e   :  { %v5270_v50 = vadd.f32 %v5268_v49, %v4622_v62 }
0x25a0   :  { %v5271_v52 = vmul.f32 0.5, %v5270_v50 }
0x25a2   :  { %7326 = vtanh.f32 %v5271_v52 }
0x25a3   :  { %7328 = vtanh.f32 %v5270_v50 }
0x25ac   :  { %v7327_v56 = vpop.eup %7326 }
0x25ad   :  { %v5273_v57 = vmul.f32 0.5, %v7327_v56  ;;  %v7329_v51 = vpop.eup %7328 }
0x25af   :  { %v5274_v60 = vadd.f32 0.5, %v5273_v57 }
0x25b1   :  { %v5276_v63 = vsel %vm8092_vm5, %v7329_v51, %v5274_v60 }
0x25b2   :  { %5282 = vrot.lane.b32.xlu0 %v5276_v63, %s7397_s13  ;;  %v5280_v10 = vmul.f32 %v5278_v6, %v5276_v63 }
0x2624   :  { %v5283_v0 = vpop.permute.xlu0 %5282 }
0x2625   :  { %v5285_v53 = vmul.f32 %v5283_v0, %v5276_v63 }
0x2627   :  { %5287 = vrot.lane.b32.xlu1 %v5285_v53, %s7398_s22 }
0x2699   :  { %v5288_v55 = vpop.permute.xlu1 %5287 }
0x269a   :  { %v5290_v62 = vadd.f32 %v5288_v55, %v5280_v10 }
0x269c   :  { %7330 = vtanh.f32 %v5290_v62  ;;  %v5332_v44 = vrot.slane %v5290_v62, 4 }
0x26a6   :  { %v7331_v1 = vpop.eup %7330 }
0x26a7   :  { %5293 = vrot.lane.b32.xlu0 %v7331_v1, %s7401_s26 }
0x2719   :  { %v5294_v2 = vpop.permute.xlu0 %5293 }
0x271a   :  { %v5296_v17 = vmul.f32 %v5294_v2, %v5276_v63  ;;  %v4356_v2 = vld [vmem:[%s8514_s18 + $0x30] sm:$0xff] }
0x271b   :  { %6849 = vmatprep.mubr.msk.f32.mxu0 %vm78_vm0, %v4356_v2  ;;  %v8361_v2 = vld [vmem:[%s8516_s20 + $0x8] sm:$0xf] }
0x271c   :  { %5304 = vperm.xlu0 %7223, %v5296_v17   ;;  %5299 = vperm.xlu1 %7226, %v5296_v17  }
0x2720   :  { %7228 = vset.pattern.permute.xlu0 %v7403_v42  ;;  %7227 = vset.pattern.permute.xlu1 %v7402_v41 }
0x2721   :  { %5314 = vperm.xlu0 %7228, %v5296_v17   ;;  %5309 = vperm.xlu1 %7227, %v5296_v17   ;;  %v4365_v17 = vld [vmem:[%s8515_s19 + $0x38] sm:$0xff] }
0x2725   :  { %7230 = vset.pattern.permute.xlu0 %v7399_v34  ;;  %7229 = vset.pattern.permute.xlu1 %v7400_v35 }
0x279b   :  { %v5305_v4 = vpop.permute.xlu0 %5304  ;;  %v5300_v13 = vpop.permute.xlu1 %5299 }
0x279c   :  { %v5307_v16 = vmul.f32 %v5305_v4, %v8120_v3  ;;  %v5302_v18 = vmul.f32 %v5300_v13, %v8123_v12  ;;  %v4357_v4 = vld [vmem:[%s8514_s18 + $0x38] sm:$0xff] }
0x279d   :  { %6850 = vmatmul.mubr.msk.f32.gmra.mrb[58].mxu0 %vm78_vm0, %v4357_v4  ;;  %v8367_v4 = vld [vmem:[%s8516_s20 + $0xc] sm:$0xf] }
0x279e   :  { %v5318_v29 = vadd.f32 %v5307_v16, %v5302_v18 }
0x27a0   :  { %v5315_v19 = vpop.permute.xlu0 %5314  ;;  %v5310_v20 = vpop.permute.xlu1 %5309 }
0x27a1   :  { %v5317_v21 = vmul.f32 %v5315_v19, %v8126_v14  ;;  %v5312_v27 = vmul.f32 %v5310_v20, %v8129_v15 }
0x27a3   :  { %v5319_v59 = vadd.f32 %v5317_v21, %v5312_v27 }
0x27a5   :  { %v5320_v61 = vadd.f32 %v5319_v59, %v5318_v29 }
0x27a7   :  { %v5322_v24 = vrot.slane %v5320_v61, 4 }
0x27a9   :  { %v5324_v25 = vadd.f32 %v5322_v24, %v8254_v58 }
0x27ab   :  { %v5325_v5 = vmul.f32 0.5, %v5324_v25 }
0x27ad   :  { %7332 = vtanh.f32 %v5325_v5 }
0x27ae   :  { %7334 = vtanh.f32 %v5324_v25 }
0x27b7   :  { %v7333_v33 = vpop.eup %7332 }
0x27b8   :  { %v5327_v37 = vmul.f32 0.5, %v7333_v33  ;;  %v7335_v40 = vpop.eup %7334 }
0x27ba   :  { %v5328_v39 = vadd.f32 0.5, %v5327_v37 }
0x27bc   :  { %v5330_v28 = vsel %vm8092_vm5, %v7335_v40, %v5328_v39 }
0x27bd   :  { %5336 = vrot.lane.b32.xlu1 %v5330_v28, %s7397_s13  ;;  %v5334_v32 = vmul.f32 %v5332_v44, %v5330_v28 }
0x282f   :  { %v5337_v26 = vpop.permute.xlu1 %5336 }
0x2830   :  { %v5339_v43 = vmul.f32 %v5337_v26, %v5330_v28 }
0x2832   :  { %5341 = vrot.lane.b32.xlu1 %v5339_v43, %s7398_s22 }
0x2870   :  { %v6851_v59 = vpop.f32.mrb[58].mxu0 }
0x2871   :  { %v4631_v25 = vpop.f32.mrb[59].mxu0 }
0x28a4   :  { %v5342_v23 = vpop.permute.xlu1 %5341 }
0x28a5   :  { %v5344_v36 = vadd.f32 %v5342_v23, %v5334_v32 }
0x28a7   :  { %7336 = vtanh.f32 %v5344_v36  ;;  %v5386_v13 = vrot.slane %v5344_v36, 4 }
0x28b1   :  { %v7337_v38 = vpop.eup %7336 }
0x28b2   :  { %5347 = vrot.lane.b32.xlu0 %v7337_v38, %s7401_s26 }
0x2924   :  { %v5348_v45 = vpop.permute.xlu0 %5347 }
0x2925   :  { %v5350_v46 = vmul.f32 %v5348_v45, %v5330_v28 }
0x2927   :  { %5358 = vperm.xlu0 %7230, %v5350_v46   ;;  %5353 = vperm.xlu1 %7229, %v5350_v46  }
0x292b   :  { %7231 = vset.pattern.permute.xlu1 %v7402_v41 }
0x292c   :  { %5363 = vperm.xlu1 %7231, %v5350_v46  }
0x2930   :  { %7232 = vset.pattern.permute.xlu1 %v7403_v42 }
0x2931   :  { %5368 = vperm.xlu1 %7232, %v5350_v46  }
0x2935   :  { %7233 = vset.pattern.permute.xlu1 %v7400_v35 }
0x29a6   :  { %v5354_v47 = vpop.permute.xlu1 %5353  ;;  %v5359_v49 = vpop.permute.xlu0 %5358 }
0x29a7   :  { %v5361_v50 = vmul.f32 %v8073_v8, %v5359_v49  ;;  %v5356_v52 = vmul.f32 %v5354_v47, %v8068_v7 }
0x29a9   :  { %v5372_v51 = vadd.f32 %v5361_v50, %v5356_v52 }
0x29ab   :  { %v5364_v48 = vpop.permute.xlu1 %5363 }
0x29ac   :  { %v5366_v57 = vmul.f32 %v8078_v9, %v5364_v48 }
0x29b0   :  { %v5369_v56 = vpop.permute.xlu1 %5368 }
0x29b1   :  { %v5371_v60 = vmul.f32 %v8083_v11, %v5369_v56 }
0x29b3   :  { %v5373_v63 = vadd.f32 %v5371_v60, %v5366_v57 }
0x29b5   :  { %v5374_v0 = vadd.f32 %v5373_v63, %v5372_v51 }
0x29b7   :  { %v5376_v53 = vrot.slane %v5374_v0, 4 }
0x29b9   :  { %v5378_v6 = vadd.f32 %v5376_v53, %v8254_v58  ;;  %v4364_v58 = vld [vmem:[%s8515_s19 + $0x30] sm:$0xff] }
0x29ba   :  { %6829 = vmatprep.mubr.msk.f32.mxu1 %vm78_vm0, %v4364_v58 }
0x29bb   :  { %v5379_v10 = vmul.f32 0.5, %v5378_v6  ;;  %6830 = vmatmul.mubr.msk.f32.gmra.mrb[78].mxu1 %vm78_vm0, %v4365_v17 }
0x29bd   :  { %7338 = vtanh.f32 %v5379_v10 }
0x29be   :  { %7340 = vtanh.f32 %v5378_v6 }
0x29c7   :  { %v7339_v55 = vpop.eup %7338 }
0x29c8   :  { %v5381_v62 = vmul.f32 0.5, %v7339_v55  ;;  %v7341_v8 = vpop.eup %7340 }
0x29ca   :  { %v5382_v1 = vadd.f32 0.5, %v5381_v62 }
0x29cc   :  { %v5384_v7 = vsel %vm8092_vm5, %v7341_v8, %v5382_v1  ;;  %v8349_v8 = vld [vmem:[%s8516_s20 + $0x4] sm:$0xf] }
0x29cd   :  { %5390 = vrot.lane.b32.xlu0 %v5384_v7, %s7397_s13  ;;  %v5388_v16 = vmul.f32 %v5386_v13, %v5384_v7 }
0x2a3f   :  { %v5391_v9 = vpop.permute.xlu0 %5390 }
0x2a40   :  { %v5393_v11 = vmul.f32 %v5391_v9, %v5384_v7  ;;  %v8355_v9 = vld [vmem:[%s8516_s20] sm:$0xf]  ;;  %s7405_s20 = smov 116  }
0x2a42   :  { %5395 = vrot.lane.b32.xlu1 %v5393_v11, %s7398_s22 }
0x2a8e   :  { %v6831_v29 = vpop.f32.mrb[78].mxu1 }
0x2a8f   :  { %v8330_v61 = vadd.f32 %v6851_v59, %v6831_v29  ;;  %v4502_v24 = vpop.f32.mrb[79].mxu1 }
0x2a90   :  { %v4632_v5 = vadd.f32 %v4631_v25, %v4502_v24 }
0x2ab4   :  { %v5396_v18 = vpop.permute.xlu1 %5395 }
0x2ab5   :  { %v5398_v19 = vadd.f32 %v5396_v18, %v5388_v16 }
0x2ab7   :  { %7342 = vtanh.f32 %v5398_v19  ;;  %v5497_v60 = vrot.slane %v5398_v19, 4 }
0x2ac1   :  { %v7343_v20 = vpop.eup %7342 }
0x2ac2   :  { %5401 = vrot.lane.b32.xlu0 %v7343_v20, %s7401_s26 }
0x2b34   :  { %v5402_v21 = vpop.permute.xlu0 %5401 }
0x2b35   :  { %v8322_v27 = vmul.f32 %v5402_v21, %v5384_v7 }
0x2b37   :  { %5469 = vperm.xlu0 %7230, %v8322_v27   ;;  %5464 = vperm.xlu1 %7233, %v8322_v27  }
0x2b3b   :  { %7235 = vset.pattern.permute.xlu0 %v7403_v42  ;;  %7234 = vset.pattern.permute.xlu1 %v7402_v41 }
0x2b3c   :  { %5479 = vperm.xlu0 %7235, %v8322_v27   ;;  %5474 = vperm.xlu1 %7234, %v8322_v27  }
0x2b40   :  { %7237 = vset.pattern.permute.xlu0 %v7399_v34  ;;  %7236 = vset.pattern.permute.xlu1 %v7400_v35 }
0x2bb6   :  { %v5470_v33 = vpop.permute.xlu0 %5469  ;;  %v5465_v37 = vpop.permute.xlu1 %5464 }
0x2bb7   :  { %v5472_v39 = vmul.f32 %v5470_v33, %v8120_v3  ;;  %v5467_v40 = vmul.f32 %v5465_v37, %v8123_v12 }
0x2bb9   :  { %v5483_v32 = vadd.f32 %v5472_v39, %v5467_v40 }
0x2bbb   :  { %v5480_v28 = vpop.permute.xlu0 %5479  ;;  %v5475_v26 = vpop.permute.xlu1 %5474 }
0x2bbc   :  { %v5482_v43 = vmul.f32 %v5480_v28, %v8126_v14  ;;  %v5477_v44 = vmul.f32 %v5475_v26, %v8129_v15 }
0x2bbe   :  { %v5484_v23 = vadd.f32 %v5482_v43, %v5477_v44 }
0x2bc0   :  { %v5485_v36 = vadd.f32 %v5484_v23, %v5483_v32 }
0x2bc2   :  { %v5487_v38 = vrot.slane %v5485_v36, 4 }
0x2bc4   :  { %v5489_v45 = vadd.f32 %v5487_v38, %v4632_v5 }
0x2bc6   :  { %v5490_v46 = vmul.f32 0.5, %v5489_v45 }
0x2bc8   :  { %7344 = vtanh.f32 %v5490_v46 }
0x2bc9   :  { %7346 = vtanh.f32 %v5489_v45 }
0x2bd2   :  { %v7345_v47 = vpop.eup %7344 }
0x2bd3   :  { %v5492_v48 = vmul.f32 0.5, %v7345_v47  ;;  %v7347_v50 = vpop.eup %7346 }
0x2bd5   :  { %v5493_v49 = vadd.f32 0.5, %v5492_v48 }
0x2bd7   :  { %v5495_v52 = vsel %vm8092_vm5, %v7347_v50, %v5493_v49 }
0x2bd8   :  { %5501 = vrot.lane.b32.xlu1 %v5495_v52, %s7397_s13  ;;  %v5499_v51 = vmul.f32 %v5497_v60, %v5495_v52 }
0x2c4a   :  { %v5502_v56 = vpop.permute.xlu1 %5501 }
0x2c4b   :  { %v5504_v57 = vmul.f32 %v5502_v56, %v5495_v52 }
0x2c4d   :  { %5506 = vrot.lane.b32.xlu1 %v5504_v57, %s7398_s22 }
0x2cbf   :  { %v5507_v63 = vpop.permute.xlu1 %5506 }
0x2cc0   :  { %v5509_v0 = vadd.f32 %v5507_v63, %v5499_v51 }
0x2cc2   :  { %7348 = vtanh.f32 %v5509_v0  ;;  %v5551_v28 = vrot.slane %v5509_v0, 4 }
0x2ccc   :  { %v7349_v53 = vpop.eup %7348 }
0x2ccd   :  { %5512 = vrot.lane.b32.xlu0 %v7349_v53, %s7401_s26 }
0x2d3f   :  { %v5513_v6 = vpop.permute.xlu0 %5512 }
0x2d40   :  { %v5515_v10 = vmul.f32 %v5513_v6, %v5495_v52 }
0x2d42   :  { %5523 = vperm.xlu0 %7237, %v5515_v10   ;;  %5518 = vperm.xlu1 %7236, %v5515_v10  }
0x2d46   :  { %7238 = vset.pattern.permute.xlu1 %v7402_v41 }
0x2d47   :  { %5528 = vperm.xlu1 %7238, %v5515_v10  }
0x2d4b   :  { %7239 = vset.pattern.permute.xlu1 %v7403_v42 }
0x2d4c   :  { %5533 = vperm.xlu1 %7239, %v5515_v10  }
0x2d50   :  { %7240 = vset.pattern.permute.xlu1 %v7400_v35 }
0x2dc1   :  { %v5519_v55 = vpop.permute.xlu1 %5518  ;;  %v5524_v1 = vpop.permute.xlu0 %5523 }
0x2dc2   :  { %v5526_v7 = vmul.f32 %v8349_v8, %v5524_v1  ;;  %v5521_v11 = vmul.f32 %v8355_v9, %v5519_v55 }
0x2dc4   :  { %v5537_v16 = vadd.f32 %v5526_v7, %v5521_v11 }
0x2dc6   :  { %v5529_v62 = vpop.permute.xlu1 %5528 }
0x2dc7   :  { %v5531_v17 = vmul.f32 %v8361_v2, %v5529_v62 }
0x2dcb   :  { %v5534_v58 = vpop.permute.xlu1 %5533 }
0x2dcc   :  { %v5536_v13 = vmul.f32 %v8367_v4, %v5534_v58 }
0x2dce   :  { %v5538_v18 = vadd.f32 %v5536_v13, %v5531_v17 }
0x2dd0   :  { %v5539_v19 = vadd.f32 %v5538_v18, %v5537_v16 }
0x2dd2   :  { %v5541_v20 = vrot.slane %v5539_v19, 4 }
0x2dd4   :  { %v5543_v21 = vadd.f32 %v5541_v20, %v4632_v5 }
0x2dd6   :  { %v5544_v29 = vmul.f32 0.5, %v5543_v21 }
0x2dd8   :  { %7350 = vtanh.f32 %v5544_v29 }
0x2dd9   :  { %7352 = vtanh.f32 %v5543_v21 }
0x2de2   :  { %v7351_v59 = vpop.eup %7350 }
0x2de3   :  { %v5546_v24 = vmul.f32 0.5, %v7351_v59  ;;  %v7353_v33 = vpop.eup %7352 }
0x2de5   :  { %v5547_v25 = vadd.f32 0.5, %v5546_v24 }
0x2de7   :  { %v5549_v37 = vsel %vm8092_vm5, %v7353_v33, %v5547_v25 }
0x2de8   :  { %5555 = vrot.lane.b32.xlu0 %v5549_v37, %s7397_s13  ;;  %v5553_v26 = vmul.f32 %v5551_v28, %v5549_v37  ;;  %v4858_v28 = vcombine.high %v8170_v30, %v8170_v30  ;;  %v5406_v30 = vcombine.high %v8322_v27, %v8322_v27 }
0x2e5a   :  { %v5556_v39 = vpop.permute.xlu0 %5555 }
0x2e5b   :  { %v5558_v40 = vmul.f32 %v5556_v39, %v5549_v37 }
0x2e5d   :  { %5560 = vrot.lane.b32.xlu1 %v5558_v40, %s7398_s22  ;;  %v4863_v40 = vshrl.u32 %v4647_v22, 7 }
0x2ecf   :  { %v5561_v43 = vpop.permute.xlu1 %5560 }
0x2ed0   :  { %v5563_v5 = vadd.f32 %v5561_v43, %v5553_v26 }
0x2ed2   :  { %7354 = vtanh.f32 %v5563_v5  ;;  %v5605_v53 = vrot.slane %v5563_v5, 4  ;;  %v8412_v5 = vsub.s32 0, %v4863_v40 }
0x2edc   :  { %v7355_v44 = vpop.eup %7354 }
0x2edd   :  { %5566 = vrot.lane.b32.xlu0 %v7355_v44, %s7401_s26 }
0x2f4f   :  { %v5567_v32 = vpop.permute.xlu0 %5566 }
0x2f50   :  { %v5569_v23 = vmul.f32 %v5567_v32, %v5549_v37 }
0x2f52   :  { %5577 = vperm.xlu0 %7237, %v5569_v23   ;;  %5572 = vperm.xlu1 %7240, %v5569_v23  }
0x2f56   :  { %7242 = vset.pattern.permute.xlu0 %v7403_v42  ;;  %7241 = vset.pattern.permute.xlu1 %v7402_v41 }
0x2f57   :  { %5587 = vperm.xlu0 %7242, %v5569_v23   ;;  %5582 = vperm.xlu1 %7241, %v5569_v23  }
0x2f5b   :  { %7244 = vset.pattern.permute.xlu0 %v7399_v34  ;;  %7243 = vset.pattern.permute.xlu1 %v7400_v35 }
0x2fd1   :  { %v5578_v36 = vpop.permute.xlu0 %5577  ;;  %v5573_v38 = vpop.permute.xlu1 %5572 }
0x2fd2   :  { %v5580_v45 = vmul.f32 %v5578_v36, %v8120_v3  ;;  %v5575_v46 = vmul.f32 %v5573_v38, %v8123_v12 }
0x2fd4   :  { %v5591_v52 = vadd.f32 %v5580_v45, %v5575_v46 }
0x2fd6   :  { %v5588_v47 = vpop.permute.xlu0 %5587  ;;  %v5583_v48 = vpop.permute.xlu1 %5582 }
0x2fd7   :  { %v5590_v49 = vmul.f32 %v5588_v47, %v8126_v14  ;;  %v5585_v50 = vmul.f32 %v5583_v48, %v8129_v15 }
0x2fd9   :  { %v5592_v56 = vadd.f32 %v5590_v49, %v5585_v50 }
0x2fdb   :  { %v5593_v57 = vadd.f32 %v5592_v56, %v5591_v52 }
0x2fdd   :  { %v5595_v60 = vrot.slane %v5593_v57, 4 }
0x2fdf   :  { %v5597_v34 = vadd.f32 %v5595_v60, %v8330_v61 }
0x2fe1   :  { %v5598_v51 = vmul.f32 0.5, %v5597_v34 }
0x2fe3   :  { %7356 = vtanh.f32 %v5598_v51 }
0x2fe4   :  { %7358 = vtanh.f32 %v5597_v34 }
0x2fed   :  { %v7357_v35 = vpop.eup %7356 }
0x2fee   :  { %v5600_v63 = vmul.f32 0.5, %v7357_v35  ;;  %v7359_v0 = vpop.eup %7358 }
0x2ff0   :  { %v5601_v3 = vadd.f32 0.5, %v5600_v63 }
0x2ff2   :  { %v5603_v12 = vsel %vm8092_vm5, %v7359_v0, %v5601_v3 }
0x2ff3   :  { %5609 = vrot.lane.b32.xlu1 %v5603_v12, %s7397_s13  ;;  %v5607_v6 = vmul.f32 %v5605_v53, %v5603_v12 }
0x3065   :  { %v5610_v14 = vpop.permute.xlu1 %5609 }
0x3066   :  { %v5612_v15 = vmul.f32 %v5610_v14, %v5603_v12 }
0x3068   :  { %5614 = vrot.lane.b32.xlu1 %v5612_v15, %s7398_s22 }
0x30da   :  { %v5615_v10 = vpop.permute.xlu1 %5614 }
0x30db   :  { %v8388_v55 = vadd.f32 %v5615_v10, %v5607_v6 }
0x30dd   :  { %7360 = vtanh.f32 %v8388_v55  ;;  %v5659_v56 = vrot.slane %v8388_v55, 4 }
0x30e7   :  { %v7361_v62 = vpop.eup %7360 }
0x30e8   :  { %5620 = vrot.lane.b32.xlu0 %v7361_v62, %s7401_s26 }
0x315a   :  { %v5621_v1 = vpop.permute.xlu0 %5620 }
0x315b   :  { %v5623_v7 = vmul.f32 %v5621_v1, %v5603_v12 }
0x315d   :  { %5631 = vperm.xlu0 %7244, %v5623_v7   ;;  %5626 = vperm.xlu1 %7243, %v5623_v7  }
0x3161   :  { %7245 = vset.pattern.permute.xlu1 %v7402_v41  ;;  %7247 = vset.pattern.permute.xlu0 %v7403_v42 }
0x3162   :  { %5636 = vperm.xlu1 %7245, %v5623_v7  }
0x3166   :  { %7246 = vset.pattern.permute.xlu1 %v7403_v42 }
0x3167   :  { %5641 = vperm.xlu1 %7246, %v5623_v7  }
0x31dc   :  { %v5627_v11 = vpop.permute.xlu1 %5626  ;;  %v5632_v17 = vpop.permute.xlu0 %5631 }
0x31dd   :  { %v5634_v13 = vmul.f32 %v8349_v8, %v5632_v17  ;;  %v5629_v16 = vmul.f32 %v8355_v9, %v5627_v11 }
0x31df   :  { %v5645_v21 = vadd.f32 %v5634_v13, %v5629_v16 }
0x31e1   :  { %v5637_v58 = vpop.permute.xlu1 %5636 }
0x31e2   :  { %v5639_v19 = vmul.f32 %v8361_v2, %v5637_v58  ;;  %v7404_v2 = vmov 1966171168  }
0x31e6   :  { %v5642_v18 = vpop.permute.xlu1 %5641 }
0x31e7   :  { %v5644_v20 = vmul.f32 %v8367_v4, %v5642_v18  ;;  %v4860_v4 = vunpack.c.l.s4 %v7404_v2 }
0x31e9   :  { %v5646_v41 = vadd.f32 %v5644_v20, %v5639_v19  ;;  %v4861_v39 = vunpack.c.0.s8 %v4860_v4 }
0x31eb   :  { %v5647_v29 = vadd.f32 %v5646_v41, %v5645_v21 }
0x31ed   :  { %v5649_v59 = vrot.slane %v5647_v29, 4 }
0x31ef   :  { %v5651_v24 = vadd.f32 %v5649_v59, %v8330_v61  ;;  %v8407_v61 = vsub.s32 %v4861_v39, %v4863_v40 }
0x31f1   :  { %v5652_v42 = vmul.f32 0.5, %v5651_v24  ;;  %v4865_v26 = vrot.slane %v4858_v28, %v8407_v61  ;;  %v5140_v36 = vrot.slane %v5133_v31, %v8407_v61  ;;  %v5413_v47 = vrot.slane %v5406_v30, %v8407_v61 }
0x31f3   :  { %7362 = vtanh.f32 %v5652_v42  ;;  %v4873_v32 = vrot.slane %v4865_v26, %v8407_v61  ;;  %v5148_v54 = vrot.slane %v5140_v36, %v8407_v61  ;;  %v5421_v49 = vrot.slane %v5413_v47, %v8407_v61 }
0x31f4   :  { %7364 = vtanh.f32 %v5651_v24  ;;  %v4866_v63 = vcombine.high %v4865_v26, %v4865_v26  ;;  %v5141_v6 = vcombine.high %v5140_v36, %v5140_v36  ;;  %v5414_v58 = vcombine.high %v5413_v47, %v5413_v47 }
0x31f5   :  { %v4884_v22 = vrot.slane %v4873_v32, %v8412_v5  ;;  %v4898_v23 = vcombine.high %v4873_v32, %v4873_v32  ;;  %v5159_v45 = vrot.slane %v5148_v54, %v8412_v5  ;;  %v5172_v46 = vcombine.high %v5148_v54, %v5148_v54 }
0x31f6   :  { %v5432_v27 = vrot.slane %v5421_v49, %v8412_v5  ;;  %v5445_v50 = vcombine.high %v5421_v49, %v5421_v49  ;;  %v4880_v0 = vrot.slane %v4866_v63, %v8407_v61  ;;  %v5155_v62 = vrot.slane %v5141_v6, %v8407_v61 }
0x31f7   :  { %v4903_v38 = vrot.slane %v4898_v23, %v8412_v5  ;;  %v5177_v48 = vrot.slane %v5172_v46, %v8412_v5  ;;  %v5428_v13 = vrot.slane %v5414_v58, %v8407_v61 }
0x31f8   :  { %v5450_v52 = vrot.slane %v5445_v50, %v8412_v5  ;;  %v4888_v15 = vrot.slane %v4880_v0, %v8412_v5  ;;  %v4899_v53 = vcombine.high %v4880_v0, %v4880_v0  ;;  %v5163_v7 = vrot.slane %v5155_v62, %v8412_v5 }
0x31f9   :  { %v5173_v11 = vcombine.high %v5155_v62, %v5155_v62  ;;  %v5436_v16 = vrot.slane %v5428_v13, %v8412_v5  ;;  %v5446_v18 = vcombine.high %v5428_v13, %v5428_v13 }
0x31fa   :  { %v4907_v55 = vrot.slane %v4899_v53, %v8412_v5 }
0x31fb   :  { %v5181_v17 = vrot.slane %v5173_v11, %v8412_v5  ;;  %v5454_v19 = vrot.slane %v5446_v18, %v8412_v5 }
0x31fd   :  { %v7363_v25 = vpop.eup %7362 }
0x31fe   :  { %v5654_v33 = vmul.f32 0.5, %v7363_v25  ;;  %v7365_v8 = vpop.eup %7364 }
0x3200   :  { %v5655_v37 = vadd.f32 0.5, %v5654_v33 }
0x3202   :  { %v8402_v9 = vsel %vm8092_vm5, %v7365_v8, %v5655_v37 }
0x3203   :  { %5663 = vrot.lane.b32.xlu0 %v8402_v9, %s7397_s13  ;;  %v5661_v57 = vmul.f32 %v5659_v56, %v8402_v9 }
0x3275   :  { %v5664_v43 = vpop.permute.xlu0 %5663 }
0x3276   :  { %v5666_v44 = vmul.f32 %v5664_v43, %v8402_v9 }
0x3278   :  { %5668 = vrot.lane.b32.xlu1 %v5666_v44, %s7398_s22 }
0x327c   :  { %4889 = vrot.lane.b32.xlu1 %v4884_v22, %s7405_s20 }
0x3280   :  { %4908 = vrot.lane.b32.xlu1 %v4903_v38, %s7397_s13 }
0x3284   :  { %5164 = vrot.lane.b32.xlu1 %v5159_v45, %s7405_s20 }
0x3288   :  { %5182 = vrot.lane.b32.xlu1 %v5177_v48, %s7397_s13 }
0x328c   :  { %5437 = vrot.lane.b32.xlu1 %v5432_v27, %s7405_s20 }
0x3290   :  { %5455 = vrot.lane.b32.xlu1 %v5450_v52, %s7397_s13 }
0x32ea   :  { %v5669_v60 = vpop.permute.xlu1 %5668 }
0x32eb   :  { %v5671_v34 = vadd.f32 %v5669_v60, %v5661_v57 }
0x32ed   :  { %7366 = vtanh.f32 %v5671_v34 }
0x32ee   :  { %v4890_v51 = vpop.permute.xlu1 %4889 }
0x32ef   :  { %4896 = vst.msk [vmem:[#allocation2] sm:$0x1] %vm4895_vm6, %v4890_v51 }
0x32f2   :  { %v4909_v35 = vpop.permute.xlu1 %4908 }
0x32f3   :  { %4915 = vst.msk [vmem:[#allocation2 + $0x3] sm:$0x1] %vm4914_vm7, %v4909_v35 }
0x32f6   :  { %v5165_v3 = vpop.permute.xlu1 %5164 }
0x32f7   :  { %v7367_v12 = vpop.eup %7366  ;;  %5170 = vst.msk [vmem:[#allocation2 + $0x1] sm:$0x1] %vm4895_vm6, %v5165_v3 }
0x32f8   :  { %5674 = vrot.lane.b32.xlu0 %v7367_v12, %s7401_s26  ;;  %s7406_s26 = smov [#allocation2]  }
0x32f9   :  { %s5741_s15 = sshll.u32 %s7406_s26, 4  ;;  %s5742_s15 = int_to_ptr.vmem [resolvable:$true] %s5741_s15 }
0x32fa   :  { %v5183_v14 = vpop.permute.xlu1 %5182  ;;  %p7377_p1 = scmp.lt.s32.totalorder %s5742_s15, %s5742_s15 }
0x32fb   :  { %5188 = vst.msk [vmem:[#allocation2 + $0x2] sm:$0x1] %vm4914_vm7, %v5183_v14 }
0x32fc   :  { %4891 = vrot.lane.b32.xlu0 %v4888_v15, %s7405_s20 }
0x32fe   :  { %v5438_v10 = vpop.permute.xlu1 %5437 }
0x32ff   :  { %5443 = vst.msk [vmem:[#allocation2 + $0x2] sm:$0x1] %vm4895_vm6, %v5438_v10 }
0x3300   :  { %4910 = vrot.lane.b32.xlu0 %v4907_v55, %s7397_s13 }
0x3302   :  { %v5456_v1 = vpop.permute.xlu1 %5455 }
0x3303   :  { %5461 = vst.msk [vmem:[#allocation2 + $0x1] sm:$0x1] %vm4914_vm7, %v5456_v1 }
0x3304   :  { %5166 = vrot.lane.b32.xlu0 %v5163_v7, %s7405_s20 }
0x3308   :  { %5184 = vrot.lane.b32.xlu0 %v5181_v17, %s7397_s13 }
0x330c   :  { %5439 = vrot.lane.b32.xlu0 %v5436_v16, %s7405_s20 }
0x3310   :  { %5457 = vrot.lane.b32.xlu0 %v5454_v19, %s7397_s13 }
0x336a   :  { %v5675_v20 = vpop.permute.xlu0 %5674 }
0x336b   :  { %v5677_v21 = vmul.f32 %v5675_v20, %v8402_v9 }
0x336d   :  { %v5679_v41 = vcombine.high %v5677_v21, %v5677_v21 }
0x336e   :  { %v4892_v29 = vpop.permute.xlu0 %4891 }
0x336f   :  { %v5686_v59 = vrot.slane %v5679_v41, %v8407_v61  ;;  %4897 = vst.msk [vmem:[#allocation2 + $0x4] sm:$0x1] %vm4895_vm6, %v4892_v29 }
0x3371   :  { %v5687_v24 = vcombine.high %v5686_v59, %v5686_v59  ;;  %v5694_v42 = vrot.slane %v5686_v59, %v8407_v61 }
0x3372   :  { %v4911_v25 = vpop.permute.xlu0 %4910 }
0x3373   :  { %v5701_v33 = vrot.slane %v5687_v24, %v8407_v61  ;;  %v5705_v37 = vrot.slane %v5694_v42, %v8412_v5  ;;  %v5718_v8 = vcombine.high %v5694_v42, %v5694_v42  ;;  %4916 = vst.msk [vmem:[#allocation2 + $0x7] sm:$0x1] %vm4914_vm7, %v4911_v25 }
0x3375   :  { %v5719_v2 = vcombine.high %v5701_v33, %v5701_v33  ;;  %5710 = vrot.lane.b32.xlu1 %v5705_v37, %s7405_s20  ;;  %v5709_v9 = vrot.slane %v5701_v33, %v8412_v5  ;;  %v5723_v39 = vrot.slane %v5718_v8, %v8412_v5 }
0x3376   :  { %v5167_v4 = vpop.permute.xlu0 %5166 }
0x3377   :  { %5171 = vst.msk [vmem:[#allocation2 + $0x5] sm:$0x1] %vm4895_vm6, %v5167_v4  ;;  %5712 = vrot.lane.b32.xlu0 %v5709_v9, %s7405_s20  ;;  %v5727_v40 = vrot.slane %v5719_v2, %v8412_v5 }
0x3379   :  { %5728 = vrot.lane.b32.xlu1 %v5723_v39, %s7397_s13 }
0x337a   :  { %v5185_v61 = vpop.permute.xlu0 %5184 }
0x337b   :  { %5189 = vst.msk [vmem:[#allocation2 + $0x6] sm:$0x1] %vm4914_vm7, %v5185_v61  ;;  %5730 = vrot.lane.b32.xlu0 %v5727_v40, %s7397_s13  ;;  %s7372_s13 = scalar_lea.vmem %s5742_s15, 128 }
0x337c   :  { %p7373_p0 = scmp.ne.s32.totalorder %s5742_s15, %s7372_s13  ;;  %p7378_p2 = scmp.lt.s32.totalorder %s7372_s13, %s7372_s13 }
0x337e   :  { %v5440_v28 = vpop.permute.xlu0 %5439  ;;  %p7379_p3 = por %p7378_p2, %p7377_p1 }
0x337f   :  { %5444 = vst.msk [vmem:[#allocation2 + $0x6] sm:$0x1] %vm4895_vm6, %v5440_v28 }
0x3380   :  { %p7380_p4 = pnand %p7379_p3, %p7373_p0 }
0x3382   :  { %v5458_v26 = vpop.permute.xlu0 %5457 }
0x3383   :  { %5462 = vst.msk [vmem:[#allocation2 + $0x5] sm:$0x1] %vm4914_vm7, %v5458_v26 }
0x33e7   :  { %v5711_v43 = vpop.permute.xlu1 %5710 }
0x33e8   :  { %5716 = vst.msk [vmem:[#allocation2 + $0x3] sm:$0x1] %vm4895_vm6, %v5711_v43 }
0x33e9   :  { %v5713_v31 = vpop.permute.xlu0 %5712 }
0x33ea   :  { %5717 = vst.msk [vmem:[#allocation2 + $0x7] sm:$0x1] %vm4895_vm6, %v5713_v31 }
0x33eb   :  { %v5729_v5 = vpop.permute.xlu1 %5728 }
0x33ec   :  { %5734 = vst.msk [vmem:[#allocation2] sm:$0x1] %vm4914_vm7, %v5729_v5 }
0x33ed   :  { %v5731_v44 = vpop.permute.xlu0 %5730 }
0x33ee   :  { %5735 = vst.msk [vmem:[#allocation2 + $0x4] sm:$0x1] %vm4914_vm7, %v5731_v44 }
0x33ef   :  { %7383 = shalt.err (!%p7380_p4)
}
0x33f0   :  { %s7384_s0 = scalar_lea.hbm %s8517_s21, 128 }
0x33f1   :  { %p7385_p5 = scmp.ne.s32.totalorder %s8517_s21, %s7384_s0  ;;  %p7388_p6 = scmp.lt.u32.totalorder %s7384_s0, %s8517_s21 }
0x33f3   :  { %p7390_p7 = pnand %p7388_p6, %p7385_p5 }
0x33f5   :  { %7393 = shalt.err (!%p7390_p7)
}
0x33f6   :  { %s7407_s23 = smov 64  }
0x33f7   :  { %5747 = dma.vmem_to_hbm [thread:$0]  %s5742_s15, 128, %s8517_s21, [#allocation3], %s7407_s23, %s7407_s23, %s7398_s22  }
0x33f8   :  { %7394 = dma.done.wait [#allocation3], 128  }
0x33f9   :  { %7395 = vsyncadd [#allocation3], 4294967168 }
0x33fa   :  { %5751 = vsyncpa [#allocation3], 1 }

</bundles_post_ra>
